<compile_context>
chip_gen: v5e
topology: v5e:2x2
jax: 0.10.0
libtpu: 0.0.40
codegen_flags: <defaults>
</compile_context>

<pallas_src>
import functools

import jax
import jax.numpy as jnp
from jax import lax
from jax.experimental import pallas as pl
from jax.experimental.pallas import tpu as pltpu


_VMEM_LIMIT_BYTES = 64 * 1024 * 1024  # fits v7x physical, > default scoped on v5e/v6e


def _pick_tile(dim, cap, align):
    """Largest tile <= cap that divides dim and is align-aligned (or the full dim)."""
    if dim <= cap:
        return dim
    for t in range(cap, 0, -1):
        if dim % t == 0 and t % align == 0:
            return t
    return dim  # fall back to an un-tiled (full) axis


# ---------------------------------------------------------------------------
# Kernel 1: masked mean pooling (tiled, pipelined, S-axis accumulator)
#   token_embeddings.masked_fill(~mask[..., None], 0).sum(1) / mask.sum(1)[..., None]
# ---------------------------------------------------------------------------
def _mean_pool_kernel(emb_ref, mask_ref, out_ref, acc_ref, cnt_ref):
    s_idx = pl.program_id(2)

    @pl.when(s_idx == 0)
    def _init():
        acc_ref[...] = jnp.zeros_like(acc_ref)
        cnt_ref[...] = jnp.zeros_like(cnt_ref)

    emb = emb_ref[...].astype(jnp.float32)        # (TB, TS, TH), bf16 -> f32 upcast
    mask = mask_ref[...].astype(jnp.float32)      # (TB, TS)
    acc_ref[...] += jnp.sum(emb * mask[:, :, None], axis=1)        # (TB, TH)
    cnt_ref[...] += jnp.sum(mask, axis=1, keepdims=True)           # (TB, 1)

    @pl.when(s_idx == pl.num_programs(2) - 1)
    def _finalize():
        # Clamp to >=1 so an all-padding row cannot produce inf/NaN with the
        # approximate reciprocal (reference would NaN; real inputs have >=1 token).
        denom = jnp.maximum(cnt_ref[...], 1.0)
        out_ref[...] = acc_ref[...] * pl.reciprocal(denom, approx=True)


def mean_pooling(token_embeddings, attention_mask, *, tb=None, ts=None, th=None):
    B, S, H = token_embeddings.shape
    tb = _pick_tile(B, 8, 8) if tb is None else tb        # sublane-aligned batch tile
    ts = _pick_tile(S, 128, 128) if ts is None else ts    # seq tile (mask lane dim)
    th = _pick_tile(H, 512, 128) if th is None else th    # hidden (lane) chunk
    assert B % tb == 0 and S % ts == 0 and H % th == 0
    assert tb % 8 == 0 or tb == B
    assert ts % 128 == 0 or ts == S
    assert th % 128 == 0 or th == H

    grid = (B // tb, H // th, S // ts)
    return pl.pallas_call(
        _mean_pool_kernel,
        out_shape=jax.ShapeDtypeStruct((B, H), jnp.float32),
        grid=grid,
        in_specs=[
            pl.BlockSpec((tb, ts, th), lambda b, h, s: (b, s, h)),
            pl.BlockSpec((tb, ts), lambda b, h, s: (b, s)),
        ],
        out_specs=pl.BlockSpec((tb, th), lambda b, h, s: (b, h)),
        scratch_shapes=[
            pltpu.VMEM((tb, th), jnp.float32),   # masked-sum accumulator
            pltpu.VMEM((tb, 1), jnp.float32),    # token-count accumulator
        ],
        compiler_params=pltpu.CompilerParams(
            dimension_semantics=("parallel", "parallel", "arbitrary"),
            vmem_limit_bytes=_VMEM_LIMIT_BYTES,
        ),
    )(token_embeddings, attention_mask)


# ---------------------------------------------------------------------------
# Kernel 2: similarity (q @ p^T on the MXU, NT form) + in-device-negatives CE,
#           tiled over Bp with an online (flash-style) logsumexp.
#   scores = q_reps @ p_reps.T
#   target = arange(Bq) * (Bp // Bq)
#   row_loss_i = logsumexp(scores[i]) - scores[i, target[i]]
# ---------------------------------------------------------------------------
def _sim_ce_kernel(q_ref, p_ref, scores_ref, rowloss_ref,
                   m_ref, l_ref, t_ref, *, tgt_stride):
    qi = pl.program_id(0)
    pj = pl.program_id(1)

    @pl.when(pj == 0)
    def _init():
        m_ref[...] = jnp.full_like(m_ref, -jnp.inf)
        l_ref[...] = jnp.zeros_like(l_ref)
        t_ref[...] = jnp.zeros_like(t_ref)

    q = q_ref[...]                                   # (TQ, H)
    p = p_ref[...]                                   # (TP, H)
    # NT matmul: contract the hidden axis of both operands directly on the MXU
    # (no explicit p.T, so no XLU transpose of the passage tile).
    s = lax.dot_general(q, p, (((1,), (1,)), ((), ())),
                        preferred_element_type=jnp.float32)        # (TQ, TP)
    scores_ref[...] = s                              # stream this tile out

    tq, tp = s.shape
    # Target-logit extraction, done only on this Bp tile (each target column
    # falls into exactly one tile, so the accumulation is exact).
    row_g = qi * tq + lax.broadcasted_iota(jnp.int32, (tq, tp), 0)
    col_g = pj * tp + lax.broadcasted_iota(jnp.int32, (tq, tp), 1)
    is_tgt = col_g == row_g * tgt_stride
    t_ref[...] += jnp.sum(jnp.where(is_tgt, s, 0.0), axis=1, keepdims=True)

    # Online logsumexp over the Bp axis.
    m_prev = m_ref[...]
    m_new = jnp.maximum(m_prev, jnp.max(s, axis=1, keepdims=True))
    l_ref[...] = (l_ref[...] * jnp.exp(m_prev - m_new)
                  + jnp.sum(jnp.exp(s - m_new), axis=1, keepdims=True))
    m_ref[...] = m_new

    @pl.when(pj == pl.num_programs(1) - 1)
    def _finalize():
        lse = m_ref[...] + jnp.log(l_ref[...])
        rowloss_ref[...] = lse - t_ref[...]          # per-query CE term


def similarity_and_loss(q_reps, p_reps, *, tq=None, tp=None):
    bq, h = q_reps.shape
    bp, h2 = p_reps.shape
    assert h == h2
    assert bp % bq == 0, "in-device negatives assume Bp is a multiple of Bq"
    tq = _pick_tile(bq, 128, 8) if tq is None else tq
    tp = _pick_tile(bp, 128, 128) if tp is None else tp
    assert bq % tq == 0 and bp % tp == 0
    assert tq % 8 == 0 or tq == bq
    assert tp % 128 == 0 or tp == bp

    kernel = functools.partial(_sim_ce_kernel, tgt_stride=bp // bq)
    scores, row_loss = pl.pallas_call(
        kernel,
        out_shape=(
            jax.ShapeDtypeStruct((bq, bp), jnp.float32),
            jax.ShapeDtypeStruct((bq, 1), jnp.float32),
        ),
        grid=(bq // tq, bp // tp),
        in_specs=[
            pl.BlockSpec((tq, h), lambda qi, pj: (qi, 0)),
            pl.BlockSpec((tp, h), lambda qi, pj: (pj, 0)),
        ],
        out_specs=(
            pl.BlockSpec((tq, tp), lambda qi, pj: (qi, pj)),
            pl.BlockSpec((tq, 1), lambda qi, pj: (qi, 0)),
        ),
        scratch_shapes=[
            pltpu.VMEM((tq, 1), jnp.float32),   # running max
            pltpu.VMEM((tq, 1), jnp.float32),   # running sum-exp
            pltpu.VMEM((tq, 1), jnp.float32),   # target logits
        ],
        compiler_params=pltpu.CompilerParams(
            dimension_semantics=("parallel", "arbitrary"),
            vmem_limit_bytes=_VMEM_LIMIT_BYTES,
        ),
    )(q_reps, p_reps)
    # Final mean over the Bq per-row losses is a trivial O(Bq) reduce; done
    # outside the kernel because the Bq grid axis may be core-parallel.
    loss = jnp.mean(row_loss)
    return scores, loss


# ---------------------------------------------------------------------------
# Module-equivalent forward (training branch with negatives_in_device=True,
# plus the eval-mode scores output).
# ---------------------------------------------------------------------------
@jax.jit
def dual_encoder_forward(q_hidden, q_mask, p_hidden, p_mask):
    q_reps = mean_pooling(q_hidden, q_mask)          # encode_query pooling
    p_reps = mean_pooling(p_hidden, p_mask)          # encode_passage pooling
    scores, loss = similarity_and_loss(q_reps, p_reps)
    return q_reps, p_reps, scores, loss


# ---------------------------------------------------------------------------
# Plain-JAX reference
# ---------------------------------------------------------------------------
def _reference(q_hidden, q_mask, p_hidden, p_mask):
    def pool(hdn, m):
        mf = m.astype(jnp.float32)
        return (hdn.astype(jnp.float32) * mf[:, :, None]).sum(1) / mf.sum(1, keepdims=True)

    q = pool(q_hidden, q_mask)
    p = pool(p_hidden, p_mask)
    scores = lax.dot_general(q, p, (((1,), (1,)), ((), ())),
                             precision=lax.Precision.HIGHEST)
    bq, bp = scores.shape
    tgt = jnp.arange(bq) * (bp // bq)
    lse = jax.scipy.special.logsumexp(scores, axis=1)
    loss = jnp.mean(lse - scores[jnp.arange(bq), tgt])
    return q, p, scores, loss


if __name__ == "__main__":
    # Small but tiling-exercising shapes: 8 queries, 256 passages (32 per query),
    # seq=256 (2 seq tiles -> accumulator path), hidden=128 (one lane tile).
    Bq, Bp, S, H = 8, 256, 256, 128
    key = jax.random.PRNGKey(0)
    k1, k2, k3, k4 = jax.random.split(key, 4)

    # Synthetic "last hidden states" standing in for the transformer outputs.
    q_hidden = jax.random.normal(k1, (Bq, S, H), dtype=jnp.float32)
    p_hidden = jax.random.normal(k2, (Bp, S, H), dtype=jnp.float32)

    # Attention masks with padding (always at least 32 valid tokens).
    q_len = jax.random.randint(k3, (Bq,), 32, S + 1)
    p_len = jax.random.randint(k4, (Bp,), 32, S + 1)
    q_mask = (jnp.arange(S)[None, :] < q_len[:, None]).astype(jnp.int32)
    p_mask = (jnp.arange(S)[None, :] < p_len[:, None]).astype(jnp.int32)

    q_reps, p_reps, scores, loss = dual_encoder_forward(q_hidden, q_mask,
                                                        p_hidden, p_mask)
    jax.block_until_ready((q_reps, p_reps, scores, loss))

    # Sanity check against a plain-JAX reference.
    rq, rp, rs, rl = _reference(q_hidden, q_mask, p_hidden, p_mask)
    assert jnp.allclose(q_reps, rq, rtol=2e-3, atol=2e-3)
    assert jnp.allclose(p_reps, rp, rtol=2e-3, atol=2e-3)
    assert jnp.allclose(scores, rs, rtol=2e-3, atol=2e-3)
    assert jnp.allclose(loss, rl, rtol=2e-3, atol=2e-3)

    print("KERNEL_OK")
</pallas_src>

<mosaic_0001>
module attributes {stable_mosaic.version = 11 : i64} {
  func.func @_mean_pool_kernel(%arg0: i32, %arg1: i32, %arg2: i32, %arg3: memref<8x128x128xf32, #tpu.memory_space<vmem>>, %arg4: memref<8x128xi32, #tpu.memory_space<vmem>>, %arg5: memref<8x128xf32, #tpu.memory_space<vmem>>, %arg6: memref<8x128xf32, #tpu.memory_space<vmem>>, %arg7: memref<8x1xf32, #tpu.memory_space<vmem>>) attributes {dimension_semantics = [#tpu.dimension_semantics<parallel>, #tpu.dimension_semantics<parallel>, #tpu.dimension_semantics<arbitrary>], iteration_bounds = array<i64: 1, 1, 2>, scalar_prefetch = 0 : i64, scratch_operands = 2 : i64, tpu.core_type = #tpu.core_type<tc>, window_params = [{transform_indices = @transform_0, window_bounds = array<i64: 8, 128, 128>}, {transform_indices = @transform_1, window_bounds = array<i64: 8, 128>}, {transform_indices = @transform_2, window_bounds = array<i64: 8, 128>}]} {
    %c0_i32 = arith.constant 0 : i32
    %0 = arith.cmpi eq, %arg2, %c0_i32 : i32
    %1 = arith.extui %0 : i1 to i32
    %c0_i32_0 = arith.constant 0 : i32
    %2 = arith.cmpi ne, %1, %c0_i32_0 : i32
    scf.if %2 {
      %cst_15 = arith.constant 0.000000e+00 : f32
      %21 = vector.broadcast %cst_15 : f32 to vector<8x128xf32>
      %c0_16 = arith.constant 0 : index
      %c0_17 = arith.constant 0 : index
      %22 = vector.load %arg6[%c0_16, %c0_17] : memref<8x128xf32, #tpu.memory_space<vmem>>, vector<8x128xf32>
      tpu.vector_store %arg6[%c0_16, %c0_17], %21 {strides = array<i32>} : memref<8x128xf32, #tpu.memory_space<vmem>>, vector<8x128xf32>,
      %cst_18 = arith.constant 0.000000e+00 : f32
      %23 = vector.broadcast %cst_18 : f32 to vector<8x1xf32>
      %c0_19 = arith.constant 0 : index
      %c0_20 = arith.constant 0 : index
      %24 = vector.load %arg7[%c0_19, %c0_20] : memref<8x1xf32, #tpu.memory_space<vmem>>, vector<8x1xf32>
      tpu.vector_store %arg7[%c0_19, %c0_20], %23 {strides = array<i32>} : memref<8x1xf32, #tpu.memory_space<vmem>>, vector<8x1xf32>,
    } else {
    }
    %c0 = arith.constant 0 : index
    %c0_1 = arith.constant 0 : index
    %c0_2 = arith.constant 0 : index
    %3 = vector.load %arg3[%c0, %c0_1, %c0_2] : memref<8x128x128xf32, #tpu.memory_space<vmem>>, vector<8x128x128xf32>
    %c0_3 = arith.constant 0 : index
    %c0_4 = arith.constant 0 : index
    %4 = vector.load %arg4[%c0_3, %c0_4] : memref<8x128xi32, #tpu.memory_space<vmem>>, vector<8x128xi32>
    %5 = arith.sitofp %4 : vector<8x128xi32> to vector<8x128xf32>
    %c0_5 = arith.constant 0 : index
    %c0_6 = arith.constant 0 : index
    %6 = vector.load %arg6[%c0_5, %c0_6] : memref<8x128xf32, #tpu.memory_space<vmem>>, vector<8x128xf32>
    %7 = vector.shape_cast %5 : vector<8x128xf32> to vector<8x128x1xf32>
    %8 = vector.broadcast %7 : vector<8x128x1xf32> to vector<8x128x128xf32>
    %9 = arith.mulf %3, %8 : vector<8x128x128xf32>
    %cst = arith.constant dense<0.000000e+00> : vector<8x128xf32>
    %10 = vector.multi_reduction <add>, %9, %cst [1] : vector<8x128x128xf32> to vector<8x128xf32>
    %11 = arith.addf %6, %10 : vector<8x128xf32>
    %c0_7 = arith.constant 0 : index
    %c0_8 = arith.constant 0 : index
    %12 = vector.load %arg6[%c0_7, %c0_8] : memref<8x128xf32, #tpu.memory_space<vmem>>, vector<8x128xf32>
    tpu.vector_store %arg6[%c0_7, %c0_8], %11 {strides = array<i32>} : memref<8x128xf32, #tpu.memory_space<vmem>>, vector<8x128xf32>,
    %c0_9 = arith.constant 0 : index
    %c0_10 = arith.constant 0 : index
    %13 = vector.load %arg7[%c0_9, %c0_10] : memref<8x1xf32, #tpu.memory_space<vmem>>, vector<8x1xf32>
    %cst_11 = arith.constant dense<0.000000e+00> : vector<8xf32>
    %14 = vector.multi_reduction <add>, %5, %cst_11 [1] : vector<8x128xf32> to vector<8xf32>
    %15 = vector.shape_cast %14 : vector<8xf32> to vector<8x1xf32>
    %16 = arith.addf %13, %15 : vector<8x1xf32>
    %c0_12 = arith.constant 0 : index
    %c0_13 = arith.constant 0 : index
    %17 = vector.load %arg7[%c0_12, %c0_13] : memref<8x1xf32, #tpu.memory_space<vmem>>, vector<8x1xf32>
    tpu.vector_store %arg7[%c0_12, %c0_13], %16 {strides = array<i32>} : memref<8x1xf32, #tpu.memory_space<vmem>>, vector<8x1xf32>,
    %c1_i32 = arith.constant 1 : i32
    %18 = arith.cmpi eq, %arg2, %c1_i32 : i32
    %19 = arith.extui %18 : i1 to i32
    %c0_i32_14 = arith.constant 0 : i32
    %20 = arith.cmpi ne, %19, %c0_i32_14 : i32
    scf.if %20 {
      %c0_15 = arith.constant 0 : index
      %c0_16 = arith.constant 0 : index
      %21 = vector.load %arg7[%c0_15, %c0_16] : memref<8x1xf32, #tpu.memory_space<vmem>>, vector<8x1xf32>
      %cst_17 = arith.constant 1.000000e+00 : f32
      %22 = vector.broadcast %cst_17 : f32 to vector<8x1xf32>
      %23 = arith.maximumf %21, %22 : vector<8x1xf32>
      %c0_18 = arith.constant 0 : index
      %c0_19 = arith.constant 0 : index
      %24 = vector.load %arg6[%c0_18, %c0_19] : memref<8x128xf32, #tpu.memory_space<vmem>>, vector<8x128xf32>
      %25 = tpu.reciprocal %23 {approx = true} : vector<8x1xf32> -> vector<8x1xf32>
      %26 = vector.broadcast %25 : vector<8x1xf32> to vector<8x128xf32>
      %27 = arith.mulf %24, %26 : vector<8x128xf32>
      %c0_20 = arith.constant 0 : index
      %c0_21 = arith.constant 0 : index
      %28 = vector.load %arg5[%c0_20, %c0_21] : memref<8x128xf32, #tpu.memory_space<vmem>>, vector<8x128xf32>
      tpu.vector_store %arg5[%c0_20, %c0_21], %27 {strides = array<i32>} : memref<8x128xf32, #tpu.memory_space<vmem>>, vector<8x128xf32>,
    } else {
    }
    return
  }
  func.func @transform_0(%arg0: i32, %arg1: i32, %arg2: i32) -> (i32, i32, i32) {
    %c0_i32 = arith.constant 0 : i32
    return %arg0, %arg2, %arg1 : i32, i32, i32
  }
  func.func @transform_1(%arg0: i32, %arg1: i32, %arg2: i32) -> (i32, i32) {
    %c0_i32 = arith.constant 0 : i32
    return %arg0, %arg2 : i32, i32
  }
  func.func @transform_2(%arg0: i32, %arg1: i32, %arg2: i32) -> (i32, i32) {
    %c0_i32 = arith.constant 0 : i32
    return %arg0, %arg1 : i32, i32
  }
}

module attributes {stable_mosaic.version = 11 : i64} {
  func.func @_sim_ce_kernel(%arg0: i32, %arg1: i32, %arg2: memref<8x128xf32, #tpu.memory_space<vmem>>, %arg3: memref<128x128xf32, #tpu.memory_space<vmem>>, %arg4: memref<8x128xf32, #tpu.memory_space<vmem>>, %arg5: memref<8x1xf32, #tpu.memory_space<vmem>>, %arg6: memref<8x1xf32, #tpu.memory_space<vmem>>, %arg7: memref<8x1xf32, #tpu.memory_space<vmem>>, %arg8: memref<8x1xf32, #tpu.memory_space<vmem>>) attributes {dimension_semantics = [#tpu.dimension_semantics<parallel>, #tpu.dimension_semantics<arbitrary>], iteration_bounds = array<i64: 1, 2>, scalar_prefetch = 0 : i64, scratch_operands = 3 : i64, tpu.core_type = #tpu.core_type<tc>, window_params = [{transform_indices = @transform_0, window_bounds = array<i64: 8, 128>}, {transform_indices = @transform_1, window_bounds = array<i64: 128, 128>}, {transform_indices = @transform_2, window_bounds = array<i64: 8, 128>}, {transform_indices = @transform_3, window_bounds = array<i64: 8, 1>}]} {
    %c0_i32 = arith.constant 0 : i32
    %0 = arith.cmpi eq, %arg1, %c0_i32 : i32
    %1 = arith.extui %0 : i1 to i32
    %c0_i32_0 = arith.constant 0 : i32
    %2 = arith.cmpi ne, %1, %c0_i32_0 : i32
    scf.if %2 {
      %cst_23 = arith.constant 0xFF800000 : f32
      %44 = vector.broadcast %cst_23 : f32 to vector<8x1xf32>
      %c0_24 = arith.constant 0 : index
      %c0_25 = arith.constant 0 : index
      %45 = vector.load %arg6[%c0_24, %c0_25] : memref<8x1xf32, #tpu.memory_space<vmem>>, vector<8x1xf32>
      tpu.vector_store %arg6[%c0_24, %c0_25], %44 {strides = array<i32>} : memref<8x1xf32, #tpu.memory_space<vmem>>, vector<8x1xf32>,
      %cst_26 = arith.constant 0.000000e+00 : f32
      %46 = vector.broadcast %cst_26 : f32 to vector<8x1xf32>
      %c0_27 = arith.constant 0 : index
      %c0_28 = arith.constant 0 : index
      %47 = vector.load %arg7[%c0_27, %c0_28] : memref<8x1xf32, #tpu.memory_space<vmem>>, vector<8x1xf32>
      tpu.vector_store %arg7[%c0_27, %c0_28], %46 {strides = array<i32>} : memref<8x1xf32, #tpu.memory_space<vmem>>, vector<8x1xf32>,
      %cst_29 = arith.constant 0.000000e+00 : f32
      %48 = vector.broadcast %cst_29 : f32 to vector<8x1xf32>
      %c0_30 = arith.constant 0 : index
      %c0_31 = arith.constant 0 : index
      %49 = vector.load %arg8[%c0_30, %c0_31] : memref<8x1xf32, #tpu.memory_space<vmem>>, vector<8x1xf32>
      tpu.vector_store %arg8[%c0_30, %c0_31], %48 {strides = array<i32>} : memref<8x1xf32, #tpu.memory_space<vmem>>, vector<8x1xf32>,
    } else {
    }
    %c0 = arith.constant 0 : index
    %c0_1 = arith.constant 0 : index
    %3 = vector.load %arg2[%c0, %c0_1] : memref<8x128xf32, #tpu.memory_space<vmem>>, vector<8x128xf32>
    %c0_2 = arith.constant 0 : index
    %c0_3 = arith.constant 0 : index
    %4 = vector.load %arg3[%c0_2, %c0_3] : memref<128x128xf32, #tpu.memory_space<vmem>>, vector<128x128xf32>
    %cst = arith.constant dense<0.000000e+00> : vector<8x128xf32>
    %5 = tpu.matmul %3, %4, %cst {dimension_numbers = #tpu.dot_dimension_numbers<[1], [1], [0], [0], [0, 0, 1, 0], [], []>} : vector<8x128xf32>, vector<128x128xf32>, vector<8x128xf32> -> vector<8x128xf32>
    %c0_4 = arith.constant 0 : index
    %c0_5 = arith.constant 0 : index
    %6 = vector.load %arg4[%c0_4, %c0_5] : memref<8x128xf32, #tpu.memory_space<vmem>>, vector<8x128xf32>
    tpu.vector_store %arg4[%c0_4, %c0_5], %5 {strides = array<i32>} : memref<8x128xf32, #tpu.memory_space<vmem>>, vector<8x128xf32>,
    %c8_i32 = arith.constant 8 : i32
    %7 = arith.muli %arg0, %c8_i32 : i32
    %8 = tpu.iota {dimensions = array<i32: 0>} : vector<8x128xi32>
    %9 = vector.broadcast %7 : i32 to vector<8x128xi32>
    %10 = arith.addi %9, %8 : vector<8x128xi32>
    %c128_i32 = arith.constant 128 : i32
    %11 = arith.muli %arg1, %c128_i32 : i32
    %12 = tpu.iota {dimensions = array<i32: 1>} : vector<8x128xi32>
    %13 = vector.broadcast %11 : i32 to vector<8x128xi32>
    %14 = arith.addi %13, %12 : vector<8x128xi32>
    %c32_i32 = arith.constant 32 : i32
    %15 = vector.broadcast %c32_i32 : i32 to vector<8x128xi32>
    %16 = arith.muli %10, %15 : vector<8x128xi32>
    %17 = arith.cmpi eq, %14, %16 : vector<8x128xi32>
    %c0_6 = arith.constant 0 : index
    %c0_7 = arith.constant 0 : index
    %18 = vector.load %arg8[%c0_6, %c0_7] : memref<8x1xf32, #tpu.memory_space<vmem>>, vector<8x1xf32>
    %cst_8 = arith.constant 0.000000e+00 : f32
    %19 = vector.broadcast %cst_8 : f32 to vector<8x128xf32>
    %20 = arith.select %17, %5, %19 : vector<8x128xi1>, vector<8x128xf32>
    %cst_9 = arith.constant dense<0.000000e+00> : vector<8xf32>
    %21 = vector.multi_reduction <add>, %20, %cst_9 [1] : vector<8x128xf32> to vector<8xf32>
    %22 = vector.shape_cast %21 : vector<8xf32> to vector<8x1xf32>
    %23 = arith.addf %18, %22 : vector<8x1xf32>
    %c0_10 = arith.constant 0 : index
    %c0_11 = arith.constant 0 : index
    %24 = vector.load %arg8[%c0_10, %c0_11] : memref<8x1xf32, #tpu.memory_space<vmem>>, vector<8x1xf32>
    tpu.vector_store %arg8[%c0_10, %c0_11], %23 {strides = array<i32>} : memref<8x1xf32, #tpu.memory_space<vmem>>, vector<8x1xf32>,
    %c0_12 = arith.constant 0 : index
    %c0_13 = arith.constant 0 : index
    %25 = vector.load %arg6[%c0_12, %c0_13] : memref<8x1xf32, #tpu.memory_space<vmem>>, vector<8x1xf32>
    %cst_14 = arith.constant dense<0xFF800000> : vector<8xf32>
    %26 = vector.multi_reduction <maximumf>, %5, %cst_14 [1] : vector<8x128xf32> to vector<8xf32>
    %27 = vector.shape_cast %26 : vector<8xf32> to vector<8x1xf32>
    %28 = arith.maximumf %25, %27 : vector<8x1xf32>
    %c0_15 = arith.constant 0 : index
    %c0_16 = arith.constant 0 : index
    %29 = vector.load %arg7[%c0_15, %c0_16] : memref<8x1xf32, #tpu.memory_space<vmem>>, vector<8x1xf32>
    %30 = arith.subf %25, %28 : vector<8x1xf32>
    %31 = math.exp %30 : vector<8x1xf32>
    %32 = arith.mulf %29, %31 : vector<8x1xf32>
    %33 = vector.broadcast %28 : vector<8x1xf32> to vector<8x128xf32>
    %34 = arith.subf %5, %33 : vector<8x128xf32>
    %35 = math.exp %34 : vector<8x128xf32>
    %cst_17 = arith.constant dense<0.000000e+00> : vector<8xf32>
    %36 = vector.multi_reduction <add>, %35, %cst_17 [1] : vector<8x128xf32> to vector<8xf32>
    %37 = vector.shape_cast %36 : vector<8xf32> to vector<8x1xf32>
    %38 = arith.addf %32, %37 : vector<8x1xf32>
    %c0_18 = arith.constant 0 : index
    %c0_19 = arith.constant 0 : index
    %39 = vector.load %arg7[%c0_18, %c0_19] : memref<8x1xf32, #tpu.memory_space<vmem>>, vector<8x1xf32>
    tpu.vector_store %arg7[%c0_18, %c0_19], %38 {strides = array<i32>} : memref<8x1xf32, #tpu.memory_space<vmem>>, vector<8x1xf32>,
    %c0_20 = arith.constant 0 : index
    %c0_21 = arith.constant 0 : index
    %40 = vector.load %arg6[%c0_20, %c0_21] : memref<8x1xf32, #tpu.memory_space<vmem>>, vector<8x1xf32>
    tpu.vector_store %arg6[%c0_20, %c0_21], %28 {strides = array<i32>} : memref<8x1xf32, #tpu.memory_space<vmem>>, vector<8x1xf32>,
    %c1_i32 = arith.constant 1 : i32
    %41 = arith.cmpi eq, %arg1, %c1_i32 : i32
    %42 = arith.extui %41 : i1 to i32
    %c0_i32_22 = arith.constant 0 : i32
    %43 = arith.cmpi ne, %42, %c0_i32_22 : i32
    scf.if %43 {
      %c0_23 = arith.constant 0 : index
      %c0_24 = arith.constant 0 : index
      %44 = vector.load %arg6[%c0_23, %c0_24] : memref<8x1xf32, #tpu.memory_space<vmem>>, vector<8x1xf32>
      %c0_25 = arith.constant 0 : index
      %c0_26 = arith.constant 0 : index
      %45 = vector.load %arg7[%c0_25, %c0_26] : memref<8x1xf32, #tpu.memory_space<vmem>>, vector<8x1xf32>
      %46 = math.log %45 : vector<8x1xf32>
      %47 = arith.addf %44, %46 : vector<8x1xf32>
      %c0_27 = arith.constant 0 : index
      %c0_28 = arith.constant 0 : index
      %48 = vector.load %arg8[%c0_27, %c0_28] : memref<8x1xf32, #tpu.memory_space<vmem>>, vector<8x1xf32>
      %49 = arith.subf %47, %48 : vector<8x1xf32>
      %c0_29 = arith.constant 0 : index
      %c0_30 = arith.constant 0 : index
      %50 = vector.load %arg5[%c0_29, %c0_30] : memref<8x1xf32, #tpu.memory_space<vmem>>, vector<8x1xf32>
      tpu.vector_store %arg5[%c0_29, %c0_30], %49 {strides = array<i32>} : memref<8x1xf32, #tpu.memory_space<vmem>>, vector<8x1xf32>,
    } else {
    }
    return
  }
  func.func @transform_0(%arg0: i32, %arg1: i32) -> (i32, i32) {
    %c0_i32 = arith.constant 0 : i32
    %c0_i32_0 = arith.constant 0 : i32
    return %arg0, %c0_i32 : i32, i32
  }
  func.func @transform_1(%arg0: i32, %arg1: i32) -> (i32, i32) {
    %c0_i32 = arith.constant 0 : i32
    %c0_i32_0 = arith.constant 0 : i32
    return %arg1, %c0_i32 : i32, i32
  }
  func.func @transform_2(%arg0: i32, %arg1: i32) -> (i32, i32) {
    %c0_i32 = arith.constant 0 : i32
    return %arg0, %arg1 : i32, i32
  }
  func.func @transform_3(%arg0: i32, %arg1: i32) -> (i32, i32) {
    %c0_i32 = arith.constant 0 : i32
    %c0_i32_0 = arith.constant 0 : i32
    return %arg0, %c0_i32 : i32, i32
  }
}

module attributes {stable_mosaic.version = 11 : i64} {
  func.func @_mean_pool_kernel(%arg0: i32, %arg1: i32, %arg2: i32, %arg3: memref<8x128x128xf32, #tpu.memory_space<vmem>>, %arg4: memref<8x128xi32, #tpu.memory_space<vmem>>, %arg5: memref<8x128xf32, #tpu.memory_space<vmem>>, %arg6: memref<8x128xf32, #tpu.memory_space<vmem>>, %arg7: memref<8x1xf32, #tpu.memory_space<vmem>>) attributes {dimension_semantics = [#tpu.dimension_semantics<parallel>, #tpu.dimension_semantics<parallel>, #tpu.dimension_semantics<arbitrary>], iteration_bounds = array<i64: 32, 1, 2>, scalar_prefetch = 0 : i64, scratch_operands = 2 : i64, tpu.core_type = #tpu.core_type<tc>, window_params = [{transform_indices = @transform_0, window_bounds = array<i64: 8, 128, 128>}, {transform_indices = @transform_1, window_bounds = array<i64: 8, 128>}, {transform_indices = @transform_2, window_bounds = array<i64: 8, 128>}]} {
    %c0_i32 = arith.constant 0 : i32
    %0 = arith.cmpi eq, %arg2, %c0_i32 : i32
    %1 = arith.extui %0 : i1 to i32
    %c0_i32_0 = arith.constant 0 : i32
    %2 = arith.cmpi ne, %1, %c0_i32_0 : i32
    scf.if %2 {
      %cst_15 = arith.constant 0.000000e+00 : f32
      %21 = vector.broadcast %cst_15 : f32 to vector<8x128xf32>
      %c0_16 = arith.constant 0 : index
      %c0_17 = arith.constant 0 : index
      %22 = vector.load %arg6[%c0_16, %c0_17] : memref<8x128xf32, #tpu.memory_space<vmem>>, vector<8x128xf32>
      tpu.vector_store %arg6[%c0_16, %c0_17], %21 {strides = array<i32>} : memref<8x128xf32, #tpu.memory_space<vmem>>, vector<8x128xf32>,
      %cst_18 = arith.constant 0.000000e+00 : f32
      %23 = vector.broadcast %cst_18 : f32 to vector<8x1xf32>
      %c0_19 = arith.constant 0 : index
      %c0_20 = arith.constant 0 : index
      %24 = vector.load %arg7[%c0_19, %c0_20] : memref<8x1xf32, #tpu.memory_space<vmem>>, vector<8x1xf32>
      tpu.vector_store %arg7[%c0_19, %c0_20], %23 {strides = array<i32>} : memref<8x1xf32, #tpu.memory_space<vmem>>, vector<8x1xf32>,
    } else {
    }
    %c0 = arith.constant 0 : index
    %c0_1 = arith.constant 0 : index
    %c0_2 = arith.constant 0 : index
    %3 = vector.load %arg3[%c0, %c0_1, %c0_2] : memref<8x128x128xf32, #tpu.memory_space<vmem>>, vector<8x128x128xf32>
    %c0_3 = arith.constant 0 : index
    %c0_4 = arith.constant 0 : index
    %4 = vector.load %arg4[%c0_3, %c0_4] : memref<8x128xi32, #tpu.memory_space<vmem>>, vector<8x128xi32>
    %5 = arith.sitofp %4 : vector<8x128xi32> to vector<8x128xf32>
    %c0_5 = arith.constant 0 : index
    %c0_6 = arith.constant 0 : index
    %6 = vector.load %arg6[%c0_5, %c0_6] : memref<8x128xf32, #tpu.memory_space<vmem>>, vector<8x128xf32>
    %7 = vector.shape_cast %5 : vector<8x128xf32> to vector<8x128x1xf32>
    %8 = vector.broadcast %7 : vector<8x128x1xf32> to vector<8x128x128xf32>
    %9 = arith.mulf %3, %8 : vector<8x128x128xf32>
    %cst = arith.constant dense<0.000000e+00> : vector<8x128xf32>
    %10 = vector.multi_reduction <add>, %9, %cst [1] : vector<8x128x128xf32> to vector<8x128xf32>
    %11 = arith.addf %6, %10 : vector<8x128xf32>
    %c0_7 = arith.constant 0 : index
    %c0_8 = arith.constant 0 : index
    %12 = vector.load %arg6[%c0_7, %c0_8] : memref<8x128xf32, #tpu.memory_space<vmem>>, vector<8x128xf32>
    tpu.vector_store %arg6[%c0_7, %c0_8], %11 {strides = array<i32>} : memref<8x128xf32, #tpu.memory_space<vmem>>, vector<8x128xf32>,
    %c0_9 = arith.constant 0 : index
    %c0_10 = arith.constant 0 : index
    %13 = vector.load %arg7[%c0_9, %c0_10] : memref<8x1xf32, #tpu.memory_space<vmem>>, vector<8x1xf32>
    %cst_11 = arith.constant dense<0.000000e+00> : vector<8xf32>
    %14 = vector.multi_reduction <add>, %5, %cst_11 [1] : vector<8x128xf32> to vector<8xf32>
    %15 = vector.shape_cast %14 : vector<8xf32> to vector<8x1xf32>
    %16 = arith.addf %13, %15 : vector<8x1xf32>
    %c0_12 = arith.constant 0 : index
    %c0_13 = arith.constant 0 : index
    %17 = vector.load %arg7[%c0_12, %c0_13] : memref<8x1xf32, #tpu.memory_space<vmem>>, vector<8x1xf32>
    tpu.vector_store %arg7[%c0_12, %c0_13], %16 {strides = array<i32>} : memref<8x1xf32, #tpu.memory_space<vmem>>, vector<8x1xf32>,
    %c1_i32 = arith.constant 1 : i32
    %18 = arith.cmpi eq, %arg2, %c1_i32 : i32
    %19 = arith.extui %18 : i1 to i32
    %c0_i32_14 = arith.constant 0 : i32
    %20 = arith.cmpi ne, %19, %c0_i32_14 : i32
    scf.if %20 {
      %c0_15 = arith.constant 0 : index
      %c0_16 = arith.constant 0 : index
      %21 = vector.load %arg7[%c0_15, %c0_16] : memref<8x1xf32, #tpu.memory_space<vmem>>, vector<8x1xf32>
      %cst_17 = arith.constant 1.000000e+00 : f32
      %22 = vector.broadcast %cst_17 : f32 to vector<8x1xf32>
      %23 = arith.maximumf %21, %22 : vector<8x1xf32>
      %c0_18 = arith.constant 0 : index
      %c0_19 = arith.constant 0 : index
      %24 = vector.load %arg6[%c0_18, %c0_19] : memref<8x128xf32, #tpu.memory_space<vmem>>, vector<8x128xf32>
      %25 = tpu.reciprocal %23 {approx = true} : vector<8x1xf32> -> vector<8x1xf32>
      %26 = vector.broadcast %25 : vector<8x1xf32> to vector<8x128xf32>
      %27 = arith.mulf %24, %26 : vector<8x128xf32>
      %c0_20 = arith.constant 0 : index
      %c0_21 = arith.constant 0 : index
      %28 = vector.load %arg5[%c0_20, %c0_21] : memref<8x128xf32, #tpu.memory_space<vmem>>, vector<8x128xf32>
      tpu.vector_store %arg5[%c0_20, %c0_21], %27 {strides = array<i32>} : memref<8x128xf32, #tpu.memory_space<vmem>>, vector<8x128xf32>,
    } else {
    }
    return
  }
  func.func @transform_0(%arg0: i32, %arg1: i32, %arg2: i32) -> (i32, i32, i32) {
    %c0_i32 = arith.constant 0 : i32
    return %arg0, %arg2, %arg1 : i32, i32, i32
  }
  func.func @transform_1(%arg0: i32, %arg1: i32, %arg2: i32) -> (i32, i32) {
    %c0_i32 = arith.constant 0 : i32
    return %arg0, %arg2 : i32, i32
  }
  func.func @transform_2(%arg0: i32, %arg1: i32, %arg2: i32) -> (i32, i32) {
    %c0_i32 = arith.constant 0 : i32
    return %arg0, %arg1 : i32, i32
  }
}

</mosaic_0001>

<bundles_post_ra>
// kernel: dual_encoder_forward.5
= control target key start
LH: loop header
LB: loop body
LE: loop exit
PB: predicated region body
PF: predicated region fallthrough
CT: control target
= control target key end

     0   :  { %9 = vsyncpa [#allocation6], 0  ;;  %s765_s0 = inlined_call_operand.vmem [shape: f32[8,128], index: 0, kind: input, shape index: {}]   ;;  %s766_s1 = inlined_call_operand.vmem [shape: f32[256,128], index: 1, kind: input, shape index: {}]   ;;  %s767_s2 = inlined_call_operand.hbm [shape: f32[8,256], index: 2, kind: output, shape index: {0}]   ;;  %s768_s3 = inlined_call_operand.vmem [shape: f32[8,1], index: 3, kind: output, shape index: {1}]  }
   0x1   :  { %11 = vsyncpa [#allocation6 + $0x1], 0  ;;  %s627_s12 = smov 0   ;;  %s629_s13 = smov 0  }
   0x2   :  { %s631_s14 = smov 0   ;;  %s633_s15 = smov 0  }
   0x3   :  { %s635_s16 = smov 0   ;;  %s637_s17 = smov 0  }
   0x4 LB: > { %s442_s18 = sadd.s32 4294967295, %s602_s17   ;;  %s443_s19 = sadd.s32 4294967294, %s602_s17   ;;  %s602_s17 = sphi %s637_s17, %s17_s17   ;;  %s598_s16 = sphi %s635_s16, %s775_s16   ;;  %s594_s15 = sphi %s633_s15, %s774_s15   ;;  %s590_s14 = sphi %s631_s14, %s773_s14   ;;  %s586_s13 = sphi %s629_s13, %s772_s13   ;;  %s582_s12 = sphi %s627_s12, %s771_s12  }
   0x5   : > { %s26_s20 = sadd.s32 1, %s598_s16  ;;  %s90_s21 = sadd.s32 1, %s590_s14 }
   0x6   : > { %p27_p0 = scmp.ge.s32.totalorder %s26_s20, 2  ;;  %p100_p1 = scmp.ne.s32.totalorder %s590_s14, %s586_s13 }
   0x7   : > { %p101_p2 = scmp.eq.s32.totalorder %s442_s18, 1  ;;  %p106_p3 = scmp.ne.s32.totalorder %s586_s13, %s582_s12 }
   0x8   : > { %s777_s20 = smov (%p27_p0, %s26_s20), 0  ;;  %p107_p5 = scmp.eq.s32.totalorder %s443_s19, 1 }
   0x9   : > { %p667_p4 = por %p101_p2, %p100_p1  ;;  %s86_s23 = ssub.s32 %s598_s16, %s777_s20 }
   0xa   : > { %p447_p6 = scmp.ge.s32.totalorder %s602_s17, 1  ;;  %p88_p7 = scmp.eq.s32.totalorder %s86_s23, 0 }
   0xb   : > { %p674_p8 = por %p107_p5, %p106_p3  ;;  %p167_p9 = scmp.lt.s32.totalorder %s602_s17, 3 }
   0xc   : > { %s680_s25 = scalar_select %p88_p7, %s590_s14, %s90_s21  }
   0xd   : > { %p168_p10 = pnand %p447_p6, %p167_p9 }
   0xe   : > { %s190_s26 = sand.u32 (!%p168_p10), 1, %s586_s13   ;;  %s449_s27 = sshll.u32 (!%p168_p10), %s594_s15, 4 }
   0xf   : > { %171 = sbr.rel (%p168_p10) target bundleno = 618 (0x26a), region = 28  ;;  %s686_s28 = sshll.u32 (!%p168_p10), %s190_s26, 3 }
  0x10   : > { %p204_p11 = scmp.lt.s32.totalorder (!%p168_p10), %s449_s27, 31  ;;  %s192_s6 = scalar_lea.vmem (!%p168_p10), [#allocation5], %s686_s28 }
  0x11   : > { %p451_p12 = scmp.ne.s32.totalorder (!%p168_p10), %s594_s15, 0 }
  0x14   : > { %s779_s27 = smov (!%p204_p11, %s449_s27), 31  ;;  %216 = sbr.rel (%p451_p12) target bundleno = 29 (0x1d), region = 32 }
  0x15   : > { %s450_s29 = sshll.u32 %s779_s27, 3 }
  0x16   : > { %s691_s5 = scalar_lea.vmem %s766_s1, %s450_s29 }
  0x19   : > { %vm217_vm0 = vcmask 7168   ;;  %v604_v0 = vmov -inf   ;;  %v605_v1 = vmov 0.0  }
  0x1a   : > { %218 = vst.msk [vmem:[#allocation2] sm:$0xff] %vm217_vm0, %v604_v0 }
  0x1b   : > { %219 = vst.msk [vmem:[#allocation3] sm:$0xff] %vm217_vm0, %v605_v1 }
  0x1c   : > { %220 = vst.msk [vmem:[#allocation4] sm:$0xff] %vm217_vm0, %v605_v1 }
  0x1d PF: > { %v237_v2 = vld [vmem:[%s691_s5 + $0x78] sm:$0xff]  ;;  %v236_v3 = vld [vmem:[%s691_s5 + $0x70] sm:$0xff]  ;;  %v235_v4 = vld [vmem:[%s691_s5 + $0x68] sm:$0xff]  ;;  %v260_v19 = vlaneseq  ;;  %s452_s9 = sshll.u32 %s594_s15, 7  ;;  %v606_v27 = vmov 0   ;;  %vm276_vm2 = vcmask 7168  }
  0x1e   : > { %238 = vmatpush.xpose.msra.mxu0 %v237_v2  ;;  %v234_v5 = vld [vmem:[%s691_s5 + $0x60] sm:$0xff]  ;;  %v233_v6 = vld [vmem:[%s691_s5 + $0x58] sm:$0xff]  ;;  %v232_v7 = vld [vmem:[%s691_s5 + $0x50] sm:$0xff]  ;;  %v267_v22 = vstv %s452_s9  ;;  %517 = vset.pattern.permute.xlu0 %v606_v27  ;;  %p453_p13 = scmp.ne.s32.totalorder %s594_s15, 1 }
  0x1f   : > { %v231_v8 = vld [vmem:[%s691_s5 + $0x48] sm:$0xff]  ;;  %v230_v9 = vld [vmem:[%s691_s5 + $0x40] sm:$0xff]  ;;  %v229_v10 = vld [vmem:[%s691_s5 + $0x38] sm:$0xff]  ;;  %v261_v20 = vshrl.u32 %v260_v19, 7  ;;  %v266_v21 = vand.u32 127, %v260_v19 }
  0x20   : > { %v228_v11 = vld [vmem:[%s691_s5 + $0x30] sm:$0xff]  ;;  %v227_v12 = vld [vmem:[%s691_s5 + $0x28] sm:$0xff]  ;;  %v226_v13 = vld [vmem:[%s691_s5 + $0x20] sm:$0xff] }
  0x21   : > { %v225_v14 = vld [vmem:[%s691_s5 + $0x18] sm:$0xff]  ;;  %v224_v15 = vld [vmem:[%s691_s5 + $0x10] sm:$0xff]  ;;  %v223_v16 = vld [vmem:[%s691_s5 + $0x8] sm:$0xff]  ;;  %v268_v23 = vadd.s32 %v267_v22, %v266_v21  ;;  %v269_v24 = vmul.u32 32, %v261_v20 }
  0x22   : > { %239 = vmatpush.xpose.msra.mxu0 %v236_v3  ;;  %v222_v17 = vld [vmem:[%s691_s5] sm:$0xff]  ;;  %v282_v41 = vld [vmem:[#allocation3] sm:$0xff] }
  0x23   : > { %v221_v18 = vld [vmem:[%s765_s0] sm:$0xff]  ;;  %vm270_vm1 = vcmp.eq.s32.totalorder %v268_v23, %v269_v24  ;;  %v271_v29 = vld [vmem:[#allocation4] sm:$0xff] }
  0x24   : > { %v278_v28 = vld [vmem:[#allocation2] sm:$0xff] }
  0x26   : > { %240 = vmatpush.xpose.msra.mxu0 %v235_v4 }
  0x2a   : > { %241 = vmatpush.xpose.msra.mxu0 %v234_v5 }
  0x2e   : > { %242 = vmatpush.xpose.msra.mxu0 %v233_v6 }
  0x32   : > { %243 = vmatpush.xpose.msra.mxu0 %v232_v7 }
  0x36   : > { %244 = vmatpush.xpose.msra.mxu0 %v231_v8 }
  0x3a   : > { %245 = vmatpush.xpose.msra.mxu0 %v230_v9 }
  0x3e   : > { %246 = vmatpush.xpose.msra.mxu0 %v229_v10 }
  0x42   : > { %247 = vmatpush.xpose.msra.mxu0 %v228_v11 }
  0x46   : > { %248 = vmatpush.xpose.msra.mxu0 %v227_v12 }
  0x4a   : > { %249 = vmatpush.xpose.msra.mxu0 %v226_v13 }
  0x4e   : > { %250 = vmatpush.xpose.msra.mxu0 %v225_v14 }
  0x52   : > { %251 = vmatpush.xpose.msra.mxu0 %v224_v15 }
  0x56   : > { %252 = vmatpush.xpose.msra.mxu0 %v223_v16 }
  0x5a   : > { %253 = vmatpush.xpose.msra.mxu0 %v222_v17 }
  0x5d   : > { %254 = vmatmul.f32.vlgmr.msra.gmra.mxu0 %v221_v18 }
  0xda   : > { %v255_v25 = vpop.f32.mrf.mxu0 }
  0xdb   : > { %258 = vst [vmem:[%s192_s6] sm:$0xff] %v255_v25  ;;  %279 = vmax.xlane.f32.xlu0 %v255_v25  ;;  %v272_v26 = vsel %vm270_vm1, %v255_v25, 0.0 }
  0xdc   : > { %273 = vadd.xlane.f32.xlu1 %v272_v26 }
 0x14e   : > { %v280_v30 = vpop.xlane.xlu0 %279 }
 0x14f   : > { %v281_v31 = vmax.f32 %v278_v28, %v280_v30  ;;  %v274_v32 = vpop.xlane.xlu1 %273 }
 0x150   : > { %v275_v33 = vadd.f32 %v274_v32, %v271_v29 }
 0x151   : > { %v283_v34 = vsub.f32 %v278_v28, %v281_v31  ;;  %299 = vst.msk [vmem:[#allocation2] sm:$0xff] %vm276_vm2, %v281_v31  ;;  %289 = vperm.xlu0 %517, %v281_v31  }
 0x152   : > { %277 = vst.msk [vmem:[#allocation4] sm:$0xff] %vm276_vm2, %v275_v33 }
 0x153   : > { %v284_v39 = vmul.f32 1.442695, %v283_v34 }
 0x1c3   : > { %v290_v35 = vpop.permute.xlu0 %289 }
 0x1c4   : > { %v292_v36 = vsub.f32 %v255_v25, %v290_v35 }
 0x1c6   : > { %v293_v37 = vmul.f32 1.442695, %v292_v36 }
 0x1c8   : > { %518 = vpow2.f32 %v293_v37 }
 0x1c9   : > { %520 = vpow2.f32 %v284_v39 }
 0x1ce   : > { %v519_v38 = vpop.eup %518 }
 0x1cf   : > { %295 = vadd.xlane.f32.xlu1 %v519_v38  ;;  %v521_v40 = vpop.eup %520 }
 0x1d0   : > { %v286_v42 = vmul.f32 %v521_v40, %v282_v41 }
 0x241   : > { %303 = sbr.rel (%p453_p13) target bundleno = 603 (0x25b), region = 36 }
 0x242   : > { %v296_v43 = vpop.xlane.xlu1 %295 }
 0x243   : > { %v297_v44 = vadd.f32 %v296_v43, %v286_v42 }
 0x245   : > { %298 = vst.msk [vmem:[#allocation3] sm:$0xff] %vm276_vm2, %v297_v44 }
 0x246   : > { %v304_v47 = vld [vmem:[#allocation2] sm:$0xff]  ;;  %v309_v49 = vld [vmem:[#allocation4] sm:$0xff] }
 0x24c   : > { %v305_v45 = vld [vmem:[#allocation3] sm:$0xff] }
 0x24d   : > { %522 = vlog2.f32 %v305_v45 }
 0x253   : > { %v523_v46 = vpop.eup %522 }
 0x254   : > { %v307_v48 = vmul.f32 0.6931472, %v523_v46 }
 0x256   : > { %v308_v50 = vadd.f32 %v307_v48, %v304_v47 }
 0x258   : > { %v310_v51 = vsub.f32 %v308_v50, %v309_v49 }
 0x25a   : > { %311 = vst.msk [vmem:[%s768_s3] sm:$0xff] %vm276_vm2, %v310_v51 }
 0x25b PF: > { %s455_s18 = sshll.u32 %s594_s15, 3  ;;  %s331_s27 = sshll.u32 %s192_s6, 4  ;;  %s332_s27 = int_to_ptr.vmem [resolvable:$true] %s331_s27 }
 0x25c   : > { %s329_s23 = scalar_lea.hbm %s767_s2, %s455_s18  ;;  %s313_s30 = scalar_lea.sflag [#allocation6], %s190_s26 }
 0x25d   : > { %s333_s29 = sshll.u32 %s329_s23, 4  ;;  %s544_s8 = scalar_lea.hbm %s767_s2, 16  ;;  %s334_s29 = int_to_ptr.hbm [resolvable:$true] %s333_s29 }
 0x25e   : > { %s538_s4 = sshra.s32 %s334_s29, 4  ;;  %s539_s4 = int_to_ptr.hbm [resolvable:$true] %s538_s4 }
 0x25f   : > { %s540_s5 = scalar_lea.hbm %s539_s4, 8  ;;  %p545_p3 = scmp.lt.s32.totalorder %s539_s4, %s767_s2 }
 0x260   : > { %p541_p0 = scmp.ne.s32.totalorder %s539_s4, %s540_s5  ;;  %p546_p5 = scmp.lt.s32.totalorder %s544_s8, %s540_s5 }
 0x262   : > { %p542_p1 = pnand %p541_p0, %p667_p4  ;;  %p547_p6 = por %p546_p5, %p545_p3 }
 0x264   : > { %p543_p2 = pneg %p542_p1 }
 0x266   : > { %p548_p7 = pnand %p547_p6, %p543_p2 }
 0x268   : > { %551 = shalt.err (!%p548_p7)
}
 0x269   : > { %459 = dma.vmem_to_hbm [thread:$0]  (%p667_p4), %s332_s27, 128, %s334_s29, %s313_s30  }
 0x26a PF: > { %p465_p9 = scmp.ge.s32.totalorder %s602_s17, 2  ;;  %s355_s26 = sand.u32 1, %s582_s12  }
 0x26b   : > { %s356_s28 = scalar_lea.sflag [#allocation6], %s355_s26 }
 0x26c   : > { %p462_p10 = pnand %p465_p9, %p674_p8 }
 0x26e   : > { %p463_p11 = pneg %p462_p10 }
 0x270   : > { %577 = dma.done.wait (%p463_p11), %s356_s28, 128  }
 0x271   : > { %579 = vsyncadd (%p463_p11), %s356_s28, 4294967168  ;;  %s17_s17 = sadd.s32 1, %s602_s17   ;;  %s771_s12 = smov %s586_s13 }
 0x272   : > { %p14_p12 = scmp.ge.s32.totalorder %s17_s17, 4   ;;  %s772_s13 = smov %s590_s14 }
 0x273   : > { %s773_s14 = smov %s680_s25  ;;  %s774_s15 = smov %s598_s16 }
 0x274   : > { %s775_s16 = smov %s777_s20  ;;  %16 = sbr.rel (!%p14_p12) target bundleno = 4 (0x4), region = 86 }
 0x279   :  { %362 = vsyncpa [#allocation6], 1 }
 0x27a   :  { %364 = vsyncpa [#allocation6 + $0x1], 1 }

// kernel: dual_encoder_forward.4
= control target key start
LH: loop header
LB: loop body
LE: loop exit
PB: predicated region body
PF: predicated region fallthrough
CT: control target
= control target key end

     0   :  { %s2701_s0 = inlined_call_operand.hbm [shape: f32[256,256,128], index: 0, kind: input, shape index: {}]   ;;  %s2702_s1 = inlined_call_operand.hbm [shape: s32[256,256], index: 1, kind: input, shape index: {}]   ;;  %s2703_s2 = inlined_call_operand.vmem [shape: f32[256,128], index: 2, kind: output, shape index: {}]  }
   0x1   :  { %2708 = sst [smem:[#allocation22_spill]] %s2701_s0 }
   0x2   :  { %7 = vsyncpa [#allocation5], 0 }
   0x3   :  { %9 = vsyncpa [#allocation5 + $0x1], 0 }
   0x4   :  { %10 = vsyncpa [#allocation7], 0 }
   0x5   :  { %12 = vsyncpa [#allocation7 + $0x1], 0  ;;  %s1994_s9 = smov 0   ;;  %s1996_s10 = smov 0  }
   0x6   :  { %s1998_s11 = smov 0   ;;  %s2000_s12 = smov 0  }
   0x7   :  { %s2002_s13 = smov 0   ;;  %s2004_s14 = smov 0  }
   0x8   :  { %s2006_s15 = smov 0   ;;  %s2008_s16 = smov 0  }
   0x9 LB: > { %s30_s17 = sadd.s32 1, %s1961_s14  ;;  %s37_s18 = sadd.s32 1, %s1965_s15  ;;  %s1969_s16 = sphi %s2008_s16, %s18_s16   ;;  %s1965_s15 = sphi %s2006_s15, %s2736_s15   ;;  %s1961_s14 = sphi %s2004_s14, %s2735_s14   ;;  %s1957_s13 = sphi %s2002_s13, %s2734_s13   ;;  %s1953_s12 = sphi %s2000_s12, %s2733_s12   ;;  %s1949_s11 = sphi %s1998_s11, %s2732_s11   ;;  %s1945_s10 = sphi %s1996_s10, %s2731_s10   ;;  %s1941_s9 = sphi %s1994_s9, %s2730_s9  }
   0xa   : > { %p31_p0 = scmp.ge.s32.totalorder %s30_s17, 2  ;;  %s1643_s19 = sadd.s32 4294967295, %s1969_s16  }
   0xb   : > { %p55_p1 = scmp.ne.s32.totalorder %s1949_s11, %s1945_s10  ;;  %p56_p2 = scmp.eq.s32.totalorder %s1969_s16, 0 }
   0xc   : > { %s2738_s17 = smov (%p31_p0, %s30_s17), 0  ;;  %s2740_s18 = smov (!%p31_p0, %s37_s18), %s1965_s15 }
   0xd   : > { %s42_s20 = ssub.s32 %s1961_s14, %s2738_s17  ;;  %p39_p3 = scmp.ge.s32.totalorder %s2740_s18, 32 }
   0xe   : > { %p61_p4 = scmp.ne.s32.totalorder %s1945_s10, %s1941_s9  ;;  %p2044_p5 = por %p56_p2, %p55_p1 }
   0xf   : > { %p62_p6 = scmp.eq.s32.totalorder %s1643_s19, 0  ;;  %s2742_s18 = smov (%p39_p3, %s2740_s18), 0 }
  0x10   : > { %s41_s23 = ssub.s32 %s1965_s15, %s2742_s18  ;;  %s48_s25 = sadd.s32 1, %s1949_s11 }
  0x11   : > { %p2050_p7 = por %p62_p6, %p61_p4  ;;  %s43_s24 = sor.u32 %s42_s20, %s41_s23 }
  0x12   : > { %p46_p8 = scmp.eq.s32.totalorder %s43_s24, 0  ;;  %p1646_p9 = scmp.ge.s32.totalorder %s1969_s16, 64 }
  0x14   : > { %s2058_s26 = scalar_select %p46_p8, %s1949_s11, %s48_s25  }
  0x15   : > { %137 = sbr.rel (%p1646_p9) target bundleno = 48 (0x30), region = 16 }
  0x1a   : > { %s2062_s27 = sand.u32 1, %s1949_s11   ;;  %s1649_s28 = sshll.u32 %s1961_s14, 4 }
  0x1b   : > { %s1647_s29 = sshll.u32 %s2062_s27, 10  ;;  %s1665_s30 = sshll.u32 %s1965_s15, 8 }
  0x1c   : > { %s152_s3 = sadd.s32 %s1665_s30, %s1649_s28  ;;  %s145_s5 = scalar_lea.vmem [#allocation4], %s1647_s29 }
  0x1d   : > { %s1651_s4 = sshll.u32 %s152_s3, 3  ;;  %s169_s6 = sshll.u32 %s145_s5, 4  ;;  %s170_s6 = int_to_ptr.vmem [resolvable:$true] %s169_s6 }
  0x1e   : > { %s2711_s0 = sld [smem:[#allocation22_spill]]  ;;  %s1971_s20 = smov 4096  }
  0x1f   : > { %s1666_s19 = scalar_select %p2044_p5, [#allocation0], [#allocation10] }
  0x20   : > { %1667 = sst [smem:[#allocation9]] (%p2044_p5), %s1971_s20  ;;  %s1972_s25 = smov 2048  }
  0x21   : > { %s159_s23 = sld [smem:[%s1666_s19]]   ;;  %s1973_s28 = smov 16  }
  0x22   : > { %1668 = sst [smem:[#allocation9 + $0x1]] (%p2044_p5), %s1972_s25  ;;  %s1974_s29 = smov 128  }
  0x23   : > { %1669 = sst [smem:[#allocation9 + $0x2]] (%p2044_p5), %s1973_s28  ;;  %s1975_s3 = smov 8  }
  0x24   : > { %s154_s9 = scalar_lea.hbm %s2711_s0, %s1651_s4  ;;  %1670 = sst [smem:[#allocation9 + $0x3]] (%p2044_p5), %s1974_s29 }
  0x25   : > { %s167_s24 = sshll.u32 %s154_s9, 4  ;;  %1671 = sst [smem:[#allocation9 + $0x4]] (%p2044_p5), %s1974_s29  ;;  %s168_s24 = int_to_ptr.hbm [resolvable:$true] %s167_s24 }
  0x26   : > { %1672 = sst [smem:[#allocation9 + $0x5]] (%p2044_p5), %s1975_s3  ;;  %s142_s5 = scalar_lea.sflag [#allocation5], %s2062_s27 }
  0x27   : > { %s1652_s30 = sshll.u32 %s159_s23, 26  ;;  %s1976_s7 = smov [#allocation8]  }
  0x28   : > { %s1653_s4 = sadd.s32 134217728, %s1652_s30  ;;  %s1654_s8 = sshll.u32 %s2062_s27, 3 }
  0x29   : > { %1673 = dma.general (%p2044_p5), %s168_s24, 16384, %s170_s6, %s142_s5, %s1976_s7, [#allocation9], %s1653_s4, 0  }
  0x2a   : > { %s1655_s9 = sshll.u32 %s1965_s15, 1  ;;  %s196_s20 = scalar_lea.vmem [#allocation6], %s1654_s8 }
  0x2b   : > { %s200_s19 = sadd.s32 %s1961_s14, %s1655_s9  ;;  %s206_s25 = sshll.u32 %s196_s20, 4  ;;  %s207_s25 = int_to_ptr.vmem [resolvable:$true] %s206_s25 }
  0x2c   : > { %s1656_s28 = sshll.u32 %s200_s19, 3  ;;  %s193_s0 = scalar_lea.sflag [#allocation7], %s2062_s27 }
  0x2d   : > { %s202_s3 = scalar_lea.hbm %s2702_s1, %s1656_s28 }
  0x2e   : > { %s204_s30 = sshll.u32 %s202_s3, 4  ;;  %s205_s30 = int_to_ptr.hbm [resolvable:$true] %s204_s30 }
  0x2f   : > { %1674 = dma.hbm_to_vmem [thread:$0]  (%p2044_p5), %s205_s30, 128, %s207_s25, %s193_s0  }
  0x30 PF: > { %p1657_p10 = scmp.ge.s32.totalorder %s1969_s16, 1  ;;  %p211_p11 = scmp.lt.s32.totalorder %s1969_s16, 65 }
  0x32   : > { %p212_p12 = pnand %p1657_p10, %p211_p11 }
  0x34   : > { %215 = sbr.rel (%p212_p12) target bundleno = 1153 (0x481), region = 28 }
  0x39   : > { %s217_s6 = sand.u32 1, %s1945_s10  }
  0x3a   : > { %s1658_s24 = sshll.u32 %s217_s6, 10  ;;  %s218_s4 = scalar_lea.sflag [#allocation5], %s217_s6 }
  0x3b   : > { %s2099_s5 = scalar_lea.vmem [#allocation4], %s1658_s24 }
  0x3c   : > { %1932 = dma.done.wait (%p2050_p7), %s218_s4, 16384  }
  0x3d   : > { %1934 = vsyncadd (%p2050_p7), %s218_s4, 4294950912  ;;  %s1659_s0 = sshll.u32 %s217_s6, 3  ;;  %s228_s21 = scalar_lea.sflag [#allocation7], %s217_s6 }
  0x3e   : > { %s231_s27 = scalar_lea.vmem [#allocation6], %s1659_s0 }
  0x3f   : > { %1936 = dma.done.wait (%p2050_p7), %s228_s21, 128  }
  0x40   : > { %1938 = vsyncadd (%p2050_p7), %s228_s21, 4294967168  ;;  %p262_p13 = scmp.lt.s32.totalorder %s1957_s13, 31  ;;  %p1661_p0 = scmp.ne.s32.totalorder %s1953_s12, 0 }
  0x42   : > { %s2744_s13 = smov (!%p262_p13, %s1957_s13), 31  ;;  %272 = sbr.rel (%p1661_p0) target bundleno = 74 (0x4a), region = 40 }
  0x43   : > { %s1660_s7 = sshll.u32 %s2744_s13, 3 }
  0x44   : > { %s2114_s19 = scalar_lea.vmem %s2703_s2, %s1660_s7 }
  0x47   : > { %vm274_vm0 = vcmask 7168   ;;  %v1977_v0 = vmov 0.0  }
  0x48   : > { %273 = vst [vmem:[#allocation2] sm:$0xff] %v1977_v0 }
  0x49   : > { %275 = vst.msk [vmem:[#allocation3] sm:$0xff] %vm274_vm0, %v1977_v0 }
  0x4a PF: > { %v408_v1 = vlaneseq  ;;  %v404_v2 = vld [vmem:[%s231_s27] sm:$0xff]  ;;  %v294_v62 = vld [vmem:[%s2099_s5 + $0x90] sm:$0xff]  ;;  %v295_v63 = vld [vmem:[%s2099_s5 + $0x98] sm:$0xff]  ;;  %vm1487_vm1 = vcmask 1041409   ;;  %vm1489_vm2 = vcmask 1042434   ;;  %vm1491_vm3 = vcmask 1043459  }
  0x4b   : > { %v2123_v5 = vcvt.s32.f32 %v404_v2  ;;  %v293_v44 = vld [vmem:[%s2099_s5 + $0x88] sm:$0xff]  ;;  %v292_v46 = vld [vmem:[%s2099_s5 + $0x80] sm:$0xff]  ;;  %vm1493_vm4 = vcmask 1044484   ;;  %vm1495_vm5 = vcmask 1045509   ;;  %vm1497_vm6 = vcmask 1046534   ;;  %p1662_p1 = scmp.ne.s32.totalorder %s1953_s12, 1 }
  0x4c   : > { %v2117_v3 = vshrl.u32 %v408_v1, 7  ;;  %v296_v2 = vld [vmem:[%s2099_s5 + $0xa0] sm:$0xff]  ;;  %vm1508_vm7 = vcmask 7168   ;;  %vm1499_vm8 = vcmask 1047559  }
  0x4d   : > { %v2131_v7 = vperm.slane %v2123_v5, 0  ;;  %v2137_v8 = vperm.slane %v2123_v5, 3  ;;  %v2191_v18 = vperm.slane %v2123_v5, 4  ;;  %v2209_v21 = vperm.slane %v2123_v5, 1 }
  0x4e   : > { %1749 = vset.pattern.permute.xlu0 %v2117_v3  ;;  %v2121_v4 = vadd.s32 16, %v2117_v3  ;;  %v2126_v6 = vadd.s32 32, %v2117_v3  ;;  %v2140_v9 = vadd.s32 24, %v2117_v3  ;;  %v2144_v10 = vadd.s32 40, %v2117_v3 }
  0x4f   : > { %v2152_v11 = vadd.s32 48, %v2117_v3  ;;  %v2155_v12 = vadd.s32 56, %v2117_v3  ;;  %v2161_v13 = vadd.s32 80, %v2117_v3  ;;  %v2167_v14 = vadd.s32 72, %v2117_v3 }
  0x50   : > { %1750 = vset.pattern.permute.xlu1 %v2121_v4  ;;  %1752 = vset.pattern.permute.xlu2 %v2126_v6  ;;  %v2173_v15 = vadd.s32 120, %v2117_v3  ;;  %v2179_v16 = vadd.s32 88, %v2117_v3  ;;  %v2182_v17 = vadd.s32 96, %v2117_v3  ;;  %v2194_v19 = vadd.s32 112, %v2117_v3 }
  0x51   : > { %v2203_v20 = vadd.s32 8, %v2117_v3  ;;  %v2221_v22 = vperm.slane %v2123_v5, 5  ;;  %v2227_v23 = vadd.s32 64, %v2117_v3  ;;  %v2239_v24 = vadd.s32 104, %v2117_v3 }
  0x52   : > { %v2277_v35 = vperm.slane %v2123_v5, 6  ;;  %v2285_v38 = vperm.slane %v2123_v5, 2  ;;  %v2339_v56 = vperm.slane %v2123_v5, 7 }
  0x54   : > { %2712 = vst [vmem:[#allocation13_spill] sm:$0xff] %v2277_v35 }
  0x55   : > { %2715 = vst [vmem:[#allocation16_spill] sm:$0xff] %v2339_v56 }
  0x56   : > { %412 = vperm.xlu0 %1749, %v2131_v7  }
  0x58   : > { %424 = vperm.xlu1 %1750, %v2131_v7   ;;  %436 = vperm.xlu2 %1752, %v2131_v7  }
  0x5e   : > { %703 = vperm.xlu0 %1749, %v2137_v8  }
  0x60   : > { %1751 = vset.pattern.permute.xlu1 %v2140_v9  ;;  %1753 = vset.pattern.permute.xlu2 %v2144_v10 }
  0x66   : > { %1792 = vset.pattern.permute.xlu0 %v2144_v10 }
  0x68   : > { %430 = vperm.xlu1 %1751, %v2131_v7   ;;  %442 = vperm.xlu2 %1753, %v2131_v7  }
  0x6e   : > { %733 = vperm.xlu0 %1792, %v2137_v8  }
  0x70   : > { %1754 = vset.pattern.permute.xlu1 %v2152_v11  ;;  %1755 = vset.pattern.permute.xlu2 %v2155_v12 }
  0x76   : > { %1797 = vset.pattern.permute.xlu0 %v2161_v13 }
  0x78   : > { %448 = vperm.xlu1 %1754, %v2131_v7   ;;  %454 = vperm.xlu2 %1755, %v2131_v7  }
  0x7e   : > { %763 = vperm.xlu0 %1797, %v2137_v8  }
  0x80   : > { %1756 = vset.pattern.permute.xlu1 %v2167_v14  ;;  %1757 = vset.pattern.permute.xlu2 %v2161_v13 }
  0x86   : > { %1802 = vset.pattern.permute.xlu0 %v2173_v15 }
  0x88   : > { %466 = vperm.xlu1 %1756, %v2131_v7   ;;  %472 = vperm.xlu2 %1757, %v2131_v7  }
  0x8e   : > { %793 = vperm.xlu0 %1802, %v2137_v8  }
  0x90   : > { %1758 = vset.pattern.permute.xlu1 %v2179_v16  ;;  %1759 = vset.pattern.permute.xlu2 %v2182_v17 }
  0x96   : > { %1807 = vset.pattern.permute.xlu0 %v2126_v6 }
  0x98   : > { %478 = vperm.xlu1 %1758, %v2131_v7   ;;  %484 = vperm.xlu2 %1759, %v2131_v7  }
  0x9e   : > { %824 = vperm.xlu0 %1807, %v2191_v18  }
  0xa0   : > { %1760 = vset.pattern.permute.xlu1 %v2194_v19  ;;  %1761 = vset.pattern.permute.xlu2 %v2173_v15 }
  0xa6   : > { %1812 = vset.pattern.permute.xlu0 %v2167_v14 }
  0xa8   : > { %496 = vperm.xlu1 %1760, %v2131_v7   ;;  %502 = vperm.xlu2 %1761, %v2131_v7  }
  0xae   : > { %854 = vperm.xlu0 %1812, %v2191_v18  }
  0xb0   : > { %1762 = vset.pattern.permute.xlu1 %v2117_v3  ;;  %1763 = vset.pattern.permute.xlu2 %v2203_v20 }
  0xb2   : > { %v2244_v25 = vpop.permute.xlu2 %436 }
  0xb6   : > { %1817 = vset.pattern.permute.xlu0 %v2194_v19 }
  0xb8   : > { %509 = vperm.xlu1 %1762, %v2209_v21   ;;  %515 = vperm.xlu2 %1763, %v2209_v21  }
  0xbe   : > { %884 = vperm.xlu0 %1817, %v2191_v18  }
  0xc0   : > { %1764 = vset.pattern.permute.xlu1 %v2140_v9  ;;  %1765 = vset.pattern.permute.xlu2 %v2126_v6 }
  0xc2   : > { %v2251_v27 = vpop.permute.xlu2 %442 }
  0xc6   : > { %1822 = vset.pattern.permute.xlu0 %v2140_v9 }
  0xc8   : > { %527 = vperm.xlu1 %1764, %v2209_v21   ;;  %533 = vperm.xlu2 %1765, %v2209_v21   ;;  %v2254_v28 = vpop.permute.xlu0 %412 }
  0xca   : > { %v2249_v26 = vpop.permute.xlu1 %424 }
  0xce   : > { %915 = vperm.xlu0 %1822, %v2221_v22  }
  0xd0   : > { %1766 = vset.pattern.permute.xlu1 %v2144_v10  ;;  %1767 = vset.pattern.permute.xlu2 %v2152_v11  ;;  %v2265_v31 = vpop.permute.xlu0 %703 }
  0xd2   : > { %v2260_v30 = vpop.permute.xlu2 %454 }
  0xd6   : > { %1823 = vset.pattern.permute.xlu0 %v2227_v23 }
  0xd8   : > { %539 = vperm.xlu1 %1766, %v2209_v21   ;;  %545 = vperm.xlu2 %1767, %v2209_v21  }
  0xda   : > { %v2258_v29 = vpop.permute.xlu1 %430 }
  0xde   : > { %460 = vperm.xlu0 %1823, %v2131_v7  }
  0xe0   : > { %1768 = vset.pattern.permute.xlu1 %v2227_v23  ;;  %1769 = vset.pattern.permute.xlu2 %v2167_v14  ;;  %v2279_v36 = vpop.permute.xlu0 %733 }
  0xe2   : > { %v2269_v33 = vpop.permute.xlu2 %472 }
  0xe6   : > { %945 = vperm.xlu0 %1823, %v2221_v22  }
  0xe8   : > { %557 = vperm.xlu1 %1768, %v2209_v21   ;;  %563 = vperm.xlu2 %1769, %v2209_v21  }
  0xea   : > { %v2267_v32 = vpop.permute.xlu1 %448 }
  0xee   : > { %1828 = vset.pattern.permute.xlu0 %v2239_v24 }
  0xf0   : > { %1770 = vset.pattern.permute.xlu1 %v2161_v13  ;;  %1771 = vset.pattern.permute.xlu2 %v2179_v16  ;;  %v2291_v40 = vpop.permute.xlu0 %763 }
  0xf2   : > { %v2281_v37 = vpop.permute.xlu2 %484 }
  0xf6   : > { %490 = vperm.xlu0 %1828, %v2131_v7  }
  0xf8   : > { %569 = vperm.xlu1 %1770, %v2209_v21   ;;  %575 = vperm.xlu2 %1771, %v2209_v21  }
  0xfa   : > { %v2274_v34 = vpop.permute.xlu1 %466 }
  0xfe   : > { %975 = vperm.xlu0 %1828, %v2221_v22  }
 0x100   : > { %1772 = vset.pattern.permute.xlu1 %v2239_v24  ;;  %1773 = vset.pattern.permute.xlu2 %v2194_v19  ;;  %v2302_v45 = vpop.permute.xlu0 %793 }
 0x102   : > { %v2293_v41 = vpop.permute.xlu2 %502 }
 0x106   : > { %1833 = vset.pattern.permute.xlu0 %v2121_v4 }
 0x108   : > { %587 = vperm.xlu1 %1772, %v2209_v21   ;;  %593 = vperm.xlu2 %1773, %v2209_v21  }
 0x10a   : > { %v2289_v39 = vpop.permute.xlu1 %478 }
 0x10e   : > { %521 = vperm.xlu0 %1833, %v2209_v21  }
 0x110   : > { %1774 = vset.pattern.permute.xlu1 %v2173_v15  ;;  %1775 = vset.pattern.permute.xlu2 %v2117_v3  ;;  %v2309_v51 = vpop.permute.xlu0 %824 }
 0x112   : > { %v516_v43 = vpop.permute.xlu2 %515 }
 0x113   : > { %v1200_v47 = vmul.f32 %v516_v43, %v293_v44  ;;  %v297_v44 = vld [vmem:[%s2099_s5 + $0xa8] sm:$0xff] }
 0x116   : > { %1006 = vperm.xlu0 %1833, %v2277_v35  }
 0x118   : > { %599 = vperm.xlu1 %1774, %v2209_v21   ;;  %606 = vperm.xlu2 %1775, %v2285_v38  }
 0x11a   : > { %v2298_v42 = vpop.permute.xlu1 %496 }
 0x11e   : > { %1838 = vset.pattern.permute.xlu0 %v2155_v12 }
 0x120   : > { %1776 = vset.pattern.permute.xlu1 %v2121_v4  ;;  %1777 = vset.pattern.permute.xlu2 %v2140_v9  ;;  %v2315_v52 = vpop.permute.xlu0 %854 }
 0x122   : > { %v534_v61 = vpop.permute.xlu2 %533 }
 0x126   : > { %551 = vperm.xlu0 %1838, %v2209_v21  }
 0x128   : > { %618 = vperm.xlu1 %1776, %v2285_v38   ;;  %624 = vperm.xlu2 %1777, %v2285_v38  }
 0x12a   : > { %v510_v48 = vpop.permute.xlu1 %509 }
 0x12b   : > { %v1199_v49 = vmul.f32 %v510_v48, %v292_v46  ;;  %v1203_v46 = vmul.f32 %v534_v61, %v296_v2  ;;  %v300_v2 = vld [vmem:[%s2099_s5 + $0xc0] sm:$0xff] }
 0x12d   : > { %v1332_v50 = vadd.f32 %v1200_v47, %v1199_v49  ;;  %v298_v49 = vld [vmem:[%s2099_s5 + $0xb0] sm:$0xff] }
 0x12e   : > { %1036 = vperm.xlu0 %1838, %v2277_v35  }
 0x130   : > { %1778 = vset.pattern.permute.xlu1 %v2126_v6  ;;  %1779 = vset.pattern.permute.xlu2 %v2144_v10  ;;  %v2320_v53 = vpop.permute.xlu0 %884 }
 0x131   : > { %2713 = vst [vmem:[#allocation14_spill] sm:$0xff] %v2320_v53 }
 0x132   : > { %v546_v48 = vpop.permute.xlu2 %545 }
 0x136   : > { %1843 = vset.pattern.permute.xlu0 %v2182_v17 }
 0x138   : > { %630 = vperm.xlu1 %1778, %v2285_v38   ;;  %636 = vperm.xlu2 %1779, %v2285_v38  }
 0x13a   : > { %v528_v60 = vpop.permute.xlu1 %527 }
 0x13e   : > { %581 = vperm.xlu0 %1843, %v2209_v21  }
 0x140   : > { %1780 = vset.pattern.permute.xlu1 %v2155_v12  ;;  %1781 = vset.pattern.permute.xlu2 %v2227_v23  ;;  %v2326_v54 = vpop.permute.xlu0 %915 }
 0x141   : > { %2714 = vst [vmem:[#allocation15_spill] sm:$0xff] %v2326_v54 }
 0x146   : > { %1066 = vperm.xlu0 %1843, %v2277_v35   ;;  %v312_v35 = vld [vmem:[%s2099_s5 + $0x120] sm:$0xff] }
 0x148   : > { %648 = vperm.xlu1 %1780, %v2285_v38   ;;  %654 = vperm.xlu2 %1781, %v2285_v38  }
 0x14a   : > { %v540_v43 = vpop.permute.xlu1 %539 }
 0x14e   : > { %1848 = vset.pattern.permute.xlu0 %v2203_v20 }
 0x150   : > { %1782 = vset.pattern.permute.xlu1 %v2167_v14  ;;  %1783 = vset.pattern.permute.xlu2 %v2161_v13  ;;  %v2332_v55 = vpop.permute.xlu0 %460 }
 0x156   : > { %418 = vperm.xlu0 %1848, %v2131_v7   ;;  %v1202_v7 = vmul.f32 %v528_v60, %v295_v63 }
 0x158   : > { %660 = vperm.xlu1 %1782, %v2285_v38   ;;  %666 = vperm.xlu2 %1783, %v2285_v38   ;;  %v2341_v57 = vpop.permute.xlu0 %945 }
 0x159   : > { %2716 = vst [vmem:[#allocation17_spill] sm:$0xff] %v2341_v57 }
 0x15a   : > { %v558_v63 = vpop.permute.xlu1 %557 }
 0x15e   : > { %612 = vperm.xlu0 %1848, %v2285_v38  }
 0x160   : > { %1784 = vset.pattern.permute.xlu1 %v2182_v17  ;;  %1785 = vset.pattern.permute.xlu2 %v2239_v24 }
 0x166   : > { %1097 = vperm.xlu0 %1848, %v2339_v56  }
 0x168   : > { %678 = vperm.xlu1 %1784, %v2285_v38   ;;  %684 = vperm.xlu2 %1785, %v2285_v38   ;;  %v2346_v58 = vpop.permute.xlu0 %490 }
 0x16e   : > { %1853 = vset.pattern.permute.xlu0 %v2152_v11 }
 0x170   : > { %1786 = vset.pattern.permute.xlu1 %v2194_v19  ;;  %1787 = vset.pattern.permute.xlu2 %v2173_v15  ;;  %v2352_v59 = vpop.permute.xlu0 %975 }
 0x171   : > { %2717 = vst [vmem:[#allocation18_spill] sm:$0xff] %v2352_v59  ;;  %v1204_v59 = vmul.f32 %v540_v43, %v297_v44  ;;  %v570_v43 = vpop.permute.xlu1 %569  ;;  %v302_v44 = vld [vmem:[%s2099_s5 + $0xd0] sm:$0xff] }
 0x176   : > { %642 = vperm.xlu0 %1853, %v2285_v38  }
 0x178   : > { %690 = vperm.xlu1 %1786, %v2285_v38   ;;  %696 = vperm.xlu2 %1787, %v2285_v38  }
 0x17e   : > { %1127 = vperm.xlu0 %1853, %v2339_v56  }
 0x180   : > { %1788 = vset.pattern.permute.xlu1 %v2203_v20  ;;  %v522_v0 = vpop.permute.xlu0 %521  ;;  %1789 = vset.pattern.permute.xlu2 %v2121_v4 }
 0x181   : > { %v1201_v1 = vmul.f32 %v522_v0, %v294_v62  ;;  %v1205_v62 = vmul.f32 %v546_v48, %v298_v49  ;;  %v564_v0 = vpop.permute.xlu2 %563  ;;  %v303_v49 = vld [vmem:[%s2099_s5 + $0xd8] sm:$0xff] }
 0x183   : > { %v1333_v21 = vadd.f32 %v1332_v50, %v1201_v1  ;;  %v299_v1 = vld [vmem:[%s2099_s5 + $0xb8] sm:$0xff] }
 0x185   : > { %v1334_v47 = vadd.f32 %v1333_v21, %v1202_v7  ;;  %v1207_v7 = vmul.f32 %v558_v63, %v300_v2 }
 0x186   : > { %1858 = vset.pattern.permute.xlu0 %v2179_v16 }
 0x187   : > { %v1335_v57 = vadd.f32 %v1334_v47, %v1203_v46 }
 0x188   : > { %709 = vperm.xlu1 %1788, %v2137_v8   ;;  %715 = vperm.xlu2 %1789, %v2137_v8   ;;  %v2368_v61 = vpop.permute.xlu0 %1006 }
 0x189   : > { %v1336_v60 = vadd.f32 %v1335_v57, %v1204_v59  ;;  %2718 = vst [vmem:[#allocation19_spill] sm:$0xff] %v2368_v61  ;;  %v301_v59 = vld [vmem:[%s2099_s5 + $0xc8] sm:$0xff]  ;;  %v576_v48 = vpop.permute.xlu2 %575  ;;  %v282_v61 = vld [vmem:[%s2099_s5 + $0x30] sm:$0xff] }
 0x18a   : > { %v1208_v46 = vmul.f32 %v564_v0, %v301_v59  ;;  %v588_v0 = vpop.permute.xlu1 %587 }
 0x18b   : > { %v1337_v50 = vadd.f32 %v1336_v60, %v1205_v62  ;;  %v1209_v62 = vmul.f32 %v570_v43, %v302_v44  ;;  %v306_v43 = vld [vmem:[%s2099_s5 + $0xf0] sm:$0xff] }
 0x18e   : > { %672 = vperm.xlu0 %1858, %v2285_v38  }
 0x190   : > { %1790 = vset.pattern.permute.xlu1 %v2140_v9  ;;  %1791 = vset.pattern.permute.xlu2 %v2126_v6 }
 0x196   : > { %1157 = vperm.xlu0 %1858, %v2339_v56  }
 0x198   : > { %721 = vperm.xlu1 %1790, %v2137_v8   ;;  %v552_v57 = vpop.permute.xlu0 %551  ;;  %727 = vperm.xlu2 %1791, %v2137_v8  }
 0x199   : > { %v1206_v38 = vmul.f32 %v552_v57, %v299_v1  ;;  %v1210_v1 = vmul.f32 %v576_v48, %v303_v49  ;;  %v304_v57 = vld [vmem:[%s2099_s5 + $0xe0] sm:$0xff]  ;;  %v307_v48 = vld [vmem:[%s2099_s5 + $0xf8] sm:$0xff] }
 0x19b   : > { %v1338_v21 = vadd.f32 %v1337_v50, %v1206_v38  ;;  %v305_v38 = vld [vmem:[%s2099_s5 + $0xe8] sm:$0xff] }
 0x19c   : > { %v1212_v44 = vmul.f32 %v588_v0, %v305_v38  ;;  %v277_v38 = vld [vmem:[%s2099_s5 + $0x8] sm:$0xff] }
 0x19d   : > { %v1339_v47 = vadd.f32 %v1338_v21, %v1207_v7  ;;  %v594_v21 = vpop.permute.xlu2 %593 }
 0x19e   : > { %1867 = vset.pattern.permute.xlu0 %v2173_v15  ;;  %v1213_v49 = vmul.f32 %v594_v21, %v306_v43 }
 0x19f   : > { %v1340_v60 = vadd.f32 %v1339_v47, %v1208_v46  ;;  %v600_v47 = vpop.permute.xlu1 %599 }
 0x1a0   : > { %1793 = vset.pattern.permute.xlu1 %v2152_v11  ;;  %1794 = vset.pattern.permute.xlu2 %v2155_v12  ;;  %v2383_v2 = vpop.permute.xlu0 %1036 }
 0x1a1   : > { %v1341_v63 = vadd.f32 %v1340_v60, %v1209_v62  ;;  %2719 = vst [vmem:[#allocation20_spill] sm:$0xff] %v2383_v2  ;;  %v1214_v60 = vmul.f32 %v600_v47, %v307_v48 }
 0x1a3   : > { %v1342_v50 = vadd.f32 %v1341_v63, %v1210_v1 }
 0x1a5   : > { %v607_v0 = vpop.permute.xlu2 %606 }
 0x1a7   : > { %v619_v47 = vpop.permute.xlu1 %618 }
 0x1a8   : > { %739 = vperm.xlu1 %1793, %v2137_v8   ;;  %745 = vperm.xlu2 %1794, %v2137_v8  }
 0x1ad   : > { %v625_v21 = vpop.permute.xlu2 %624 }
 0x1b0   : > { %1795 = vset.pattern.permute.xlu1 %v2227_v23  ;;  %v582_v59 = vpop.permute.xlu0 %581  ;;  %1796 = vset.pattern.permute.xlu2 %v2167_v14 }
 0x1b1   : > { %v1211_v7 = vmul.f32 %v582_v59, %v304_v57 }
 0x1b3   : > { %v1343_v46 = vadd.f32 %v1342_v50, %v1211_v7  ;;  %v276_v50 = vld [vmem:[%s2099_s5] sm:$0xff]  ;;  %v278_v7 = vld [vmem:[%s2099_s5 + $0x10] sm:$0xff] }
 0x1b4   : > { %v1183_v59 = vmul.f32 %v2254_v28, %v276_v50  ;;  %v309_v50 = vld [vmem:[%s2099_s5 + $0x108] sm:$0xff] }
 0x1b5   : > { %v1344_v62 = vadd.f32 %v1343_v46, %v1212_v44  ;;  %v279_v46 = vld [vmem:[%s2099_s5 + $0x18] sm:$0xff] }
 0x1b6   : > { %v1186_v28 = vmul.f32 %v2258_v29, %v279_v46 }
 0x1b7   : > { %v1345_v1 = vadd.f32 %v1344_v62, %v1213_v49  ;;  %v280_v49 = vld [vmem:[%s2099_s5 + $0x20] sm:$0xff] }
 0x1b8   : > { %751 = vperm.xlu1 %1795, %v2137_v8   ;;  %757 = vperm.xlu2 %1796, %v2137_v8   ;;  %v2397_v57 = vpop.permute.xlu0 %1066 }
 0x1b9   : > { %v2395_v63 = vadd.f32 %v1345_v1, %v1214_v60  ;;  %2720 = vst [vmem:[#allocation21_spill] sm:$0xff] %v2397_v57  ;;  %v281_v60 = vld [vmem:[%s2099_s5 + $0x28] sm:$0xff]  ;;  %v308_v1 = vld [vmem:[%s2099_s5 + $0x100] sm:$0xff]  ;;  %v1187_v57 = vmul.f32 %v2244_v25, %v280_v49  ;;  %v311_v25 = vld [vmem:[%s2099_s5 + $0x118] sm:$0xff]  ;;  %v1189_v49 = vmul.f32 %v2267_v32, %v282_v61 }
 0x1ba   : > { %v1188_v29 = vmul.f32 %v2251_v27, %v281_v60  ;;  %v1218_v60 = vmul.f32 %v625_v21, %v311_v25  ;;  %v286_v32 = vld [vmem:[%s2099_s5 + $0x50] sm:$0xff] }
 0x1c0   : > { %1798 = vset.pattern.permute.xlu1 %v2179_v16  ;;  %1799 = vset.pattern.permute.xlu2 %v2182_v17 }
 0x1c1   : > { %1505 = vadd.xlane.f32.xlu0 %v2123_v5  ;;  %v1185_v5 = vmul.f32 %v2249_v26, %v278_v7  ;;  %v1215_v7 = vmul.f32 %v607_v0, %v308_v1  ;;  %v313_v1 = vld [vmem:[%s2099_s5 + $0x128] sm:$0xff] }
 0x1c8   : > { %769 = vperm.xlu1 %1798, %v2137_v8   ;;  %v419_v43 = vpop.permute.xlu0 %418  ;;  %775 = vperm.xlu2 %1799, %v2137_v8  }
 0x1c9   : > { %v1184_v44 = vmul.f32 %v419_v43, %v277_v38  ;;  %v310_v38 = vld [vmem:[%s2099_s5 + $0x110] sm:$0xff]  ;;  %v637_v43 = vpop.permute.xlu2 %636 }
 0x1cb   : > { %v1311_v48 = vadd.f32 %v1184_v44, %v1183_v59  ;;  %v283_v59 = vld [vmem:[%s2099_s5 + $0x38] sm:$0xff] }
 0x1cc   : > { %v1190_v54 = vmul.f32 %v2260_v30, %v283_v59  ;;  %v288_v59 = vld [vmem:[%s2099_s5 + $0x60] sm:$0xff] }
 0x1cd   : > { %v1312_v62 = vadd.f32 %v1311_v48, %v1185_v5  ;;  %v284_v5 = vld [vmem:[%s2099_s5 + $0x40] sm:$0xff]  ;;  %v631_v48 = vpop.permute.xlu1 %630 }
 0x1ce   : > { %v1191_v27 = vmul.f32 %v2332_v55, %v284_v5  ;;  %v1220_v55 = vmul.f32 %v637_v43, %v313_v1 }
 0x1cf   : > { %v1313_v2 = vadd.f32 %v1312_v62, %v1186_v28  ;;  %v1217_v28 = vmul.f32 %v619_v47, %v310_v38 }
 0x1d0   : > { %1800 = vset.pattern.permute.xlu1 %v2239_v24  ;;  %v613_v26 = vpop.permute.xlu0 %612  ;;  %1801 = vset.pattern.permute.xlu2 %v2194_v19 }
 0x1d1   : > { %v1314_v44 = vadd.f32 %v1313_v2, %v1187_v57  ;;  %v1216_v46 = vmul.f32 %v613_v26, %v309_v50  ;;  %v285_v57 = vld [vmem:[%s2099_s5 + $0x48] sm:$0xff]  ;;  %v1219_v50 = vmul.f32 %v631_v48, %v312_v35  ;;  %v655_v61 = vpop.permute.xlu2 %654  ;;  %v1193_v35 = vmul.f32 %v2269_v33, %v286_v32  ;;  %v290_v33 = vld [vmem:[%s2099_s5 + $0x70] sm:$0xff]  ;;  %v316_v32 = vld [vmem:[%s2099_s5 + $0x140] sm:$0xff] }
 0x1d2   : > { %v1192_v30 = vmul.f32 %v2274_v34, %v285_v57  ;;  %v315_v57 = vld [vmem:[%s2099_s5 + $0x138] sm:$0xff] }
 0x1d3   : > { %v1315_v62 = vadd.f32 %v1314_v44, %v1188_v29  ;;  %v1353_v56 = vadd.f32 %v1216_v46, %v1215_v7  ;;  %v289_v7 = vld [vmem:[%s2099_s5 + $0x68] sm:$0xff] }
 0x1d4   : > { %v1196_v34 = vmul.f32 %v2346_v58, %v289_v7 }
 0x1d5   : > { %v1316_v0 = vadd.f32 %v1315_v62, %v1189_v49  ;;  %v1354_v2 = vadd.f32 %v1353_v56, %v1217_v28  ;;  %v287_v56 = vld [vmem:[%s2099_s5 + $0x58] sm:$0xff]  ;;  %v649_v38 = vpop.permute.xlu1 %648  ;;  %v1197_v28 = vmul.f32 %v2298_v42, %v290_v33 }
 0x1d6   : > { %v1194_v44 = vmul.f32 %v2289_v39, %v287_v56  ;;  %v291_v39 = vld [vmem:[%s2099_s5 + $0x78] sm:$0xff]  ;;  %v1223_v56 = vmul.f32 %v655_v61, %v316_v32 }
 0x1d7   : > { %v1317_v26 = vadd.f32 %v1316_v0, %v1190_v54  ;;  %v1355_v53 = vadd.f32 %v1354_v2, %v1218_v60  ;;  %v1198_v58 = vmul.f32 %v2293_v41, %v291_v39  ;;  %v314_v60 = vld [vmem:[%s2099_s5 + $0x130] sm:$0xff] }
 0x1d8   : > { %781 = vperm.xlu1 %1800, %v2137_v8   ;;  %787 = vperm.xlu2 %1801, %v2137_v8   ;;  %v2439_v5 = vpop.permute.xlu0 %1097  ;;  %v1195_v8 = vmul.f32 %v2281_v37, %v288_v59  ;;  %v318_v59 = vld [vmem:[%s2099_s5 + $0x150] sm:$0xff] }
 0x1d9   : > { %v1318_v21 = vadd.f32 %v1317_v26, %v1191_v27  ;;  %v1356_v47 = vadd.f32 %v1355_v53, %v1219_v50  ;;  %v1347_v53 = vrot.slane %v2395_v63, 4  ;;  %v667_v25 = vpop.permute.xlu2 %666 }
 0x1db   : > { %v1319_v29 = vadd.f32 %v1318_v21, %v1192_v30  ;;  %v1357_v54 = vadd.f32 %v1356_v47, %v1220_v55  ;;  %v1348_v37 = vadd.f32 %v1347_v53, %v2395_v63  ;;  %v1222_v55 = vmul.f32 %v649_v38, %v315_v57  ;;  %v317_v47 = vld [vmem:[%s2099_s5 + $0x148] sm:$0xff]  ;;  %v319_v57 = vld [vmem:[%s2099_s5 + $0x158] sm:$0xff] }
 0x1dc   : > { %v1225_v38 = vmul.f32 %v667_v25, %v318_v59  ;;  %v327_v59 = vld [vmem:[%s2099_s5 + $0x198] sm:$0xff] }
 0x1dd   : > { %v1320_v46 = vadd.f32 %v1319_v29, %v1193_v35  ;;  %v661_v49 = vpop.permute.xlu1 %660  ;;  %v1349_v0 = vrot.slane %v1348_v37, 2 }
 0x1df   : > { %v1321_v43 = vadd.f32 %v1320_v46, %v1194_v44  ;;  %v1350_v30 = vadd.f32 %v1349_v0, %v1348_v37  ;;  %v1224_v44 = vmul.f32 %v661_v49, %v317_v47  ;;  %v324_v49 = vld [vmem:[%s2099_s5 + $0x180] sm:$0xff]  ;;  %v325_v37 = vld [vmem:[%s2099_s5 + $0x188] sm:$0xff] }
 0x1e0   : > { %1803 = vset.pattern.permute.xlu1 %v2117_v3  ;;  %1804 = vset.pattern.permute.xlu2 %v2203_v20  ;;  %v1231_v25 = vmul.f32 %v2265_v31, %v324_v49 }
 0x1e1   : > { %v1322_v48 = vadd.f32 %v1321_v43, %v1195_v8  ;;  %v685_v1 = vpop.permute.xlu2 %684  ;;  %v1351_v7 = vrot.slane %v1350_v30, 1 }
 0x1e3   : > { %v1323_v62 = vadd.f32 %v1322_v48, %v1196_v34  ;;  %v1352_v61 = vadd.f32 %v1351_v7, %v1350_v30  ;;  %v321_v30 = vld [vmem:[%s2099_s5 + $0x168] sm:$0xff] }
 0x1e5   : > { %v1324_v27 = vadd.f32 %v1323_v62, %v1197_v28  ;;  %v679_v63 = vpop.permute.xlu1 %678 }
 0x1e7   : > { %v1325_v2 = vadd.f32 %v1324_v27, %v1198_v58  ;;  %v326_v58 = vld [vmem:[%s2099_s5 + $0x190] sm:$0xff] }
 0x1e8   : > { %800 = vperm.xlu1 %1803, %v2191_v18   ;;  %v643_v50 = vpop.permute.xlu0 %642  ;;  %806 = vperm.xlu2 %1804, %v2191_v18  }
 0x1e9   : > { %v1221_v26 = vmul.f32 %v643_v50, %v314_v60  ;;  %v1326_v42 = vrot.slane %v1325_v2, 4  ;;  %v697_v34 = vpop.permute.xlu2 %696 }
 0x1eb   : > { %v1358_v41 = vadd.f32 %v1357_v54, %v1221_v26  ;;  %v1327_v21 = vadd.f32 %v1326_v42, %v1325_v2  ;;  %v320_v26 = vld [vmem:[%s2099_s5 + $0x160] sm:$0xff] }
 0x1ed   : > { %v1359_v35 = vadd.f32 %v1358_v41, %v1222_v55  ;;  %v1328_v29 = vrot.slane %v1327_v21, 2  ;;  %v691_v43 = vpop.permute.xlu1 %690  ;;  %v1227_v55 = vmul.f32 %v679_v63, %v320_v26  ;;  %v322_v41 = vld [vmem:[%s2099_s5 + $0x170] sm:$0xff] }
 0x1ef   : > { %v1360_v46 = vadd.f32 %v1359_v35, %v1223_v56  ;;  %v1329_v8 = vadd.f32 %v1328_v29, %v1327_v21  ;;  %v1228_v21 = vmul.f32 %v685_v1, %v321_v30  ;;  %v323_v56 = vld [vmem:[%s2099_s5 + $0x178] sm:$0xff]  ;;  %v1229_v35 = vmul.f32 %v691_v43, %v322_v41 }
 0x1f0   : > { %1805 = vset.pattern.permute.xlu1 %v2121_v4  ;;  %1806 = vset.pattern.permute.xlu2 %v2140_v9  ;;  %v2461_v28 = vpop.permute.xlu0 %1127 }
 0x1f1   : > { %v1361_v54 = vadd.f32 %v1360_v46, %v1224_v44  ;;  %v1330_v53 = vrot.slane %v1329_v8, 1  ;;  %v716_v62 = vpop.permute.xlu2 %715  ;;  %v328_v44 = vld [vmem:[%s2099_s5 + $0x1a0] sm:$0xff]  ;;  %v1230_v46 = vmul.f32 %v697_v34, %v323_v56 }
 0x1f2   : > { %v1233_v0 = vmul.f32 %v716_v62, %v326_v58 }
 0x1f3   : > { %v1362_v33 = vadd.f32 %v1361_v54, %v1225_v38  ;;  %v1331_v48 = vadd.f32 %v1330_v53, %v1329_v8  ;;  %v329_v38 = vld [vmem:[%s2099_s5 + $0x1a8] sm:$0xff] }
 0x1f4   : > { %v1236_v1 = vmul.f32 %v2279_v36, %v329_v38  ;;  %v330_v36 = vld [vmem:[%s2099_s5 + $0x1b0] sm:$0xff] }
 0x1f5   : > { %v1488_v39 = vsel %vm1487_vm1, %v1352_v61, %v1331_v48 }
 0x1f8   : > { %812 = vperm.xlu1 %1805, %v2191_v18   ;;  %818 = vperm.xlu2 %1806, %v2191_v18  }
 0x1f9   : > { %v728_v7 = vpop.permute.xlu2 %727 }
 0x1fa   : > { %v710_v27 = vpop.permute.xlu1 %709  ;;  %v1235_v61 = vmul.f32 %v728_v7, %v328_v44  ;;  %v336_v44 = vld [vmem:[%s2099_s5 + $0x1e0] sm:$0xff] }
 0x1fb   : > { %v1232_v60 = vmul.f32 %v710_v27, %v325_v37 }
 0x1fd   : > { %v1374_v2 = vadd.f32 %v1232_v60, %v1231_v25  ;;  %v331_v60 = vld [vmem:[%s2099_s5 + $0x1b8] sm:$0xff] }
 0x1ff   : > { %v1375_v50 = vadd.f32 %v1374_v2, %v1233_v0 }
 0x200   : > { %1808 = vset.pattern.permute.xlu1 %v2144_v10  ;;  %v673_v42 = vpop.permute.xlu0 %672  ;;  %1809 = vset.pattern.permute.xlu2 %v2152_v11 }
 0x201   : > { %v1226_v32 = vmul.f32 %v673_v42, %v319_v57 }
 0x202   : > { %v746_v27 = vpop.permute.xlu2 %745 }
 0x203   : > { %v1363_v31 = vadd.f32 %v1362_v33, %v1226_v32  ;;  %v332_v32 = vld [vmem:[%s2099_s5 + $0x1c0] sm:$0xff] }
 0x205   : > { %v1364_v47 = vadd.f32 %v1363_v31, %v1227_v55  ;;  %v333_v55 = vld [vmem:[%s2099_s5 + $0x1c8] sm:$0xff] }
 0x207   : > { %v1365_v29 = vadd.f32 %v1364_v47, %v1228_v21 }
 0x208   : > { %830 = vperm.xlu1 %1808, %v2191_v18   ;;  %836 = vperm.xlu2 %1809, %v2191_v18  }
 0x209   : > { %v1366_v8 = vadd.f32 %v1365_v29, %v1229_v35 }
 0x20a   : > { %v722_v54 = vpop.permute.xlu1 %721 }
 0x20b   : > { %v1367_v53 = vadd.f32 %v1366_v8, %v1230_v46  ;;  %v1234_v63 = vmul.f32 %v722_v54, %v327_v59  ;;  %v335_v59 = vld [vmem:[%s2099_s5 + $0x1d8] sm:$0xff] }
 0x20d   : > { %v1368_v43 = vrot.slane %v1367_v53, 4  ;;  %v1376_v33 = vadd.f32 %v1375_v50, %v1234_v63  ;;  %v1238_v50 = vmul.f32 %v746_v27, %v331_v60  ;;  %v340_v60 = vld [vmem:[%s2099_s5 + $0x200] sm:$0xff] }
 0x20f   : > { %v1369_v48 = vadd.f32 %v1368_v43, %v1367_v53  ;;  %v1377_v49 = vadd.f32 %v1376_v33, %v1235_v61  ;;  %v337_v53 = vld [vmem:[%s2099_s5 + $0x1e8] sm:$0xff]  ;;  %v338_v61 = vld [vmem:[%s2099_s5 + $0x1f0] sm:$0xff] }
 0x210   : > { %1810 = vset.pattern.permute.xlu1 %v2155_v12  ;;  %1811 = vset.pattern.permute.xlu2 %v2227_v23 }
 0x211   : > { %v1370_v37 = vrot.slane %v1369_v48, 2  ;;  %v1378_v34 = vadd.f32 %v1377_v49, %v1236_v1  ;;  %v339_v1 = vld [vmem:[%s2099_s5 + $0x1f8] sm:$0xff] }
 0x212   : > { %v758_v30 = vpop.permute.xlu2 %757  ;;  %v1246_v49 = vmul.f32 %v2302_v45, %v339_v1  ;;  %v349_v1 = vld [vmem:[%s2099_s5 + $0x248] sm:$0xff] }
 0x213   : > { %v1371_v62 = vadd.f32 %v1370_v37, %v1369_v48  ;;  %v1240_v21 = vmul.f32 %v758_v30, %v333_v55  ;;  %v342_v55 = vld [vmem:[%s2099_s5 + $0x210] sm:$0xff] }
 0x215   : > { %v1372_v58 = vrot.slane %v1371_v62, 1 }
 0x217   : > { %v1373_v25 = vadd.f32 %v1372_v58, %v1371_v62 }
 0x218   : > { %842 = vperm.xlu1 %1810, %v2191_v18   ;;  %848 = vperm.xlu2 %1811, %v2191_v18  }
 0x219   : > { %v2487_v0 = vsel %vm1489_vm2, %v1373_v25, %v1488_v39  ;;  %v334_v39 = vld [vmem:[%s2099_s5 + $0x1d0] sm:$0xff] }
 0x21a   : > { %v740_v2 = vpop.permute.xlu1 %739  ;;  %v1241_v47 = vmul.f32 %v2291_v40, %v334_v39 }
 0x21b   : > { %v1237_v57 = vmul.f32 %v740_v2, %v330_v36  ;;  %v341_v36 = vld [vmem:[%s2099_s5 + $0x208] sm:$0xff] }
 0x21d   : > { %v1379_v26 = vadd.f32 %v1378_v34, %v1237_v57 }
 0x21f   : > { %v1380_v42 = vadd.f32 %v1379_v26, %v1238_v50 }
 0x220   : > { %1813 = vset.pattern.permute.xlu1 %v2161_v13  ;;  %1814 = vset.pattern.permute.xlu2 %v2179_v16 }
 0x222   : > { %v776_v7 = vpop.permute.xlu2 %775 }
 0x223   : > { %v1243_v40 = vmul.f32 %v776_v7, %v336_v44  ;;  %v345_v7 = vld [vmem:[%s2099_s5 + $0x228] sm:$0xff] }
 0x228   : > { %860 = vperm.xlu1 %1813, %v2191_v18   ;;  %866 = vperm.xlu2 %1814, %v2191_v18  }
 0x22a   : > { %v752_v31 = vpop.permute.xlu1 %751 }
 0x22b   : > { %v1239_v41 = vmul.f32 %v752_v31, %v332_v32  ;;  %v343_v31 = vld [vmem:[%s2099_s5 + $0x218] sm:$0xff] }
 0x22d   : > { %v1381_v56 = vadd.f32 %v1380_v42, %v1239_v41  ;;  %v344_v41 = vld [vmem:[%s2099_s5 + $0x220] sm:$0xff] }
 0x22f   : > { %v1382_v35 = vadd.f32 %v1381_v56, %v1240_v21 }
 0x230   : > { %1815 = vset.pattern.permute.xlu1 %v2182_v17  ;;  %1816 = vset.pattern.permute.xlu2 %v2239_v24 }
 0x231   : > { %v1383_v29 = vadd.f32 %v1382_v35, %v1241_v47 }
 0x232   : > { %v788_v63 = vpop.permute.xlu2 %787 }
 0x233   : > { %v1245_v48 = vmul.f32 %v788_v63, %v338_v61  ;;  %v348_v61 = vld [vmem:[%s2099_s5 + $0x240] sm:$0xff] }
 0x238   : > { %872 = vperm.xlu1 %1815, %v2191_v18   ;;  %878 = vperm.xlu2 %1816, %v2191_v18  }
 0x23a   : > { %v770_v46 = vpop.permute.xlu1 %769 }
 0x23b   : > { %v1242_v8 = vmul.f32 %v770_v46, %v335_v59  ;;  %v346_v46 = vld [vmem:[%s2099_s5 + $0x230] sm:$0xff] }
 0x23d   : > { %v1384_v38 = vadd.f32 %v1383_v29, %v1242_v8 }
 0x23f   : > { %v1385_v54 = vadd.f32 %v1384_v38, %v1243_v40 }
 0x240   : > { %1818 = vset.pattern.permute.xlu1 %v2173_v15  ;;  %1819 = vset.pattern.permute.xlu2 %v2117_v3 }
 0x242   : > { %v807_v25 = vpop.permute.xlu2 %806 }
 0x243   : > { %v1248_v2 = vmul.f32 %v807_v25, %v341_v36  ;;  %v351_v25 = vld [vmem:[%s2099_s5 + $0x258] sm:$0xff] }
 0x248   : > { %890 = vperm.xlu1 %1818, %v2191_v18   ;;  %897 = vperm.xlu2 %1819, %v2221_v22  }
 0x24a   : > { %v782_v43 = vpop.permute.xlu1 %781 }
 0x24b   : > { %v1244_v33 = vmul.f32 %v782_v43, %v337_v53  ;;  %v347_v53 = vld [vmem:[%s2099_s5 + $0x238] sm:$0xff] }
 0x24d   : > { %v1386_v37 = vadd.f32 %v1385_v54, %v1244_v33 }
 0x24f   : > { %v1387_v34 = vadd.f32 %v1386_v37, %v1245_v48 }
 0x250   : > { %1820 = vset.pattern.permute.xlu1 %v2203_v20  ;;  %1821 = vset.pattern.permute.xlu2 %v2121_v4 }
 0x251   : > { %v1388_v18 = vadd.f32 %v1387_v34, %v1246_v49  ;;  %v1256_v49 = vmul.f32 %v2315_v52, %v349_v1 }
 0x252   : > { %v819_v39 = vpop.permute.xlu2 %818 }
 0x253   : > { %v1389_v62 = vrot.slane %v1388_v18, 4  ;;  %v1250_v56 = vmul.f32 %v819_v39, %v343_v31  ;;  %v2721_v39 = vld [vmem:[#allocation14_spill] sm:$0xff] }
 0x255   : > { %v1390_v58 = vadd.f32 %v1389_v62, %v1388_v18  ;;  %v350_v62 = vld [vmem:[%s2099_s5 + $0x250] sm:$0xff] }
 0x257   : > { %v1391_v27 = vrot.slane %v1390_v58, 2 }
 0x258   : > { %903 = vperm.xlu1 %1820, %v2221_v22   ;;  %909 = vperm.xlu2 %1821, %v2221_v22  }
 0x259   : > { %v1392_v45 = vadd.f32 %v1391_v27, %v1390_v58 }
 0x25a   : > { %v801_v57 = vpop.permute.xlu1 %800 }
 0x25b   : > { %v1393_v50 = vrot.slane %v1392_v45, 1  ;;  %v1247_v26 = vmul.f32 %v801_v57, %v340_v60 }
 0x25d   : > { %v1394_v42 = vadd.f32 %v1393_v50, %v1392_v45  ;;  %v1395_v32 = vadd.f32 %v1248_v2, %v1247_v26  ;;  %v352_v2 = vld [vmem:[%s2099_s5 + $0x260] sm:$0xff]  ;;  %v353_v50 = vld [vmem:[%s2099_s5 + $0x268] sm:$0xff]  ;;  %v354_v26 = vld [vmem:[%s2099_s5 + $0x270] sm:$0xff] }
 0x25e   : > { %v1261_v31 = vmul.f32 %v2721_v39, %v354_v26 }
 0x25f   : > { %v2518_v30 = vsel %vm1491_vm3, %v1394_v42, %v2487_v0  ;;  %v1251_v0 = vmul.f32 %v2309_v51, %v344_v41 }
 0x260   : > { %1824 = vset.pattern.permute.xlu1 %v2126_v6  ;;  %1825 = vset.pattern.permute.xlu2 %v2144_v10 }
 0x262   : > { %v837_v44 = vpop.permute.xlu2 %836 }
 0x263   : > { %v1253_v51 = vmul.f32 %v837_v44, %v346_v46 }
 0x268   : > { %921 = vperm.xlu1 %1824, %v2221_v22   ;;  %927 = vperm.xlu2 %1825, %v2221_v22  }
 0x26a   : > { %v813_v21 = vpop.permute.xlu1 %812 }
 0x26b   : > { %v1249_v47 = vmul.f32 %v813_v21, %v342_v55 }
 0x26d   : > { %v1396_v35 = vadd.f32 %v1395_v32, %v1249_v47 }
 0x26f   : > { %v1397_v29 = vadd.f32 %v1396_v35, %v1250_v56  ;;  %v2722_v56 = vld [vmem:[#allocation13_spill] sm:$0xff] }
 0x270   : > { %1826 = vset.pattern.permute.xlu1 %v2152_v11  ;;  %1827 = vset.pattern.permute.xlu2 %v2155_v12 }
 0x271   : > { %v1398_v59 = vadd.f32 %v1397_v29, %v1251_v0  ;;  %v355_v0 = vld [vmem:[%s2099_s5 + $0x278] sm:$0xff] }
 0x272   : > { %v849_v63 = vpop.permute.xlu2 %848 }
 0x273   : > { %v1255_v48 = vmul.f32 %v849_v63, %v348_v61  ;;  %v359_v63 = vld [vmem:[%s2099_s5 + $0x298] sm:$0xff] }
 0x278   : > { %933 = vperm.xlu1 %1826, %v2221_v22   ;;  %939 = vperm.xlu2 %1827, %v2221_v22  }
 0x27a   : > { %v831_v8 = vpop.permute.xlu1 %830 }
 0x27b   : > { %v1252_v40 = vmul.f32 %v831_v8, %v345_v7 }
 0x27d   : > { %v1399_v38 = vadd.f32 %v1398_v59, %v1252_v40  ;;  %v356_v40 = vld [vmem:[%s2099_s5 + $0x280] sm:$0xff] }
 0x27f   : > { %v1400_v54 = vadd.f32 %v1399_v38, %v1253_v51  ;;  %v357_v51 = vld [vmem:[%s2099_s5 + $0x288] sm:$0xff] }
 0x280   : > { %1829 = vset.pattern.permute.xlu1 %v2167_v14  ;;  %1830 = vset.pattern.permute.xlu2 %v2161_v13 }
 0x282   : > { %v867_v58 = vpop.permute.xlu2 %866 }
 0x283   : > { %v1258_v52 = vmul.f32 %v867_v58, %v351_v25  ;;  %v360_v58 = vld [vmem:[%s2099_s5 + $0x2a0] sm:$0xff]  ;;  %v361_v25 = vld [vmem:[%s2099_s5 + $0x2a8] sm:$0xff] }
 0x288   : > { %951 = vperm.xlu1 %1829, %v2221_v22   ;;  %957 = vperm.xlu2 %1830, %v2221_v22  }
 0x28a   : > { %v843_v43 = vpop.permute.xlu1 %842 }
 0x28b   : > { %v1254_v33 = vmul.f32 %v843_v43, %v347_v53 }
 0x28d   : > { %v1401_v37 = vadd.f32 %v1400_v54, %v1254_v33  ;;  %v358_v54 = vld [vmem:[%s2099_s5 + $0x290] sm:$0xff] }
 0x28f   : > { %v1402_v34 = vadd.f32 %v1401_v37, %v1255_v48 }
 0x290   : > { %1831 = vset.pattern.permute.xlu1 %v2179_v16  ;;  %1832 = vset.pattern.permute.xlu2 %v2182_v17 }
 0x291   : > { %v1403_v18 = vadd.f32 %v1402_v34, %v1256_v49  ;;  %v2723_v49 = vld [vmem:[#allocation15_spill] sm:$0xff] }
 0x292   : > { %v879_v57 = vpop.permute.xlu2 %878  ;;  %v1266_v37 = vmul.f32 %v2723_v49, %v359_v63  ;;  %v371_v49 = vld [vmem:[%s2099_s5 + $0x2f8] sm:$0xff] }
 0x293   : > { %v1260_v55 = vmul.f32 %v879_v57, %v353_v50  ;;  %v363_v57 = vld [vmem:[%s2099_s5 + $0x2b8] sm:$0xff]  ;;  %v364_v50 = vld [vmem:[%s2099_s5 + $0x2c0] sm:$0xff] }
 0x298   : > { %963 = vperm.xlu1 %1831, %v2221_v22   ;;  %969 = vperm.xlu2 %1832, %v2221_v22  }
 0x29a   : > { %v861_v36 = vpop.permute.xlu1 %860 }
 0x29b   : > { %v1257_v27 = vmul.f32 %v861_v36, %v350_v62 }
 0x29d   : > { %v1404_v60 = vadd.f32 %v1403_v18, %v1257_v27 }
 0x29f   : > { %v1405_v45 = vadd.f32 %v1404_v60, %v1258_v52 }
 0x2a0   : > { %1834 = vset.pattern.permute.xlu1 %v2194_v19  ;;  %1835 = vset.pattern.permute.xlu2 %v2173_v15 }
 0x2a2   : > { %v898_v7 = vpop.permute.xlu2 %897 }
 0x2a3   : > { %v1263_v43 = vmul.f32 %v898_v7, %v356_v40 }
 0x2a8   : > { %981 = vperm.xlu1 %1834, %v2221_v22   ;;  %987 = vperm.xlu2 %1835, %v2221_v22  }
 0x2aa   : > { %v873_v42 = vpop.permute.xlu1 %872 }
 0x2ab   : > { %v1259_v32 = vmul.f32 %v873_v42, %v352_v2 }
 0x2ad   : > { %v1406_v41 = vadd.f32 %v1405_v45, %v1259_v32 }
 0x2af   : > { %v1407_v21 = vadd.f32 %v1406_v41, %v1260_v55  ;;  %v2724_v55 = vld [vmem:[#allocation17_spill] sm:$0xff] }
 0x2b0   : > { %1836 = vset.pattern.permute.xlu1 %v2117_v3  ;;  %1837 = vset.pattern.permute.xlu2 %v2203_v20  ;;  %v1271_v39 = vmul.f32 %v2724_v55, %v364_v50 }
 0x2b1   : > { %v1408_v47 = vadd.f32 %v1407_v21, %v1261_v31 }
 0x2b2   : > { %v910_v38 = vpop.permute.xlu2 %909 }
 0x2b3   : > { %v1265_v48 = vmul.f32 %v910_v38, %v358_v54  ;;  %v2725_v54 = vld [vmem:[#allocation18_spill] sm:$0xff] }
 0x2b8   : > { %994 = vperm.xlu1 %1836, %v2722_v56   ;;  %1000 = vperm.xlu2 %1837, %v2722_v56  }
 0x2ba   : > { %v891_v22 = vpop.permute.xlu1 %890 }
 0x2bb   : > { %v1262_v35 = vmul.f32 %v891_v22, %v355_v0  ;;  %v366_v22 = vld [vmem:[%s2099_s5 + $0x2d0] sm:$0xff] }
 0x2bd   : > { %v1409_v29 = vadd.f32 %v1408_v47, %v1262_v35  ;;  %v365_v47 = vld [vmem:[%s2099_s5 + $0x2c8] sm:$0xff] }
 0x2bf   : > { %v1410_v59 = vrot.slane %v1409_v29, 4 }
 0x2c0   : > { %1839 = vset.pattern.permute.xlu1 %v2140_v9  ;;  %1840 = vset.pattern.permute.xlu2 %v2126_v6 }
 0x2c1   : > { %v1411_v20 = vadd.f32 %v1410_v59, %v1409_v29 }
 0x2c3   : > { %v1412_v44 = vrot.slane %v1411_v20, 2 }
 0x2c5   : > { %v1413_v46 = vadd.f32 %v1412_v44, %v1411_v20 }
 0x2c7   : > { %v1414_v8 = vrot.slane %v1413_v46, 1 }
 0x2c8   : > { %1012 = vperm.xlu1 %1839, %v2722_v56   ;;  %1018 = vperm.xlu2 %1840, %v2722_v56  }
 0x2c9   : > { %v1415_v53 = vadd.f32 %v1414_v8, %v1413_v46  ;;  %v368_v46 = vld [vmem:[%s2099_s5 + $0x2e0] sm:$0xff]  ;;  %v369_v8 = vld [vmem:[%s2099_s5 + $0x2e8] sm:$0xff] }
 0x2ca   : > { %v904_v61 = vpop.permute.xlu1 %903 }
 0x2cb   : > { %v2570_v1 = vsel %vm1493_vm4, %v1415_v53, %v2518_v30  ;;  %v1264_v33 = vmul.f32 %v904_v61, %v357_v51  ;;  %v928_v30 = vpop.permute.xlu2 %927  ;;  %v1276_v53 = vmul.f32 %v2725_v54, %v369_v8  ;;  %v381_v54 = vld [vmem:[%s2099_s5 + $0x348] sm:$0xff] }
 0x2cc   : > { %v1268_v52 = vmul.f32 %v928_v30, %v361_v25 }
 0x2cd   : > { %v1416_v34 = vadd.f32 %v1264_v33, %v1263_v43  ;;  %v370_v33 = vld [vmem:[%s2099_s5 + $0x2f0] sm:$0xff] }
 0x2cf   : > { %v1417_v18 = vadd.f32 %v1416_v34, %v1265_v48 }
 0x2d0   : > { %1841 = vset.pattern.permute.xlu1 %v2144_v10  ;;  %1842 = vset.pattern.permute.xlu2 %v2152_v11  ;;  %v362_v11 = vld [vmem:[%s2099_s5 + $0x2b0] sm:$0xff] }
 0x2d1   : > { %v1418_v62 = vadd.f32 %v1417_v18, %v1266_v37  ;;  %v2726_v37 = vld [vmem:[#allocation16_spill] sm:$0xff] }
 0x2d3   : > { %v940_v2 = vpop.permute.xlu2 %939 }
 0x2d4   : > { %v1270_v32 = vmul.f32 %v940_v2, %v363_v57  ;;  %v2727_v57 = vld [vmem:[#allocation19_spill] sm:$0xff] }
 0x2d8   : > { %1024 = vperm.xlu1 %1841, %v2722_v56   ;;  %1030 = vperm.xlu2 %1842, %v2722_v56  }
 0x2da   : > { %v922_v36 = vpop.permute.xlu1 %921 }
 0x2db   : > { %v1267_v27 = vmul.f32 %v922_v36, %v360_v58 }
 0x2dd   : > { %v1419_v60 = vadd.f32 %v1418_v62, %v1267_v27  ;;  %v373_v27 = vld [vmem:[%s2099_s5 + $0x308] sm:$0xff] }
 0x2df   : > { %v1420_v45 = vadd.f32 %v1419_v60, %v1268_v52  ;;  %v374_v60 = vld [vmem:[%s2099_s5 + $0x310] sm:$0xff] }
 0x2e0   : > { %1844 = vset.pattern.permute.xlu1 %v2227_v23  ;;  %1845 = vset.pattern.permute.xlu2 %v2167_v14 }
 0x2e2   : > { %v958_v0 = vpop.permute.xlu2 %957 }
 0x2e3   : > { %v1273_v59 = vmul.f32 %v958_v0, %v366_v22 }
 0x2e8   : > { %1042 = vperm.xlu1 %1844, %v2722_v56   ;;  %1048 = vperm.xlu2 %1845, %v2722_v56  }
 0x2ea   : > { %v934_v26 = vpop.permute.xlu1 %933 }
 0x2eb   : > { %v1269_v42 = vmul.f32 %v934_v26, %v362_v11 }
 0x2ed   : > { %v1421_v31 = vadd.f32 %v1420_v45, %v1269_v42  ;;  %v372_v45 = vld [vmem:[%s2099_s5 + $0x300] sm:$0xff] }
 0x2ef   : > { %v1422_v41 = vadd.f32 %v1421_v31, %v1270_v32 }
 0x2f0   : > { %1846 = vset.pattern.permute.xlu1 %v2161_v13  ;;  %1847 = vset.pattern.permute.xlu2 %v2179_v16  ;;  %v367_v16 = vld [vmem:[%s2099_s5 + $0x2d8] sm:$0xff] }
 0x2f1   : > { %v1423_v21 = vadd.f32 %v1422_v41, %v1271_v39  ;;  %v375_v39 = vld [vmem:[%s2099_s5 + $0x318] sm:$0xff]  ;;  %v376_v41 = vld [vmem:[%s2099_s5 + $0x320] sm:$0xff] }
 0x2f2   : > { %v970_v44 = vpop.permute.xlu2 %969 }
 0x2f3   : > { %v1275_v38 = vmul.f32 %v970_v44, %v368_v46 }
 0x2f8   : > { %1054 = vperm.xlu1 %1846, %v2722_v56   ;;  %1060 = vperm.xlu2 %1847, %v2722_v56  }
 0x2fa   : > { %v952_v35 = vpop.permute.xlu1 %951 }
 0x2fb   : > { %v1272_v29 = vmul.f32 %v952_v35, %v365_v47  ;;  %v378_v35 = vld [vmem:[%s2099_s5 + $0x330] sm:$0xff] }
 0x2fd   : > { %v1424_v7 = vadd.f32 %v1423_v21, %v1272_v29  ;;  %v379_v29 = vld [vmem:[%s2099_s5 + $0x338] sm:$0xff] }
 0x2ff   : > { %v1425_v20 = vadd.f32 %v1424_v7, %v1273_v59 }
 0x300   : > { %1849 = vset.pattern.permute.xlu1 %v2239_v24  ;;  %1850 = vset.pattern.permute.xlu2 %v2194_v19 }
 0x302   : > { %v988_v48 = vpop.permute.xlu2 %987 }
 0x303   : > { %v1278_v62 = vmul.f32 %v988_v48, %v371_v49 }
 0x308   : > { %1072 = vperm.xlu1 %1849, %v2722_v56   ;;  %1078 = vperm.xlu2 %1850, %v2722_v56  }
 0x30a   : > { %v964_v40 = vpop.permute.xlu1 %963 }
 0x30b   : > { %v1274_v51 = vmul.f32 %v964_v40, %v367_v16  ;;  %v2728_v16 = vld [vmem:[#allocation20_spill] sm:$0xff]  ;;  %v380_v40 = vld [vmem:[%s2099_s5 + $0x340] sm:$0xff] }
 0x30c   : > { %v1286_v44 = vmul.f32 %v2728_v16, %v379_v29 }
 0x30d   : > { %v1426_v63 = vadd.f32 %v1425_v20, %v1274_v51 }
 0x30f   : > { %v1427_v61 = vadd.f32 %v1426_v63, %v1275_v38 }
 0x310   : > { %1851 = vset.pattern.permute.xlu1 %v2173_v15  ;;  %1852 = vset.pattern.permute.xlu2 %v2117_v3 }
 0x311   : > { %v1428_v43 = vadd.f32 %v1427_v61, %v1276_v53  ;;  %v383_v61 = vld [vmem:[%s2099_s5 + $0x358] sm:$0xff] }
 0x312   : > { %v1001_v36 = vpop.permute.xlu2 %1000 }
 0x313   : > { %v1280_v2 = vmul.f32 %v1001_v36, %v373_v27  ;;  %v386_v36 = vld [vmem:[%s2099_s5 + $0x370] sm:$0xff] }
 0x318   : > { %1084 = vperm.xlu1 %1851, %v2722_v56   ;;  %1091 = vperm.xlu2 %1852, %v2726_v37  }
 0x31a   : > { %v982_v34 = vpop.permute.xlu1 %981 }
 0x31b   : > { %v1277_v18 = vmul.f32 %v982_v34, %v370_v33  ;;  %v2729_v34 = vld [vmem:[#allocation21_spill] sm:$0xff] }
 0x31d   : > { %v1429_v58 = vadd.f32 %v1428_v43, %v1277_v18  ;;  %v384_v43 = vld [vmem:[%s2099_s5 + $0x360] sm:$0xff] }
 0x31f   : > { %v1430_v30 = vadd.f32 %v1429_v58, %v1278_v62 }
 0x320   : > { %1854 = vset.pattern.permute.xlu1 %v2121_v4  ;;  %1855 = vset.pattern.permute.xlu2 %v2140_v9  ;;  %v1281_v9 = vmul.f32 %v2727_v57, %v374_v60  ;;  %v387_v60 = vld [vmem:[%s2099_s5 + $0x378] sm:$0xff] }
 0x321   : > { %v1431_v3 = vrot.slane %v1430_v30, 4 }
 0x322   : > { %v1019_v31 = vpop.permute.xlu2 %1018 }
 0x323   : > { %v1432_v25 = vadd.f32 %v1431_v3, %v1430_v30  ;;  %v385_v3 = vld [vmem:[%s2099_s5 + $0x368] sm:$0xff] }
 0x325   : > { %v1433_v56 = vrot.slane %v1432_v25, 2 }
 0x327   : > { %v1434_v52 = vadd.f32 %v1433_v56, %v1432_v25 }
 0x328   : > { %1103 = vperm.xlu1 %1854, %v2726_v37   ;;  %1109 = vperm.xlu2 %1855, %v2726_v37  }
 0x329   : > { %v1435_v11 = vrot.slane %v1434_v52, 1 }
 0x32a   : > { %v995_v4 = vpop.permute.xlu1 %994 }
 0x32b   : > { %v1436_v50 = vadd.f32 %v1435_v11, %v1434_v52  ;;  %v1279_v26 = vmul.f32 %v995_v4, %v372_v45 }
 0x32d   : > { %v2616_v42 = vsel %vm1495_vm5, %v1436_v50, %v2570_v1  ;;  %v1437_v32 = vadd.f32 %v1280_v2, %v1279_v26  ;;  %v1283_v1 = vmul.f32 %v1019_v31, %v376_v41  ;;  %v390_v41 = vld [vmem:[%s2099_s5 + $0x390] sm:$0xff] }
 0x32f   : > { %v1438_v55 = vadd.f32 %v1437_v32, %v1281_v9 }
 0x330   : > { %1856 = vset.pattern.permute.xlu1 %v2126_v6  ;;  %1857 = vset.pattern.permute.xlu2 %v2144_v10  ;;  %v377_v6 = vld [vmem:[%s2099_s5 + $0x328] sm:$0xff] }
 0x332   : > { %v1031_v10 = vpop.permute.xlu2 %1030 }
 0x333   : > { %v1285_v20 = vmul.f32 %v1031_v10, %v378_v35  ;;  %v392_v35 = vld [vmem:[%s2099_s5 + $0x3a0] sm:$0xff] }
 0x338   : > { %1115 = vperm.xlu1 %1856, %v2726_v37   ;;  %1121 = vperm.xlu2 %1857, %v2726_v37  }
 0x33a   : > { %v1013_v21 = vpop.permute.xlu1 %1012 }
 0x33b   : > { %v1282_v47 = vmul.f32 %v1013_v21, %v375_v39  ;;  %v388_v39 = vld [vmem:[%s2099_s5 + $0x380] sm:$0xff] }
 0x33d   : > { %v1439_v0 = vadd.f32 %v1438_v55, %v1282_v47  ;;  %v389_v55 = vld [vmem:[%s2099_s5 + $0x388] sm:$0xff] }
 0x33e   : > { %v1296_v47 = vmul.f32 %v2439_v5, %v389_v55 }
 0x33f   : > { %v1440_v22 = vadd.f32 %v1439_v0, %v1283_v1 }
 0x340   : > { %1859 = vset.pattern.permute.xlu1 %v2155_v12  ;;  %1860 = vset.pattern.permute.xlu2 %v2227_v23 }
 0x342   : > { %v1049_v51 = vpop.permute.xlu2 %1048 }
 0x348   : > { %1133 = vperm.xlu1 %1859, %v2726_v37   ;;  %1139 = vperm.xlu2 %1860, %v2726_v37  }
 0x34a   : > { %v1025_v59 = vpop.permute.xlu1 %1024 }
 0x34b   : > { %v1284_v7 = vmul.f32 %v1025_v59, %v377_v6 }
 0x34d   : > { %v1441_v46 = vadd.f32 %v1440_v22, %v1284_v7  ;;  %v391_v22 = vld [vmem:[%s2099_s5 + $0x398] sm:$0xff] }
 0x34f   : > { %v1442_v8 = vadd.f32 %v1441_v46, %v1285_v20  ;;  %v393_v20 = vld [vmem:[%s2099_s5 + $0x3a8] sm:$0xff] }
 0x350   : > { %1861 = vset.pattern.permute.xlu1 %v2167_v14  ;;  %1862 = vset.pattern.permute.xlu2 %v2161_v13  ;;  %v1288_v14 = vmul.f32 %v1049_v51, %v381_v54  ;;  %v382_v13 = vld [vmem:[%s2099_s5 + $0x350] sm:$0xff]  ;;  %v396_v54 = vld [vmem:[%s2099_s5 + $0x3c0] sm:$0xff] }
 0x351   : > { %v1443_v12 = vadd.f32 %v1442_v8, %v1286_v44  ;;  %v394_v8 = vld [vmem:[%s2099_s5 + $0x3b0] sm:$0xff] }
 0x352   : > { %v1061_v63 = vpop.permute.xlu2 %1060 }
 0x358   : > { %1145 = vperm.xlu1 %1861, %v2726_v37   ;;  %1151 = vperm.xlu2 %1862, %v2726_v37  }
 0x35a   : > { %v1043_v23 = vpop.permute.xlu1 %1042 }
 0x35b   : > { %v1287_v38 = vmul.f32 %v1043_v23, %v380_v40  ;;  %v1301_v40 = vmul.f32 %v2461_v28, %v394_v8 }
 0x35d   : > { %v1444_v53 = vadd.f32 %v1443_v12, %v1287_v38  ;;  %v395_v12 = vld [vmem:[%s2099_s5 + $0x3b8] sm:$0xff] }
 0x35f   : > { %v1445_v48 = vadd.f32 %v1444_v53, %v1288_v14  ;;  %v1158_v14 = vpop.permute.xlu0 %1157 }
 0x360   : > { %1863 = vset.pattern.permute.xlu1 %v2182_v17  ;;  %1864 = vset.pattern.permute.xlu2 %v2239_v24  ;;  %v1290_v17 = vmul.f32 %v1061_v63, %v383_v61  ;;  %v1291_v24 = vmul.f32 %v2729_v34, %v384_v43  ;;  %v397_v63 = vld [vmem:[%s2099_s5 + $0x3c8] sm:$0xff] }
 0x362   : > { %v1079_v56 = vpop.permute.xlu2 %1078 }
 0x363   : > { %v1293_v52 = vmul.f32 %v1079_v56, %v386_v36 }
 0x367   : > { %v1506_v28 = vpop.xlane.xlu0 %1505 }
 0x368   : > { %1163 = vperm.xlu1 %1863, %v2726_v37   ;;  %1169 = vperm.xlu2 %1864, %v2726_v37  }
 0x36a   : > { %v1055_v33 = vpop.permute.xlu1 %1054 }
 0x36b   : > { %v1289_v49 = vmul.f32 %v1055_v33, %v382_v13 }
 0x36d   : > { %v1446_v18 = vadd.f32 %v1445_v48, %v1289_v49  ;;  %v398_v49 = vld [vmem:[%s2099_s5 + $0x3d0] sm:$0xff] }
 0x36f   : > { %v1447_v62 = vadd.f32 %v1446_v18, %v1290_v17  ;;  %v1504_v18 = vld [vmem:[#allocation3] sm:$0xff] }
 0x370   : > { %1865 = vset.pattern.permute.xlu1 %v2194_v19  ;;  %1866 = vset.pattern.permute.xlu2 %v2173_v15 }
 0x371   : > { %v1448_v58 = vadd.f32 %v1447_v62, %v1291_v24  ;;  %v1507_v62 = vadd.f32 %v1506_v28, %v1504_v18 }
 0x372   : > { %v1092_v32 = vpop.permute.xlu2 %1091 }
 0x373   : > { %v1295_v1 = vmul.f32 %v1092_v32, %v388_v39  ;;  %1509 = vst.msk [vmem:[#allocation3] sm:$0xff] %vm1508_vm7, %v1507_v62 }
 0x375   : > { %v1458_v6 = vadd.f32 %v1296_v47, %v1295_v1  ;;  %v406_v47 = vld [vmem:[#allocation2] sm:$0xff] }
 0x378   : > { %1175 = vperm.xlu1 %1865, %v2726_v37   ;;  %1181 = vperm.xlu2 %1866, %v2726_v37  }
 0x37a   : > { %v1073_v30 = vpop.permute.xlu1 %1072 }
 0x37b   : > { %v1292_v25 = vmul.f32 %v1073_v30, %v385_v3  ;;  %v400_v3 = vld [vmem:[%s2099_s5 + $0x3e0] sm:$0xff] }
 0x37d   : > { %v1449_v27 = vadd.f32 %v1448_v58, %v1292_v25  ;;  %v399_v58 = vld [vmem:[%s2099_s5 + $0x3d8] sm:$0xff] }
 0x37e   : > { %v1306_v36 = vmul.f32 %v1158_v14, %v399_v58 }
 0x37f   : > { %v1450_v19 = vadd.f32 %v1449_v27, %v1293_v52  ;;  %v401_v52 = vld [vmem:[%s2099_s5 + $0x3e8] sm:$0xff] }
 0x382   : > { %v1110_v21 = vpop.permute.xlu2 %1109 }
 0x383   : > { %v1298_v29 = vmul.f32 %v1110_v21, %v391_v22 }
 0x38a   : > { %v1085_v45 = vpop.permute.xlu1 %1084 }
 0x38b   : > { %v1294_v11 = vmul.f32 %v1085_v45, %v387_v60 }
 0x38d   : > { %v1451_v15 = vadd.f32 %v1450_v19, %v1294_v11  ;;  %v402_v11 = vld [vmem:[%s2099_s5 + $0x3f0] sm:$0xff] }
 0x38f   : > { %v1452_v2 = vrot.slane %v1451_v15, 4 }
 0x391   : > { %v1453_v4 = vadd.f32 %v1452_v2, %v1451_v15  ;;  %v403_v2 = vld [vmem:[%s2099_s5 + $0x3f8] sm:$0xff] }
 0x392   : > { %v1122_v59 = vpop.permute.xlu2 %1121 }
 0x393   : > { %v1454_v57 = vrot.slane %v1453_v4, 2  ;;  %v1300_v46 = vmul.f32 %v1122_v59, %v393_v20 }
 0x395   : > { %v1455_v37 = vadd.f32 %v1454_v57, %v1453_v4 }
 0x397   : > { %v1456_v9 = vrot.slane %v1455_v37, 1 }
 0x399   : > { %v1457_v50 = vadd.f32 %v1456_v9, %v1455_v37 }
 0x39a   : > { %v1104_v31 = vpop.permute.xlu1 %1103 }
 0x39b   : > { %v2654_v26 = vsel %vm1497_vm6, %v1457_v50, %v2616_v42  ;;  %v1297_v0 = vmul.f32 %v1104_v31, %v390_v41 }
 0x39d   : > { %v1459_v42 = vadd.f32 %v1458_v6, %v1297_v0 }
 0x39f   : > { %v1460_v16 = vadd.f32 %v1459_v42, %v1298_v29 }
 0x3a2   : > { %v1140_v23 = vpop.permute.xlu2 %1139 }
 0x3a3   : > { %v1303_v43 = vmul.f32 %v1140_v23, %v396_v54 }
 0x3aa   : > { %v1116_v10 = vpop.permute.xlu1 %1115 }
 0x3ab   : > { %v1299_v7 = vmul.f32 %v1116_v10, %v392_v35 }
 0x3ad   : > { %v1461_v44 = vadd.f32 %v1460_v16, %v1299_v7 }
 0x3af   : > { %v1462_v51 = vadd.f32 %v1461_v44, %v1300_v46 }
 0x3b1   : > { %v1463_v53 = vadd.f32 %v1462_v51, %v1301_v40 }
 0x3b2   : > { %v1152_v33 = vpop.permute.xlu2 %1151 }
 0x3b3   : > { %v1305_v24 = vmul.f32 %v1152_v33, %v398_v49 }
 0x3ba   : > { %v1134_v5 = vpop.permute.xlu1 %1133 }
 0x3bb   : > { %v1302_v38 = vmul.f32 %v1134_v5, %v395_v12 }
 0x3bd   : > { %v1464_v61 = vadd.f32 %v1463_v53, %v1302_v38 }
 0x3bf   : > { %v1465_v17 = vadd.f32 %v1464_v61, %v1303_v43 }
 0x3c2   : > { %v1170_v25 = vpop.permute.xlu2 %1169 }
 0x3c3   : > { %v1308_v19 = vmul.f32 %v1170_v25, %v401_v52 }
 0x3ca   : > { %v1146_v13 = vpop.permute.xlu1 %1145 }
 0x3cb   : > { %v1304_v48 = vmul.f32 %v1146_v13, %v397_v63 }
 0x3cd   : > { %v1466_v34 = vadd.f32 %v1465_v17, %v1304_v48 }
 0x3cf   : > { %v1467_v56 = vadd.f32 %v1466_v34, %v1305_v24 }
 0x3d1   : > { %v1468_v60 = vadd.f32 %v1467_v56, %v1306_v36 }
 0x3d2   : > { %v1182_v15 = vpop.permute.xlu2 %1181 }
 0x3d3   : > { %v1310_v9 = vmul.f32 %v1182_v15, %v403_v2 }
 0x3da   : > { %v1164_v30 = vpop.permute.xlu1 %1163 }
 0x3db   : > { %v1307_v27 = vmul.f32 %v1164_v30, %v400_v3 }
 0x3dd   : > { %v1469_v45 = vadd.f32 %v1468_v60, %v1307_v27 }
 0x3df   : > { %v1470_v57 = vadd.f32 %v1469_v45, %v1308_v19 }
 0x3ea   : > { %v1176_v4 = vpop.permute.xlu1 %1175 }
 0x3eb   : > { %v1309_v37 = vmul.f32 %v1176_v4, %v402_v11 }
 0x3ed   : > { %v1471_v50 = vadd.f32 %v1470_v57, %v1309_v37 }
 0x3ef   : > { %v1472_v32 = vadd.f32 %v1471_v50, %v1310_v9 }
 0x3f1   : > { %v1473_v55 = vrot.slane %v1472_v32, 4 }
 0x3f3   : > { %v1474_v39 = vadd.f32 %v1473_v55, %v1472_v32 }
 0x3f5   : > { %v1475_v31 = vrot.slane %v1474_v39, 2 }
 0x3f7   : > { %v1476_v41 = vadd.f32 %v1475_v31, %v1474_v39 }
 0x3f9   : > { %v1477_v21 = vrot.slane %v1476_v41, 1 }
 0x3fb   : > { %v1478_v1 = vadd.f32 %v1477_v21, %v1476_v41 }
 0x3fc   : > { %1513 = sbr.rel (%p1662_p1) target bundleno = 1153 (0x481), region = 44 }
 0x3fd   : > { %v1500_v0 = vsel %vm1499_vm8, %v1478_v1, %v2654_v26 }
 0x3fe   : > { %v1502_v22 = vadd.f32 %v1500_v0, %v406_v47 }
 0x400   : > { %1503 = vst [vmem:[#allocation2] sm:$0xff] %v1502_v22 }
 0x401   : > { %v1514_v6 = vld [vmem:[#allocation3] sm:$0xff]  ;;  %v1978_v10 = vmov 0  }
 0x402   : > { %1868 = vset.pattern.permute.xlu0 %v1978_v10  ;;  %v1515_v35 = vmax.f32 %v1514_v6, 1.0 }
 0x404   : > { %1869 = vrcp.f32 %v1515_v35 }
 0x407   : > { %v1516_v29 = vld [vmem:[#allocation2] sm:$0xff] }
 0x40a   : > { %v1870_v42 = vpop.eup %1869 }
 0x40b   : > { %1520 = vperm.xlu0 %1868, %v1870_v42  }
 0x47d   : > { %v1521_v59 = vpop.permute.xlu0 %1520 }
 0x47e   : > { %v1523_v7 = vmul.f32 %v1521_v59, %v1516_v29 }
 0x480   : > { %1524 = vst [vmem:[%s2114_s19] sm:$0xff] %v1523_v7 }
 0x481 PF: > { %s18_s16 = sadd.s32 1, %s1969_s16   ;;  %s2730_s9 = smov %s1945_s10 }
 0x482   : > { %p15_p2 = scmp.ge.s32.totalorder %s18_s16, 66   ;;  %s2731_s10 = smov %s1949_s11 }
 0x483   : > { %s2732_s11 = smov %s2058_s26  ;;  %s2733_s12 = smov %s1961_s14 }
 0x484   : > { %s2734_s13 = smov %s1965_s15  ;;  %s2735_s14 = smov %s2738_s17 }
 0x485   : > { %s2736_s15 = smov %s2742_s18  ;;  %17 = sbr.rel (!%p15_p2) target bundleno = 9 (0x9), region = 94 }
 0x48a   :  { %1550 = vsyncpa [#allocation5], 1 }
 0x48b   :  { %1552 = vsyncpa [#allocation5 + $0x1], 1 }
 0x48c   :  { %1553 = vsyncpa [#allocation7], 1 }
 0x48d   :  { %1555 = vsyncpa [#allocation7 + $0x1], 1 }

// kernel: dual_encoder_forward.3
= control target key start
LH: loop header
LB: loop body
LE: loop exit
PB: predicated region body
PF: predicated region fallthrough
CT: control target
= control target key end

     0   :  { %7 = vsyncpa [#allocation5], 0  ;;  %s2630_s0 = inlined_call_operand.hbm [shape: f32[8,256,128], index: 0, kind: input, shape index: {}]   ;;  %s2631_s1 = inlined_call_operand.hbm [shape: s32[8,256], index: 1, kind: input, shape index: {}]   ;;  %s2632_s2 = inlined_call_operand.vmem [shape: f32[8,128], index: 2, kind: output, shape index: {}]  }
   0x1   :  { %9 = vsyncpa [#allocation5 + $0x1], 0 }
   0x2   :  { %10 = vsyncpa [#allocation7], 0 }
   0x3   :  { %12 = vsyncpa [#allocation7 + $0x1], 0  ;;  %s1952_s9 = smov 0   ;;  %s1954_s10 = smov 0  }
   0x4   :  { %s1956_s11 = smov 0   ;;  %s1958_s12 = smov 0  }
   0x5   :  { %s1960_s13 = smov 0   ;;  %s1962_s14 = smov 0  }
   0x6 LB: > { %s1637_s15 = sadd.s32 4294967295, %s1927_s14   ;;  %s30_s16 = sadd.s32 1, %s1923_s13  ;;  %s1927_s14 = sphi %s1962_s14, %s18_s14   ;;  %s1923_s13 = sphi %s1960_s13, %s2661_s13   ;;  %s1919_s12 = sphi %s1958_s12, %s2660_s12   ;;  %s1915_s11 = sphi %s1956_s11, %s2659_s11   ;;  %s1911_s10 = sphi %s1954_s10, %s2658_s10   ;;  %s1907_s9 = sphi %s1952_s9, %s2657_s9  }
   0x7   : > { %p31_p0 = scmp.ge.s32.totalorder %s30_s16, 2  ;;  %s48_s17 = sadd.s32 1, %s1915_s11 }
   0x8   : > { %p55_p1 = scmp.ne.s32.totalorder %s1915_s11, %s1911_s10  ;;  %p56_p2 = scmp.eq.s32.totalorder %s1927_s14, 0 }
   0x9   : > { %s2663_s16 = smov (%p31_p0, %s30_s16), 0  ;;  %p61_p4 = scmp.ne.s32.totalorder %s1911_s10, %s1907_s9 }
   0xa   : > { %p1988_p3 = por %p56_p2, %p55_p1  ;;  %s42_s19 = ssub.s32 %s1923_s13, %s2663_s16 }
   0xb   : > { %p62_p5 = scmp.eq.s32.totalorder %s1637_s15, 0  ;;  %p46_p6 = scmp.eq.s32.totalorder %s42_s19, 0 }
   0xc   : > { %p1639_p8 = scmp.ge.s32.totalorder %s1927_s14, 2 }
   0xd   : > { %p1995_p7 = por %p62_p5, %p61_p4 }
   0xe   : > { %s2000_s21 = scalar_select %p46_p6, %s1915_s11, %s48_s17  }
   0xf   : > { %137 = sbr.rel (%p1639_p8) target bundleno = 38 (0x26), region = 16 }
  0x14   : > { %s2004_s22 = sand.u32 1, %s1915_s11   ;;  %s1655_s23 = sshll.u32 %s1923_s13, 7 }
  0x15   : > { %s1640_s24 = sshll.u32 %s2004_s22, 10  ;;  %s154_s27 = scalar_lea.hbm %s2630_s0, %s1655_s23 }
  0x16   : > { %s1656_s28 = scalar_select %p1988_p3, [#allocation0], [#allocation10] }
  0x17   : > { %s167_s29 = sshll.u32 %s154_s27, 4  ;;  %s145_s30 = scalar_lea.vmem [#allocation4], %s1640_s24  ;;  %s168_s29 = int_to_ptr.hbm [resolvable:$true] %s167_s29 }
  0x18   : > { %s169_s3 = sshll.u32 %s145_s30, 4  ;;  %s159_s4 = sld [smem:[%s1656_s28]]   ;;  %s170_s3 = int_to_ptr.vmem [resolvable:$true] %s169_s3 }
  0x19   : > { %s1929_s5 = smov 4096   ;;  %s1930_s6 = smov 2048  }
  0x1a   : > { %1657 = sst [smem:[#allocation9]] (%p1988_p3), %s1929_s5  ;;  %s1931_s7 = smov 16  }
  0x1b   : > { %1658 = sst [smem:[#allocation9 + $0x1]] (%p1988_p3), %s1930_s6  ;;  %s1932_s8 = smov 128  }
  0x1c   : > { %1659 = sst [smem:[#allocation9 + $0x2]] (%p1988_p3), %s1931_s7  ;;  %s1933_s17 = smov 8  }
  0x1d   : > { %1660 = sst [smem:[#allocation9 + $0x3]] (%p1988_p3), %s1932_s8  ;;  %s142_s19 = scalar_lea.sflag [#allocation5], %s2004_s22 }
  0x1e   : > { %s1643_s9 = sshll.u32 %s159_s4, 26  ;;  %1661 = sst [smem:[#allocation9 + $0x4]] (%p1988_p3), %s1932_s8 }
  0x1f   : > { %s1644_s15 = sadd.s32 134217728, %s1643_s9  ;;  %1662 = sst [smem:[#allocation9 + $0x5]] (%p1988_p3), %s1933_s17 }
  0x20   : > { %s1934_s23 = smov [#allocation8]   ;;  %s1645_s24 = sshll.u32 %s2004_s22, 3 }
  0x21   : > { %1663 = dma.general (%p1988_p3), %s168_s29, 16384, %s170_s3, %s142_s19, %s1934_s23, [#allocation9], %s1644_s15, 0  }
  0x22   : > { %s1646_s25 = sshll.u32 %s1923_s13, 3  ;;  %s196_s30 = scalar_lea.vmem [#allocation6], %s1645_s24 }
  0x23   : > { %s202_s28 = scalar_lea.hbm %s2631_s1, %s1646_s25  ;;  %s206_s4 = sshll.u32 %s196_s30, 4  ;;  %s207_s4 = int_to_ptr.vmem [resolvable:$true] %s206_s4 }
  0x24   : > { %s204_s5 = sshll.u32 %s202_s28, 4  ;;  %s193_s6 = scalar_lea.sflag [#allocation7], %s2004_s22  ;;  %s205_s5 = int_to_ptr.hbm [resolvable:$true] %s204_s5 }
  0x25   : > { %1664 = dma.hbm_to_vmem [thread:$0]  (%p1988_p3), %s205_s5, 128, %s207_s4, %s193_s6  }
  0x26 PF: > { %p1647_p9 = scmp.ge.s32.totalorder %s1927_s14, 1  ;;  %p211_p10 = scmp.lt.s32.totalorder %s1927_s14, 3 }
  0x28   : > { %p212_p11 = pnand %p1647_p9, %p211_p10 }
  0x2a   : > { %215 = sbr.rel (%p212_p11) target bundleno = 1143 (0x477), region = 28 }
  0x2f   : > { %s217_s29 = sand.u32 1, %s1911_s10  }
  0x30   : > { %s1648_s3 = sshll.u32 %s217_s29, 10  ;;  %s218_s7 = scalar_lea.sflag [#allocation5], %s217_s29 }
  0x31   : > { %s2039_s8 = scalar_lea.vmem [#allocation4], %s1648_s3 }
  0x32   : > { %1898 = dma.done.wait (%p1995_p7), %s218_s7, 16384  }
  0x33   : > { %1900 = vsyncadd (%p1995_p7), %s218_s7, 4294950912  ;;  %s1649_s18 = sshll.u32 %s217_s29, 3  ;;  %s228_s22 = scalar_lea.sflag [#allocation7], %s217_s29 }
  0x34   : > { %s231_s9 = scalar_lea.vmem [#allocation6], %s1649_s18 }
  0x35   : > { %1902 = dma.done.wait (%p1995_p7), %s228_s22, 128  }
  0x36   : > { %1904 = vsyncadd (%p1995_p7), %s228_s22, 4294967168  ;;  %p1650_p12 = scmp.ne.s32.totalorder %s1919_s12, 0 }
  0x38   : > { %272 = sbr.rel (%p1650_p12) target bundleno = 64 (0x40), region = 40 }
  0x3d   : > { %vm274_vm0 = vcmask 7168   ;;  %v1935_v0 = vmov 0.0  }
  0x3e   : > { %273 = vst [vmem:[#allocation2] sm:$0xff] %v1935_v0 }
  0x3f   : > { %275 = vst.msk [vmem:[#allocation3] sm:$0xff] %vm274_vm0, %v1935_v0 }
  0x40 PF: > { %v408_v1 = vlaneseq  ;;  %v404_v2 = vld [vmem:[%s231_s9] sm:$0xff]  ;;  %v294_v62 = vld [vmem:[%s2039_s8 + $0x90] sm:$0xff]  ;;  %v295_v63 = vld [vmem:[%s2039_s8 + $0x98] sm:$0xff]  ;;  %vm1487_vm1 = vcmask 1041409   ;;  %vm1489_vm2 = vcmask 1042434   ;;  %vm1491_vm3 = vcmask 1043459  }
  0x41   : > { %v2056_v5 = vcvt.s32.f32 %v404_v2  ;;  %v293_v44 = vld [vmem:[%s2039_s8 + $0x88] sm:$0xff]  ;;  %v292_v46 = vld [vmem:[%s2039_s8 + $0x80] sm:$0xff]  ;;  %vm1493_vm4 = vcmask 1044484   ;;  %vm1495_vm5 = vcmask 1045509   ;;  %vm1497_vm6 = vcmask 1046534   ;;  %p1651_p13 = scmp.ne.s32.totalorder %s1919_s12, 1 }
  0x42   : > { %v2050_v3 = vshrl.u32 %v408_v1, 7  ;;  %v296_v2 = vld [vmem:[%s2039_s8 + $0xa0] sm:$0xff]  ;;  %vm1508_vm7 = vcmask 7168   ;;  %vm1499_vm8 = vcmask 1047559  }
  0x43   : > { %v2064_v7 = vperm.slane %v2056_v5, 0  ;;  %v2070_v8 = vperm.slane %v2056_v5, 3  ;;  %v2124_v18 = vperm.slane %v2056_v5, 4  ;;  %v2142_v21 = vperm.slane %v2056_v5, 1 }
  0x44   : > { %1723 = vset.pattern.permute.xlu0 %v2050_v3  ;;  %v2054_v4 = vadd.s32 16, %v2050_v3  ;;  %v2059_v6 = vadd.s32 32, %v2050_v3  ;;  %v2073_v9 = vadd.s32 24, %v2050_v3  ;;  %v2077_v10 = vadd.s32 40, %v2050_v3 }
  0x45   : > { %v2085_v11 = vadd.s32 48, %v2050_v3  ;;  %v2088_v12 = vadd.s32 56, %v2050_v3  ;;  %v2094_v13 = vadd.s32 80, %v2050_v3  ;;  %v2100_v14 = vadd.s32 72, %v2050_v3 }
  0x46   : > { %1724 = vset.pattern.permute.xlu1 %v2054_v4  ;;  %1726 = vset.pattern.permute.xlu2 %v2059_v6  ;;  %v2106_v15 = vadd.s32 120, %v2050_v3  ;;  %v2112_v16 = vadd.s32 88, %v2050_v3  ;;  %v2115_v17 = vadd.s32 96, %v2050_v3  ;;  %v2127_v19 = vadd.s32 112, %v2050_v3 }
  0x47   : > { %v2136_v20 = vadd.s32 8, %v2050_v3  ;;  %v2154_v22 = vperm.slane %v2056_v5, 5  ;;  %v2160_v23 = vadd.s32 64, %v2050_v3  ;;  %v2172_v24 = vadd.s32 104, %v2050_v3 }
  0x48   : > { %v2210_v35 = vperm.slane %v2056_v5, 6  ;;  %v2218_v38 = vperm.slane %v2056_v5, 2  ;;  %v2272_v56 = vperm.slane %v2056_v5, 7 }
  0x4a   : > { %2639 = vst [vmem:[#allocation13_spill] sm:$0xff] %v2210_v35 }
  0x4b   : > { %2642 = vst [vmem:[#allocation16_spill] sm:$0xff] %v2272_v56 }
  0x4c   : > { %412 = vperm.xlu0 %1723, %v2064_v7  }
  0x4e   : > { %424 = vperm.xlu1 %1724, %v2064_v7   ;;  %436 = vperm.xlu2 %1726, %v2064_v7  }
  0x54   : > { %703 = vperm.xlu0 %1723, %v2070_v8  }
  0x56   : > { %1725 = vset.pattern.permute.xlu1 %v2073_v9  ;;  %1727 = vset.pattern.permute.xlu2 %v2077_v10 }
  0x5c   : > { %1766 = vset.pattern.permute.xlu0 %v2077_v10 }
  0x5e   : > { %430 = vperm.xlu1 %1725, %v2064_v7   ;;  %442 = vperm.xlu2 %1727, %v2064_v7  }
  0x64   : > { %733 = vperm.xlu0 %1766, %v2070_v8  }
  0x66   : > { %1728 = vset.pattern.permute.xlu1 %v2085_v11  ;;  %1729 = vset.pattern.permute.xlu2 %v2088_v12 }
  0x6c   : > { %1771 = vset.pattern.permute.xlu0 %v2094_v13 }
  0x6e   : > { %448 = vperm.xlu1 %1728, %v2064_v7   ;;  %454 = vperm.xlu2 %1729, %v2064_v7  }
  0x74   : > { %763 = vperm.xlu0 %1771, %v2070_v8  }
  0x76   : > { %1730 = vset.pattern.permute.xlu1 %v2100_v14  ;;  %1731 = vset.pattern.permute.xlu2 %v2094_v13 }
  0x7c   : > { %1776 = vset.pattern.permute.xlu0 %v2106_v15 }
  0x7e   : > { %466 = vperm.xlu1 %1730, %v2064_v7   ;;  %472 = vperm.xlu2 %1731, %v2064_v7  }
  0x84   : > { %793 = vperm.xlu0 %1776, %v2070_v8  }
  0x86   : > { %1732 = vset.pattern.permute.xlu1 %v2112_v16  ;;  %1733 = vset.pattern.permute.xlu2 %v2115_v17 }
  0x8c   : > { %1781 = vset.pattern.permute.xlu0 %v2059_v6 }
  0x8e   : > { %478 = vperm.xlu1 %1732, %v2064_v7   ;;  %484 = vperm.xlu2 %1733, %v2064_v7  }
  0x94   : > { %824 = vperm.xlu0 %1781, %v2124_v18  }
  0x96   : > { %1734 = vset.pattern.permute.xlu1 %v2127_v19  ;;  %1735 = vset.pattern.permute.xlu2 %v2106_v15 }
  0x9c   : > { %1786 = vset.pattern.permute.xlu0 %v2100_v14 }
  0x9e   : > { %496 = vperm.xlu1 %1734, %v2064_v7   ;;  %502 = vperm.xlu2 %1735, %v2064_v7  }
  0xa4   : > { %854 = vperm.xlu0 %1786, %v2124_v18  }
  0xa6   : > { %1736 = vset.pattern.permute.xlu1 %v2050_v3  ;;  %1737 = vset.pattern.permute.xlu2 %v2136_v20 }
  0xa8   : > { %v2177_v25 = vpop.permute.xlu2 %436 }
  0xac   : > { %1791 = vset.pattern.permute.xlu0 %v2127_v19 }
  0xae   : > { %509 = vperm.xlu1 %1736, %v2142_v21   ;;  %515 = vperm.xlu2 %1737, %v2142_v21  }
  0xb4   : > { %884 = vperm.xlu0 %1791, %v2124_v18  }
  0xb6   : > { %1738 = vset.pattern.permute.xlu1 %v2073_v9  ;;  %1739 = vset.pattern.permute.xlu2 %v2059_v6 }
  0xb8   : > { %v2184_v27 = vpop.permute.xlu2 %442 }
  0xbc   : > { %1796 = vset.pattern.permute.xlu0 %v2073_v9 }
  0xbe   : > { %527 = vperm.xlu1 %1738, %v2142_v21   ;;  %533 = vperm.xlu2 %1739, %v2142_v21   ;;  %v2187_v28 = vpop.permute.xlu0 %412 }
  0xc0   : > { %v2182_v26 = vpop.permute.xlu1 %424 }
  0xc4   : > { %915 = vperm.xlu0 %1796, %v2154_v22  }
  0xc6   : > { %1740 = vset.pattern.permute.xlu1 %v2077_v10  ;;  %1741 = vset.pattern.permute.xlu2 %v2085_v11  ;;  %v2198_v31 = vpop.permute.xlu0 %703 }
  0xc8   : > { %v2193_v30 = vpop.permute.xlu2 %454 }
  0xcc   : > { %1797 = vset.pattern.permute.xlu0 %v2160_v23 }
  0xce   : > { %539 = vperm.xlu1 %1740, %v2142_v21   ;;  %545 = vperm.xlu2 %1741, %v2142_v21  }
  0xd0   : > { %v2191_v29 = vpop.permute.xlu1 %430 }
  0xd4   : > { %460 = vperm.xlu0 %1797, %v2064_v7  }
  0xd6   : > { %1742 = vset.pattern.permute.xlu1 %v2160_v23  ;;  %1743 = vset.pattern.permute.xlu2 %v2100_v14  ;;  %v2212_v36 = vpop.permute.xlu0 %733 }
  0xd8   : > { %v2202_v33 = vpop.permute.xlu2 %472 }
  0xdc   : > { %945 = vperm.xlu0 %1797, %v2154_v22  }
  0xde   : > { %557 = vperm.xlu1 %1742, %v2142_v21   ;;  %563 = vperm.xlu2 %1743, %v2142_v21  }
  0xe0   : > { %v2200_v32 = vpop.permute.xlu1 %448 }
  0xe4   : > { %1802 = vset.pattern.permute.xlu0 %v2172_v24 }
  0xe6   : > { %1744 = vset.pattern.permute.xlu1 %v2094_v13  ;;  %1745 = vset.pattern.permute.xlu2 %v2112_v16  ;;  %v2224_v40 = vpop.permute.xlu0 %763 }
  0xe8   : > { %v2214_v37 = vpop.permute.xlu2 %484 }
  0xec   : > { %490 = vperm.xlu0 %1802, %v2064_v7  }
  0xee   : > { %569 = vperm.xlu1 %1744, %v2142_v21   ;;  %575 = vperm.xlu2 %1745, %v2142_v21  }
  0xf0   : > { %v2207_v34 = vpop.permute.xlu1 %466 }
  0xf4   : > { %975 = vperm.xlu0 %1802, %v2154_v22  }
  0xf6   : > { %1746 = vset.pattern.permute.xlu1 %v2172_v24  ;;  %1747 = vset.pattern.permute.xlu2 %v2127_v19  ;;  %v2235_v45 = vpop.permute.xlu0 %793 }
  0xf8   : > { %v2226_v41 = vpop.permute.xlu2 %502 }
  0xfc   : > { %1807 = vset.pattern.permute.xlu0 %v2054_v4 }
  0xfe   : > { %587 = vperm.xlu1 %1746, %v2142_v21   ;;  %593 = vperm.xlu2 %1747, %v2142_v21  }
 0x100   : > { %v2222_v39 = vpop.permute.xlu1 %478 }
 0x104   : > { %521 = vperm.xlu0 %1807, %v2142_v21  }
 0x106   : > { %1748 = vset.pattern.permute.xlu1 %v2106_v15  ;;  %1749 = vset.pattern.permute.xlu2 %v2050_v3  ;;  %v2242_v51 = vpop.permute.xlu0 %824 }
 0x108   : > { %v516_v43 = vpop.permute.xlu2 %515 }
 0x109   : > { %v1200_v47 = vmul.f32 %v516_v43, %v293_v44  ;;  %v297_v44 = vld [vmem:[%s2039_s8 + $0xa8] sm:$0xff] }
 0x10c   : > { %1006 = vperm.xlu0 %1807, %v2210_v35  }
 0x10e   : > { %599 = vperm.xlu1 %1748, %v2142_v21   ;;  %606 = vperm.xlu2 %1749, %v2218_v38  }
 0x110   : > { %v2231_v42 = vpop.permute.xlu1 %496 }
 0x114   : > { %1812 = vset.pattern.permute.xlu0 %v2088_v12 }
 0x116   : > { %1750 = vset.pattern.permute.xlu1 %v2054_v4  ;;  %1751 = vset.pattern.permute.xlu2 %v2073_v9  ;;  %v2248_v52 = vpop.permute.xlu0 %854 }
 0x118   : > { %v534_v61 = vpop.permute.xlu2 %533 }
 0x11c   : > { %551 = vperm.xlu0 %1812, %v2142_v21  }
 0x11e   : > { %618 = vperm.xlu1 %1750, %v2218_v38   ;;  %624 = vperm.xlu2 %1751, %v2218_v38  }
 0x120   : > { %v510_v48 = vpop.permute.xlu1 %509 }
 0x121   : > { %v1199_v49 = vmul.f32 %v510_v48, %v292_v46  ;;  %v1203_v46 = vmul.f32 %v534_v61, %v296_v2  ;;  %v300_v2 = vld [vmem:[%s2039_s8 + $0xc0] sm:$0xff] }
 0x123   : > { %v1332_v50 = vadd.f32 %v1200_v47, %v1199_v49  ;;  %v298_v49 = vld [vmem:[%s2039_s8 + $0xb0] sm:$0xff] }
 0x124   : > { %1036 = vperm.xlu0 %1812, %v2210_v35  }
 0x126   : > { %1752 = vset.pattern.permute.xlu1 %v2059_v6  ;;  %1753 = vset.pattern.permute.xlu2 %v2077_v10  ;;  %v2253_v53 = vpop.permute.xlu0 %884 }
 0x127   : > { %2640 = vst [vmem:[#allocation14_spill] sm:$0xff] %v2253_v53 }
 0x128   : > { %v546_v48 = vpop.permute.xlu2 %545 }
 0x12c   : > { %1817 = vset.pattern.permute.xlu0 %v2115_v17 }
 0x12e   : > { %630 = vperm.xlu1 %1752, %v2218_v38   ;;  %636 = vperm.xlu2 %1753, %v2218_v38  }
 0x130   : > { %v528_v60 = vpop.permute.xlu1 %527 }
 0x134   : > { %581 = vperm.xlu0 %1817, %v2142_v21  }
 0x136   : > { %1754 = vset.pattern.permute.xlu1 %v2088_v12  ;;  %1755 = vset.pattern.permute.xlu2 %v2160_v23  ;;  %v2259_v54 = vpop.permute.xlu0 %915 }
 0x137   : > { %2641 = vst [vmem:[#allocation15_spill] sm:$0xff] %v2259_v54 }
 0x13c   : > { %1066 = vperm.xlu0 %1817, %v2210_v35   ;;  %v312_v35 = vld [vmem:[%s2039_s8 + $0x120] sm:$0xff] }
 0x13e   : > { %648 = vperm.xlu1 %1754, %v2218_v38   ;;  %654 = vperm.xlu2 %1755, %v2218_v38  }
 0x140   : > { %v540_v43 = vpop.permute.xlu1 %539 }
 0x144   : > { %1822 = vset.pattern.permute.xlu0 %v2136_v20 }
 0x146   : > { %1756 = vset.pattern.permute.xlu1 %v2100_v14  ;;  %1757 = vset.pattern.permute.xlu2 %v2094_v13  ;;  %v2265_v55 = vpop.permute.xlu0 %460 }
 0x14c   : > { %418 = vperm.xlu0 %1822, %v2064_v7   ;;  %v1202_v7 = vmul.f32 %v528_v60, %v295_v63 }
 0x14e   : > { %660 = vperm.xlu1 %1756, %v2218_v38   ;;  %666 = vperm.xlu2 %1757, %v2218_v38   ;;  %v2274_v57 = vpop.permute.xlu0 %945 }
 0x14f   : > { %2643 = vst [vmem:[#allocation17_spill] sm:$0xff] %v2274_v57 }
 0x150   : > { %v558_v63 = vpop.permute.xlu1 %557 }
 0x154   : > { %612 = vperm.xlu0 %1822, %v2218_v38  }
 0x156   : > { %1758 = vset.pattern.permute.xlu1 %v2115_v17  ;;  %1759 = vset.pattern.permute.xlu2 %v2172_v24 }
 0x15c   : > { %1097 = vperm.xlu0 %1822, %v2272_v56  }
 0x15e   : > { %678 = vperm.xlu1 %1758, %v2218_v38   ;;  %684 = vperm.xlu2 %1759, %v2218_v38   ;;  %v2279_v58 = vpop.permute.xlu0 %490 }
 0x164   : > { %1827 = vset.pattern.permute.xlu0 %v2085_v11 }
 0x166   : > { %1760 = vset.pattern.permute.xlu1 %v2127_v19  ;;  %1761 = vset.pattern.permute.xlu2 %v2106_v15  ;;  %v2285_v59 = vpop.permute.xlu0 %975 }
 0x167   : > { %2644 = vst [vmem:[#allocation18_spill] sm:$0xff] %v2285_v59  ;;  %v1204_v59 = vmul.f32 %v540_v43, %v297_v44  ;;  %v570_v43 = vpop.permute.xlu1 %569  ;;  %v302_v44 = vld [vmem:[%s2039_s8 + $0xd0] sm:$0xff] }
 0x16c   : > { %642 = vperm.xlu0 %1827, %v2218_v38  }
 0x16e   : > { %690 = vperm.xlu1 %1760, %v2218_v38   ;;  %696 = vperm.xlu2 %1761, %v2218_v38  }
 0x174   : > { %1127 = vperm.xlu0 %1827, %v2272_v56  }
 0x176   : > { %1762 = vset.pattern.permute.xlu1 %v2136_v20  ;;  %v522_v0 = vpop.permute.xlu0 %521  ;;  %1763 = vset.pattern.permute.xlu2 %v2054_v4 }
 0x177   : > { %v1201_v1 = vmul.f32 %v522_v0, %v294_v62  ;;  %v1205_v62 = vmul.f32 %v546_v48, %v298_v49  ;;  %v564_v0 = vpop.permute.xlu2 %563  ;;  %v303_v49 = vld [vmem:[%s2039_s8 + $0xd8] sm:$0xff] }
 0x179   : > { %v1333_v21 = vadd.f32 %v1332_v50, %v1201_v1  ;;  %v299_v1 = vld [vmem:[%s2039_s8 + $0xb8] sm:$0xff] }
 0x17b   : > { %v1334_v47 = vadd.f32 %v1333_v21, %v1202_v7  ;;  %v1207_v7 = vmul.f32 %v558_v63, %v300_v2 }
 0x17c   : > { %1832 = vset.pattern.permute.xlu0 %v2112_v16 }
 0x17d   : > { %v1335_v57 = vadd.f32 %v1334_v47, %v1203_v46 }
 0x17e   : > { %709 = vperm.xlu1 %1762, %v2070_v8   ;;  %715 = vperm.xlu2 %1763, %v2070_v8   ;;  %v2301_v61 = vpop.permute.xlu0 %1006 }
 0x17f   : > { %v1336_v60 = vadd.f32 %v1335_v57, %v1204_v59  ;;  %2645 = vst [vmem:[#allocation19_spill] sm:$0xff] %v2301_v61  ;;  %v301_v59 = vld [vmem:[%s2039_s8 + $0xc8] sm:$0xff]  ;;  %v576_v48 = vpop.permute.xlu2 %575  ;;  %v282_v61 = vld [vmem:[%s2039_s8 + $0x30] sm:$0xff] }
 0x180   : > { %v1208_v46 = vmul.f32 %v564_v0, %v301_v59  ;;  %v588_v0 = vpop.permute.xlu1 %587 }
 0x181   : > { %v1337_v50 = vadd.f32 %v1336_v60, %v1205_v62  ;;  %v1209_v62 = vmul.f32 %v570_v43, %v302_v44  ;;  %v306_v43 = vld [vmem:[%s2039_s8 + $0xf0] sm:$0xff] }
 0x184   : > { %672 = vperm.xlu0 %1832, %v2218_v38  }
 0x186   : > { %1764 = vset.pattern.permute.xlu1 %v2073_v9  ;;  %1765 = vset.pattern.permute.xlu2 %v2059_v6 }
 0x18c   : > { %1157 = vperm.xlu0 %1832, %v2272_v56  }
 0x18e   : > { %721 = vperm.xlu1 %1764, %v2070_v8   ;;  %v552_v57 = vpop.permute.xlu0 %551  ;;  %727 = vperm.xlu2 %1765, %v2070_v8  }
 0x18f   : > { %v1206_v38 = vmul.f32 %v552_v57, %v299_v1  ;;  %v1210_v1 = vmul.f32 %v576_v48, %v303_v49  ;;  %v304_v57 = vld [vmem:[%s2039_s8 + $0xe0] sm:$0xff]  ;;  %v307_v48 = vld [vmem:[%s2039_s8 + $0xf8] sm:$0xff] }
 0x191   : > { %v1338_v21 = vadd.f32 %v1337_v50, %v1206_v38  ;;  %v305_v38 = vld [vmem:[%s2039_s8 + $0xe8] sm:$0xff] }
 0x192   : > { %v1212_v44 = vmul.f32 %v588_v0, %v305_v38  ;;  %v277_v38 = vld [vmem:[%s2039_s8 + $0x8] sm:$0xff] }
 0x193   : > { %v1339_v47 = vadd.f32 %v1338_v21, %v1207_v7  ;;  %v594_v21 = vpop.permute.xlu2 %593 }
 0x194   : > { %1841 = vset.pattern.permute.xlu0 %v2106_v15  ;;  %v1213_v49 = vmul.f32 %v594_v21, %v306_v43 }
 0x195   : > { %v1340_v60 = vadd.f32 %v1339_v47, %v1208_v46  ;;  %v600_v47 = vpop.permute.xlu1 %599 }
 0x196   : > { %1767 = vset.pattern.permute.xlu1 %v2085_v11  ;;  %1768 = vset.pattern.permute.xlu2 %v2088_v12  ;;  %v2316_v2 = vpop.permute.xlu0 %1036 }
 0x197   : > { %v1341_v63 = vadd.f32 %v1340_v60, %v1209_v62  ;;  %2646 = vst [vmem:[#allocation20_spill] sm:$0xff] %v2316_v2  ;;  %v1214_v60 = vmul.f32 %v600_v47, %v307_v48 }
 0x199   : > { %v1342_v50 = vadd.f32 %v1341_v63, %v1210_v1 }
 0x19b   : > { %v607_v0 = vpop.permute.xlu2 %606 }
 0x19d   : > { %v619_v47 = vpop.permute.xlu1 %618 }
 0x19e   : > { %739 = vperm.xlu1 %1767, %v2070_v8   ;;  %745 = vperm.xlu2 %1768, %v2070_v8  }
 0x1a3   : > { %v625_v21 = vpop.permute.xlu2 %624 }
 0x1a6   : > { %1769 = vset.pattern.permute.xlu1 %v2160_v23  ;;  %v582_v59 = vpop.permute.xlu0 %581  ;;  %1770 = vset.pattern.permute.xlu2 %v2100_v14 }
 0x1a7   : > { %v1211_v7 = vmul.f32 %v582_v59, %v304_v57 }
 0x1a9   : > { %v1343_v46 = vadd.f32 %v1342_v50, %v1211_v7  ;;  %v276_v50 = vld [vmem:[%s2039_s8] sm:$0xff]  ;;  %v278_v7 = vld [vmem:[%s2039_s8 + $0x10] sm:$0xff] }
 0x1aa   : > { %v1183_v59 = vmul.f32 %v2187_v28, %v276_v50  ;;  %v309_v50 = vld [vmem:[%s2039_s8 + $0x108] sm:$0xff] }
 0x1ab   : > { %v1344_v62 = vadd.f32 %v1343_v46, %v1212_v44  ;;  %v279_v46 = vld [vmem:[%s2039_s8 + $0x18] sm:$0xff] }
 0x1ac   : > { %v1186_v28 = vmul.f32 %v2191_v29, %v279_v46 }
 0x1ad   : > { %v1345_v1 = vadd.f32 %v1344_v62, %v1213_v49  ;;  %v280_v49 = vld [vmem:[%s2039_s8 + $0x20] sm:$0xff] }
 0x1ae   : > { %751 = vperm.xlu1 %1769, %v2070_v8   ;;  %757 = vperm.xlu2 %1770, %v2070_v8   ;;  %v2330_v57 = vpop.permute.xlu0 %1066 }
 0x1af   : > { %v2328_v63 = vadd.f32 %v1345_v1, %v1214_v60  ;;  %2647 = vst [vmem:[#allocation21_spill] sm:$0xff] %v2330_v57  ;;  %v281_v60 = vld [vmem:[%s2039_s8 + $0x28] sm:$0xff]  ;;  %v308_v1 = vld [vmem:[%s2039_s8 + $0x100] sm:$0xff]  ;;  %v1187_v57 = vmul.f32 %v2177_v25, %v280_v49  ;;  %v311_v25 = vld [vmem:[%s2039_s8 + $0x118] sm:$0xff]  ;;  %v1189_v49 = vmul.f32 %v2200_v32, %v282_v61 }
 0x1b0   : > { %v1188_v29 = vmul.f32 %v2184_v27, %v281_v60  ;;  %v1218_v60 = vmul.f32 %v625_v21, %v311_v25  ;;  %v286_v32 = vld [vmem:[%s2039_s8 + $0x50] sm:$0xff] }
 0x1b6   : > { %1772 = vset.pattern.permute.xlu1 %v2112_v16  ;;  %1773 = vset.pattern.permute.xlu2 %v2115_v17 }
 0x1b7   : > { %1505 = vadd.xlane.f32.xlu0 %v2056_v5  ;;  %v1185_v5 = vmul.f32 %v2182_v26, %v278_v7  ;;  %v1215_v7 = vmul.f32 %v607_v0, %v308_v1  ;;  %v313_v1 = vld [vmem:[%s2039_s8 + $0x128] sm:$0xff] }
 0x1be   : > { %769 = vperm.xlu1 %1772, %v2070_v8   ;;  %v419_v43 = vpop.permute.xlu0 %418  ;;  %775 = vperm.xlu2 %1773, %v2070_v8  }
 0x1bf   : > { %v1184_v44 = vmul.f32 %v419_v43, %v277_v38  ;;  %v310_v38 = vld [vmem:[%s2039_s8 + $0x110] sm:$0xff]  ;;  %v637_v43 = vpop.permute.xlu2 %636 }
 0x1c1   : > { %v1311_v48 = vadd.f32 %v1184_v44, %v1183_v59  ;;  %v283_v59 = vld [vmem:[%s2039_s8 + $0x38] sm:$0xff] }
 0x1c2   : > { %v1190_v54 = vmul.f32 %v2193_v30, %v283_v59  ;;  %v288_v59 = vld [vmem:[%s2039_s8 + $0x60] sm:$0xff] }
 0x1c3   : > { %v1312_v62 = vadd.f32 %v1311_v48, %v1185_v5  ;;  %v284_v5 = vld [vmem:[%s2039_s8 + $0x40] sm:$0xff]  ;;  %v631_v48 = vpop.permute.xlu1 %630 }
 0x1c4   : > { %v1191_v27 = vmul.f32 %v2265_v55, %v284_v5  ;;  %v1220_v55 = vmul.f32 %v637_v43, %v313_v1 }
 0x1c5   : > { %v1313_v2 = vadd.f32 %v1312_v62, %v1186_v28  ;;  %v1217_v28 = vmul.f32 %v619_v47, %v310_v38 }
 0x1c6   : > { %1774 = vset.pattern.permute.xlu1 %v2172_v24  ;;  %v613_v26 = vpop.permute.xlu0 %612  ;;  %1775 = vset.pattern.permute.xlu2 %v2127_v19 }
 0x1c7   : > { %v1314_v44 = vadd.f32 %v1313_v2, %v1187_v57  ;;  %v1216_v46 = vmul.f32 %v613_v26, %v309_v50  ;;  %v285_v57 = vld [vmem:[%s2039_s8 + $0x48] sm:$0xff]  ;;  %v1219_v50 = vmul.f32 %v631_v48, %v312_v35  ;;  %v655_v61 = vpop.permute.xlu2 %654  ;;  %v1193_v35 = vmul.f32 %v2202_v33, %v286_v32  ;;  %v290_v33 = vld [vmem:[%s2039_s8 + $0x70] sm:$0xff]  ;;  %v316_v32 = vld [vmem:[%s2039_s8 + $0x140] sm:$0xff] }
 0x1c8   : > { %v1192_v30 = vmul.f32 %v2207_v34, %v285_v57  ;;  %v315_v57 = vld [vmem:[%s2039_s8 + $0x138] sm:$0xff] }
 0x1c9   : > { %v1315_v62 = vadd.f32 %v1314_v44, %v1188_v29  ;;  %v1353_v56 = vadd.f32 %v1216_v46, %v1215_v7  ;;  %v289_v7 = vld [vmem:[%s2039_s8 + $0x68] sm:$0xff] }
 0x1ca   : > { %v1196_v34 = vmul.f32 %v2279_v58, %v289_v7 }
 0x1cb   : > { %v1316_v0 = vadd.f32 %v1315_v62, %v1189_v49  ;;  %v1354_v2 = vadd.f32 %v1353_v56, %v1217_v28  ;;  %v287_v56 = vld [vmem:[%s2039_s8 + $0x58] sm:$0xff]  ;;  %v649_v38 = vpop.permute.xlu1 %648  ;;  %v1197_v28 = vmul.f32 %v2231_v42, %v290_v33 }
 0x1cc   : > { %v1194_v44 = vmul.f32 %v2222_v39, %v287_v56  ;;  %v291_v39 = vld [vmem:[%s2039_s8 + $0x78] sm:$0xff]  ;;  %v1223_v56 = vmul.f32 %v655_v61, %v316_v32 }
 0x1cd   : > { %v1317_v26 = vadd.f32 %v1316_v0, %v1190_v54  ;;  %v1355_v53 = vadd.f32 %v1354_v2, %v1218_v60  ;;  %v1198_v58 = vmul.f32 %v2226_v41, %v291_v39  ;;  %v314_v60 = vld [vmem:[%s2039_s8 + $0x130] sm:$0xff] }
 0x1ce   : > { %781 = vperm.xlu1 %1774, %v2070_v8   ;;  %787 = vperm.xlu2 %1775, %v2070_v8   ;;  %v2372_v5 = vpop.permute.xlu0 %1097  ;;  %v1195_v8 = vmul.f32 %v2214_v37, %v288_v59  ;;  %v318_v59 = vld [vmem:[%s2039_s8 + $0x150] sm:$0xff] }
 0x1cf   : > { %v1318_v21 = vadd.f32 %v1317_v26, %v1191_v27  ;;  %v1356_v47 = vadd.f32 %v1355_v53, %v1219_v50  ;;  %v1347_v53 = vrot.slane %v2328_v63, 4  ;;  %v667_v25 = vpop.permute.xlu2 %666 }
 0x1d1   : > { %v1319_v29 = vadd.f32 %v1318_v21, %v1192_v30  ;;  %v1357_v54 = vadd.f32 %v1356_v47, %v1220_v55  ;;  %v1348_v37 = vadd.f32 %v1347_v53, %v2328_v63  ;;  %v1222_v55 = vmul.f32 %v649_v38, %v315_v57  ;;  %v317_v47 = vld [vmem:[%s2039_s8 + $0x148] sm:$0xff]  ;;  %v319_v57 = vld [vmem:[%s2039_s8 + $0x158] sm:$0xff] }
 0x1d2   : > { %v1225_v38 = vmul.f32 %v667_v25, %v318_v59  ;;  %v327_v59 = vld [vmem:[%s2039_s8 + $0x198] sm:$0xff] }
 0x1d3   : > { %v1320_v46 = vadd.f32 %v1319_v29, %v1193_v35  ;;  %v661_v49 = vpop.permute.xlu1 %660  ;;  %v1349_v0 = vrot.slane %v1348_v37, 2 }
 0x1d5   : > { %v1321_v43 = vadd.f32 %v1320_v46, %v1194_v44  ;;  %v1350_v30 = vadd.f32 %v1349_v0, %v1348_v37  ;;  %v1224_v44 = vmul.f32 %v661_v49, %v317_v47  ;;  %v324_v49 = vld [vmem:[%s2039_s8 + $0x180] sm:$0xff]  ;;  %v325_v37 = vld [vmem:[%s2039_s8 + $0x188] sm:$0xff] }
 0x1d6   : > { %1777 = vset.pattern.permute.xlu1 %v2050_v3  ;;  %1778 = vset.pattern.permute.xlu2 %v2136_v20  ;;  %v1231_v25 = vmul.f32 %v2198_v31, %v324_v49 }
 0x1d7   : > { %v1322_v48 = vadd.f32 %v1321_v43, %v1195_v8  ;;  %v685_v1 = vpop.permute.xlu2 %684  ;;  %v1351_v7 = vrot.slane %v1350_v30, 1 }
 0x1d9   : > { %v1323_v62 = vadd.f32 %v1322_v48, %v1196_v34  ;;  %v1352_v61 = vadd.f32 %v1351_v7, %v1350_v30  ;;  %v321_v30 = vld [vmem:[%s2039_s8 + $0x168] sm:$0xff] }
 0x1db   : > { %v1324_v27 = vadd.f32 %v1323_v62, %v1197_v28  ;;  %v679_v63 = vpop.permute.xlu1 %678 }
 0x1dd   : > { %v1325_v2 = vadd.f32 %v1324_v27, %v1198_v58  ;;  %v326_v58 = vld [vmem:[%s2039_s8 + $0x190] sm:$0xff] }
 0x1de   : > { %800 = vperm.xlu1 %1777, %v2124_v18   ;;  %v643_v50 = vpop.permute.xlu0 %642  ;;  %806 = vperm.xlu2 %1778, %v2124_v18  }
 0x1df   : > { %v1221_v26 = vmul.f32 %v643_v50, %v314_v60  ;;  %v1326_v42 = vrot.slane %v1325_v2, 4  ;;  %v697_v34 = vpop.permute.xlu2 %696 }
 0x1e1   : > { %v1358_v41 = vadd.f32 %v1357_v54, %v1221_v26  ;;  %v1327_v21 = vadd.f32 %v1326_v42, %v1325_v2  ;;  %v320_v26 = vld [vmem:[%s2039_s8 + $0x160] sm:$0xff] }
 0x1e3   : > { %v1359_v35 = vadd.f32 %v1358_v41, %v1222_v55  ;;  %v1328_v29 = vrot.slane %v1327_v21, 2  ;;  %v691_v43 = vpop.permute.xlu1 %690  ;;  %v1227_v55 = vmul.f32 %v679_v63, %v320_v26  ;;  %v322_v41 = vld [vmem:[%s2039_s8 + $0x170] sm:$0xff] }
 0x1e5   : > { %v1360_v46 = vadd.f32 %v1359_v35, %v1223_v56  ;;  %v1329_v8 = vadd.f32 %v1328_v29, %v1327_v21  ;;  %v1228_v21 = vmul.f32 %v685_v1, %v321_v30  ;;  %v323_v56 = vld [vmem:[%s2039_s8 + $0x178] sm:$0xff]  ;;  %v1229_v35 = vmul.f32 %v691_v43, %v322_v41 }
 0x1e6   : > { %1779 = vset.pattern.permute.xlu1 %v2054_v4  ;;  %1780 = vset.pattern.permute.xlu2 %v2073_v9  ;;  %v2394_v28 = vpop.permute.xlu0 %1127 }
 0x1e7   : > { %v1361_v54 = vadd.f32 %v1360_v46, %v1224_v44  ;;  %v1330_v53 = vrot.slane %v1329_v8, 1  ;;  %v716_v62 = vpop.permute.xlu2 %715  ;;  %v328_v44 = vld [vmem:[%s2039_s8 + $0x1a0] sm:$0xff]  ;;  %v1230_v46 = vmul.f32 %v697_v34, %v323_v56 }
 0x1e8   : > { %v1233_v0 = vmul.f32 %v716_v62, %v326_v58 }
 0x1e9   : > { %v1362_v33 = vadd.f32 %v1361_v54, %v1225_v38  ;;  %v1331_v48 = vadd.f32 %v1330_v53, %v1329_v8  ;;  %v329_v38 = vld [vmem:[%s2039_s8 + $0x1a8] sm:$0xff] }
 0x1ea   : > { %v1236_v1 = vmul.f32 %v2212_v36, %v329_v38  ;;  %v330_v36 = vld [vmem:[%s2039_s8 + $0x1b0] sm:$0xff] }
 0x1eb   : > { %v1488_v39 = vsel %vm1487_vm1, %v1352_v61, %v1331_v48 }
 0x1ee   : > { %812 = vperm.xlu1 %1779, %v2124_v18   ;;  %818 = vperm.xlu2 %1780, %v2124_v18  }
 0x1ef   : > { %v728_v7 = vpop.permute.xlu2 %727 }
 0x1f0   : > { %v710_v27 = vpop.permute.xlu1 %709  ;;  %v1235_v61 = vmul.f32 %v728_v7, %v328_v44  ;;  %v336_v44 = vld [vmem:[%s2039_s8 + $0x1e0] sm:$0xff] }
 0x1f1   : > { %v1232_v60 = vmul.f32 %v710_v27, %v325_v37 }
 0x1f3   : > { %v1374_v2 = vadd.f32 %v1232_v60, %v1231_v25  ;;  %v331_v60 = vld [vmem:[%s2039_s8 + $0x1b8] sm:$0xff] }
 0x1f5   : > { %v1375_v50 = vadd.f32 %v1374_v2, %v1233_v0 }
 0x1f6   : > { %1782 = vset.pattern.permute.xlu1 %v2077_v10  ;;  %v673_v42 = vpop.permute.xlu0 %672  ;;  %1783 = vset.pattern.permute.xlu2 %v2085_v11 }
 0x1f7   : > { %v1226_v32 = vmul.f32 %v673_v42, %v319_v57 }
 0x1f8   : > { %v746_v27 = vpop.permute.xlu2 %745 }
 0x1f9   : > { %v1363_v31 = vadd.f32 %v1362_v33, %v1226_v32  ;;  %v332_v32 = vld [vmem:[%s2039_s8 + $0x1c0] sm:$0xff] }
 0x1fb   : > { %v1364_v47 = vadd.f32 %v1363_v31, %v1227_v55  ;;  %v333_v55 = vld [vmem:[%s2039_s8 + $0x1c8] sm:$0xff] }
 0x1fd   : > { %v1365_v29 = vadd.f32 %v1364_v47, %v1228_v21 }
 0x1fe   : > { %830 = vperm.xlu1 %1782, %v2124_v18   ;;  %836 = vperm.xlu2 %1783, %v2124_v18  }
 0x1ff   : > { %v1366_v8 = vadd.f32 %v1365_v29, %v1229_v35 }
 0x200   : > { %v722_v54 = vpop.permute.xlu1 %721 }
 0x201   : > { %v1367_v53 = vadd.f32 %v1366_v8, %v1230_v46  ;;  %v1234_v63 = vmul.f32 %v722_v54, %v327_v59  ;;  %v335_v59 = vld [vmem:[%s2039_s8 + $0x1d8] sm:$0xff] }
 0x203   : > { %v1368_v43 = vrot.slane %v1367_v53, 4  ;;  %v1376_v33 = vadd.f32 %v1375_v50, %v1234_v63  ;;  %v1238_v50 = vmul.f32 %v746_v27, %v331_v60  ;;  %v340_v60 = vld [vmem:[%s2039_s8 + $0x200] sm:$0xff] }
 0x205   : > { %v1369_v48 = vadd.f32 %v1368_v43, %v1367_v53  ;;  %v1377_v49 = vadd.f32 %v1376_v33, %v1235_v61  ;;  %v337_v53 = vld [vmem:[%s2039_s8 + $0x1e8] sm:$0xff]  ;;  %v338_v61 = vld [vmem:[%s2039_s8 + $0x1f0] sm:$0xff] }
 0x206   : > { %1784 = vset.pattern.permute.xlu1 %v2088_v12  ;;  %1785 = vset.pattern.permute.xlu2 %v2160_v23 }
 0x207   : > { %v1370_v37 = vrot.slane %v1369_v48, 2  ;;  %v1378_v34 = vadd.f32 %v1377_v49, %v1236_v1  ;;  %v339_v1 = vld [vmem:[%s2039_s8 + $0x1f8] sm:$0xff] }
 0x208   : > { %v758_v30 = vpop.permute.xlu2 %757  ;;  %v1246_v49 = vmul.f32 %v2235_v45, %v339_v1  ;;  %v349_v1 = vld [vmem:[%s2039_s8 + $0x248] sm:$0xff] }
 0x209   : > { %v1371_v62 = vadd.f32 %v1370_v37, %v1369_v48  ;;  %v1240_v21 = vmul.f32 %v758_v30, %v333_v55  ;;  %v342_v55 = vld [vmem:[%s2039_s8 + $0x210] sm:$0xff] }
 0x20b   : > { %v1372_v58 = vrot.slane %v1371_v62, 1 }
 0x20d   : > { %v1373_v25 = vadd.f32 %v1372_v58, %v1371_v62 }
 0x20e   : > { %842 = vperm.xlu1 %1784, %v2124_v18   ;;  %848 = vperm.xlu2 %1785, %v2124_v18  }
 0x20f   : > { %v2420_v0 = vsel %vm1489_vm2, %v1373_v25, %v1488_v39  ;;  %v334_v39 = vld [vmem:[%s2039_s8 + $0x1d0] sm:$0xff] }
 0x210   : > { %v740_v2 = vpop.permute.xlu1 %739  ;;  %v1241_v47 = vmul.f32 %v2224_v40, %v334_v39 }
 0x211   : > { %v1237_v57 = vmul.f32 %v740_v2, %v330_v36  ;;  %v341_v36 = vld [vmem:[%s2039_s8 + $0x208] sm:$0xff] }
 0x213   : > { %v1379_v26 = vadd.f32 %v1378_v34, %v1237_v57 }
 0x215   : > { %v1380_v42 = vadd.f32 %v1379_v26, %v1238_v50 }
 0x216   : > { %1787 = vset.pattern.permute.xlu1 %v2094_v13  ;;  %1788 = vset.pattern.permute.xlu2 %v2112_v16 }
 0x218   : > { %v776_v7 = vpop.permute.xlu2 %775 }
 0x219   : > { %v1243_v40 = vmul.f32 %v776_v7, %v336_v44  ;;  %v345_v7 = vld [vmem:[%s2039_s8 + $0x228] sm:$0xff] }
 0x21e   : > { %860 = vperm.xlu1 %1787, %v2124_v18   ;;  %866 = vperm.xlu2 %1788, %v2124_v18  }
 0x220   : > { %v752_v31 = vpop.permute.xlu1 %751 }
 0x221   : > { %v1239_v41 = vmul.f32 %v752_v31, %v332_v32  ;;  %v343_v31 = vld [vmem:[%s2039_s8 + $0x218] sm:$0xff] }
 0x223   : > { %v1381_v56 = vadd.f32 %v1380_v42, %v1239_v41  ;;  %v344_v41 = vld [vmem:[%s2039_s8 + $0x220] sm:$0xff] }
 0x225   : > { %v1382_v35 = vadd.f32 %v1381_v56, %v1240_v21 }
 0x226   : > { %1789 = vset.pattern.permute.xlu1 %v2115_v17  ;;  %1790 = vset.pattern.permute.xlu2 %v2172_v24 }
 0x227   : > { %v1383_v29 = vadd.f32 %v1382_v35, %v1241_v47 }
 0x228   : > { %v788_v63 = vpop.permute.xlu2 %787 }
 0x229   : > { %v1245_v48 = vmul.f32 %v788_v63, %v338_v61  ;;  %v348_v61 = vld [vmem:[%s2039_s8 + $0x240] sm:$0xff] }
 0x22e   : > { %872 = vperm.xlu1 %1789, %v2124_v18   ;;  %878 = vperm.xlu2 %1790, %v2124_v18  }
 0x230   : > { %v770_v46 = vpop.permute.xlu1 %769 }
 0x231   : > { %v1242_v8 = vmul.f32 %v770_v46, %v335_v59  ;;  %v346_v46 = vld [vmem:[%s2039_s8 + $0x230] sm:$0xff] }
 0x233   : > { %v1384_v38 = vadd.f32 %v1383_v29, %v1242_v8 }
 0x235   : > { %v1385_v54 = vadd.f32 %v1384_v38, %v1243_v40 }
 0x236   : > { %1792 = vset.pattern.permute.xlu1 %v2106_v15  ;;  %1793 = vset.pattern.permute.xlu2 %v2050_v3 }
 0x238   : > { %v807_v25 = vpop.permute.xlu2 %806 }
 0x239   : > { %v1248_v2 = vmul.f32 %v807_v25, %v341_v36  ;;  %v351_v25 = vld [vmem:[%s2039_s8 + $0x258] sm:$0xff] }
 0x23e   : > { %890 = vperm.xlu1 %1792, %v2124_v18   ;;  %897 = vperm.xlu2 %1793, %v2154_v22  }
 0x240   : > { %v782_v43 = vpop.permute.xlu1 %781 }
 0x241   : > { %v1244_v33 = vmul.f32 %v782_v43, %v337_v53  ;;  %v347_v53 = vld [vmem:[%s2039_s8 + $0x238] sm:$0xff] }
 0x243   : > { %v1386_v37 = vadd.f32 %v1385_v54, %v1244_v33 }
 0x245   : > { %v1387_v34 = vadd.f32 %v1386_v37, %v1245_v48 }
 0x246   : > { %1794 = vset.pattern.permute.xlu1 %v2136_v20  ;;  %1795 = vset.pattern.permute.xlu2 %v2054_v4 }
 0x247   : > { %v1388_v18 = vadd.f32 %v1387_v34, %v1246_v49  ;;  %v1256_v49 = vmul.f32 %v2248_v52, %v349_v1 }
 0x248   : > { %v819_v39 = vpop.permute.xlu2 %818 }
 0x249   : > { %v1389_v62 = vrot.slane %v1388_v18, 4  ;;  %v1250_v56 = vmul.f32 %v819_v39, %v343_v31  ;;  %v2648_v39 = vld [vmem:[#allocation14_spill] sm:$0xff] }
 0x24b   : > { %v1390_v58 = vadd.f32 %v1389_v62, %v1388_v18  ;;  %v350_v62 = vld [vmem:[%s2039_s8 + $0x250] sm:$0xff] }
 0x24d   : > { %v1391_v27 = vrot.slane %v1390_v58, 2 }
 0x24e   : > { %903 = vperm.xlu1 %1794, %v2154_v22   ;;  %909 = vperm.xlu2 %1795, %v2154_v22  }
 0x24f   : > { %v1392_v45 = vadd.f32 %v1391_v27, %v1390_v58 }
 0x250   : > { %v801_v57 = vpop.permute.xlu1 %800 }
 0x251   : > { %v1393_v50 = vrot.slane %v1392_v45, 1  ;;  %v1247_v26 = vmul.f32 %v801_v57, %v340_v60 }
 0x253   : > { %v1394_v42 = vadd.f32 %v1393_v50, %v1392_v45  ;;  %v1395_v32 = vadd.f32 %v1248_v2, %v1247_v26  ;;  %v352_v2 = vld [vmem:[%s2039_s8 + $0x260] sm:$0xff]  ;;  %v353_v50 = vld [vmem:[%s2039_s8 + $0x268] sm:$0xff]  ;;  %v354_v26 = vld [vmem:[%s2039_s8 + $0x270] sm:$0xff] }
 0x254   : > { %v1261_v31 = vmul.f32 %v2648_v39, %v354_v26 }
 0x255   : > { %v2451_v30 = vsel %vm1491_vm3, %v1394_v42, %v2420_v0  ;;  %v1251_v0 = vmul.f32 %v2242_v51, %v344_v41 }
 0x256   : > { %1798 = vset.pattern.permute.xlu1 %v2059_v6  ;;  %1799 = vset.pattern.permute.xlu2 %v2077_v10 }
 0x258   : > { %v837_v44 = vpop.permute.xlu2 %836 }
 0x259   : > { %v1253_v51 = vmul.f32 %v837_v44, %v346_v46 }
 0x25e   : > { %921 = vperm.xlu1 %1798, %v2154_v22   ;;  %927 = vperm.xlu2 %1799, %v2154_v22  }
 0x260   : > { %v813_v21 = vpop.permute.xlu1 %812 }
 0x261   : > { %v1249_v47 = vmul.f32 %v813_v21, %v342_v55 }
 0x263   : > { %v1396_v35 = vadd.f32 %v1395_v32, %v1249_v47 }
 0x265   : > { %v1397_v29 = vadd.f32 %v1396_v35, %v1250_v56  ;;  %v2649_v56 = vld [vmem:[#allocation13_spill] sm:$0xff] }
 0x266   : > { %1800 = vset.pattern.permute.xlu1 %v2085_v11  ;;  %1801 = vset.pattern.permute.xlu2 %v2088_v12 }
 0x267   : > { %v1398_v59 = vadd.f32 %v1397_v29, %v1251_v0  ;;  %v355_v0 = vld [vmem:[%s2039_s8 + $0x278] sm:$0xff] }
 0x268   : > { %v849_v63 = vpop.permute.xlu2 %848 }
 0x269   : > { %v1255_v48 = vmul.f32 %v849_v63, %v348_v61  ;;  %v359_v63 = vld [vmem:[%s2039_s8 + $0x298] sm:$0xff] }
 0x26e   : > { %933 = vperm.xlu1 %1800, %v2154_v22   ;;  %939 = vperm.xlu2 %1801, %v2154_v22  }
 0x270   : > { %v831_v8 = vpop.permute.xlu1 %830 }
 0x271   : > { %v1252_v40 = vmul.f32 %v831_v8, %v345_v7 }
 0x273   : > { %v1399_v38 = vadd.f32 %v1398_v59, %v1252_v40  ;;  %v356_v40 = vld [vmem:[%s2039_s8 + $0x280] sm:$0xff] }
 0x275   : > { %v1400_v54 = vadd.f32 %v1399_v38, %v1253_v51  ;;  %v357_v51 = vld [vmem:[%s2039_s8 + $0x288] sm:$0xff] }
 0x276   : > { %1803 = vset.pattern.permute.xlu1 %v2100_v14  ;;  %1804 = vset.pattern.permute.xlu2 %v2094_v13 }
 0x278   : > { %v867_v58 = vpop.permute.xlu2 %866 }
 0x279   : > { %v1258_v52 = vmul.f32 %v867_v58, %v351_v25  ;;  %v360_v58 = vld [vmem:[%s2039_s8 + $0x2a0] sm:$0xff]  ;;  %v361_v25 = vld [vmem:[%s2039_s8 + $0x2a8] sm:$0xff] }
 0x27e   : > { %951 = vperm.xlu1 %1803, %v2154_v22   ;;  %957 = vperm.xlu2 %1804, %v2154_v22  }
 0x280   : > { %v843_v43 = vpop.permute.xlu1 %842 }
 0x281   : > { %v1254_v33 = vmul.f32 %v843_v43, %v347_v53 }
 0x283   : > { %v1401_v37 = vadd.f32 %v1400_v54, %v1254_v33  ;;  %v358_v54 = vld [vmem:[%s2039_s8 + $0x290] sm:$0xff] }
 0x285   : > { %v1402_v34 = vadd.f32 %v1401_v37, %v1255_v48 }
 0x286   : > { %1805 = vset.pattern.permute.xlu1 %v2112_v16  ;;  %1806 = vset.pattern.permute.xlu2 %v2115_v17 }
 0x287   : > { %v1403_v18 = vadd.f32 %v1402_v34, %v1256_v49  ;;  %v2650_v49 = vld [vmem:[#allocation15_spill] sm:$0xff] }
 0x288   : > { %v879_v57 = vpop.permute.xlu2 %878  ;;  %v1266_v37 = vmul.f32 %v2650_v49, %v359_v63  ;;  %v371_v49 = vld [vmem:[%s2039_s8 + $0x2f8] sm:$0xff] }
 0x289   : > { %v1260_v55 = vmul.f32 %v879_v57, %v353_v50  ;;  %v363_v57 = vld [vmem:[%s2039_s8 + $0x2b8] sm:$0xff]  ;;  %v364_v50 = vld [vmem:[%s2039_s8 + $0x2c0] sm:$0xff] }
 0x28e   : > { %963 = vperm.xlu1 %1805, %v2154_v22   ;;  %969 = vperm.xlu2 %1806, %v2154_v22  }
 0x290   : > { %v861_v36 = vpop.permute.xlu1 %860 }
 0x291   : > { %v1257_v27 = vmul.f32 %v861_v36, %v350_v62 }
 0x293   : > { %v1404_v60 = vadd.f32 %v1403_v18, %v1257_v27 }
 0x295   : > { %v1405_v45 = vadd.f32 %v1404_v60, %v1258_v52 }
 0x296   : > { %1808 = vset.pattern.permute.xlu1 %v2127_v19  ;;  %1809 = vset.pattern.permute.xlu2 %v2106_v15 }
 0x298   : > { %v898_v7 = vpop.permute.xlu2 %897 }
 0x299   : > { %v1263_v43 = vmul.f32 %v898_v7, %v356_v40 }
 0x29e   : > { %981 = vperm.xlu1 %1808, %v2154_v22   ;;  %987 = vperm.xlu2 %1809, %v2154_v22  }
 0x2a0   : > { %v873_v42 = vpop.permute.xlu1 %872 }
 0x2a1   : > { %v1259_v32 = vmul.f32 %v873_v42, %v352_v2 }
 0x2a3   : > { %v1406_v41 = vadd.f32 %v1405_v45, %v1259_v32 }
 0x2a5   : > { %v1407_v21 = vadd.f32 %v1406_v41, %v1260_v55  ;;  %v2651_v55 = vld [vmem:[#allocation17_spill] sm:$0xff] }
 0x2a6   : > { %1810 = vset.pattern.permute.xlu1 %v2050_v3  ;;  %1811 = vset.pattern.permute.xlu2 %v2136_v20  ;;  %v1271_v39 = vmul.f32 %v2651_v55, %v364_v50 }
 0x2a7   : > { %v1408_v47 = vadd.f32 %v1407_v21, %v1261_v31 }
 0x2a8   : > { %v910_v38 = vpop.permute.xlu2 %909 }
 0x2a9   : > { %v1265_v48 = vmul.f32 %v910_v38, %v358_v54  ;;  %v2652_v54 = vld [vmem:[#allocation18_spill] sm:$0xff] }
 0x2ae   : > { %994 = vperm.xlu1 %1810, %v2649_v56   ;;  %1000 = vperm.xlu2 %1811, %v2649_v56  }
 0x2b0   : > { %v891_v22 = vpop.permute.xlu1 %890 }
 0x2b1   : > { %v1262_v35 = vmul.f32 %v891_v22, %v355_v0  ;;  %v366_v22 = vld [vmem:[%s2039_s8 + $0x2d0] sm:$0xff] }
 0x2b3   : > { %v1409_v29 = vadd.f32 %v1408_v47, %v1262_v35  ;;  %v365_v47 = vld [vmem:[%s2039_s8 + $0x2c8] sm:$0xff] }
 0x2b5   : > { %v1410_v59 = vrot.slane %v1409_v29, 4 }
 0x2b6   : > { %1813 = vset.pattern.permute.xlu1 %v2073_v9  ;;  %1814 = vset.pattern.permute.xlu2 %v2059_v6 }
 0x2b7   : > { %v1411_v20 = vadd.f32 %v1410_v59, %v1409_v29 }
 0x2b9   : > { %v1412_v44 = vrot.slane %v1411_v20, 2 }
 0x2bb   : > { %v1413_v46 = vadd.f32 %v1412_v44, %v1411_v20 }
 0x2bd   : > { %v1414_v8 = vrot.slane %v1413_v46, 1 }
 0x2be   : > { %1012 = vperm.xlu1 %1813, %v2649_v56   ;;  %1018 = vperm.xlu2 %1814, %v2649_v56  }
 0x2bf   : > { %v1415_v53 = vadd.f32 %v1414_v8, %v1413_v46  ;;  %v368_v46 = vld [vmem:[%s2039_s8 + $0x2e0] sm:$0xff]  ;;  %v369_v8 = vld [vmem:[%s2039_s8 + $0x2e8] sm:$0xff] }
 0x2c0   : > { %v904_v61 = vpop.permute.xlu1 %903 }
 0x2c1   : > { %v2503_v1 = vsel %vm1493_vm4, %v1415_v53, %v2451_v30  ;;  %v1264_v33 = vmul.f32 %v904_v61, %v357_v51  ;;  %v928_v30 = vpop.permute.xlu2 %927  ;;  %v1276_v53 = vmul.f32 %v2652_v54, %v369_v8  ;;  %v381_v54 = vld [vmem:[%s2039_s8 + $0x348] sm:$0xff] }
 0x2c2   : > { %v1268_v52 = vmul.f32 %v928_v30, %v361_v25 }
 0x2c3   : > { %v1416_v34 = vadd.f32 %v1264_v33, %v1263_v43  ;;  %v370_v33 = vld [vmem:[%s2039_s8 + $0x2f0] sm:$0xff] }
 0x2c5   : > { %v1417_v18 = vadd.f32 %v1416_v34, %v1265_v48 }
 0x2c6   : > { %1815 = vset.pattern.permute.xlu1 %v2077_v10  ;;  %1816 = vset.pattern.permute.xlu2 %v2085_v11  ;;  %v362_v11 = vld [vmem:[%s2039_s8 + $0x2b0] sm:$0xff] }
 0x2c7   : > { %v1418_v62 = vadd.f32 %v1417_v18, %v1266_v37  ;;  %v2653_v37 = vld [vmem:[#allocation16_spill] sm:$0xff] }
 0x2c9   : > { %v940_v2 = vpop.permute.xlu2 %939 }
 0x2ca   : > { %v1270_v32 = vmul.f32 %v940_v2, %v363_v57  ;;  %v2654_v57 = vld [vmem:[#allocation19_spill] sm:$0xff] }
 0x2ce   : > { %1024 = vperm.xlu1 %1815, %v2649_v56   ;;  %1030 = vperm.xlu2 %1816, %v2649_v56  }
 0x2d0   : > { %v922_v36 = vpop.permute.xlu1 %921 }
 0x2d1   : > { %v1267_v27 = vmul.f32 %v922_v36, %v360_v58 }
 0x2d3   : > { %v1419_v60 = vadd.f32 %v1418_v62, %v1267_v27  ;;  %v373_v27 = vld [vmem:[%s2039_s8 + $0x308] sm:$0xff] }
 0x2d5   : > { %v1420_v45 = vadd.f32 %v1419_v60, %v1268_v52  ;;  %v374_v60 = vld [vmem:[%s2039_s8 + $0x310] sm:$0xff] }
 0x2d6   : > { %1818 = vset.pattern.permute.xlu1 %v2160_v23  ;;  %1819 = vset.pattern.permute.xlu2 %v2100_v14 }
 0x2d8   : > { %v958_v0 = vpop.permute.xlu2 %957 }
 0x2d9   : > { %v1273_v59 = vmul.f32 %v958_v0, %v366_v22 }
 0x2de   : > { %1042 = vperm.xlu1 %1818, %v2649_v56   ;;  %1048 = vperm.xlu2 %1819, %v2649_v56  }
 0x2e0   : > { %v934_v26 = vpop.permute.xlu1 %933 }
 0x2e1   : > { %v1269_v42 = vmul.f32 %v934_v26, %v362_v11 }
 0x2e3   : > { %v1421_v31 = vadd.f32 %v1420_v45, %v1269_v42  ;;  %v372_v45 = vld [vmem:[%s2039_s8 + $0x300] sm:$0xff] }
 0x2e5   : > { %v1422_v41 = vadd.f32 %v1421_v31, %v1270_v32 }
 0x2e6   : > { %1820 = vset.pattern.permute.xlu1 %v2094_v13  ;;  %1821 = vset.pattern.permute.xlu2 %v2112_v16  ;;  %v367_v16 = vld [vmem:[%s2039_s8 + $0x2d8] sm:$0xff] }
 0x2e7   : > { %v1423_v21 = vadd.f32 %v1422_v41, %v1271_v39  ;;  %v375_v39 = vld [vmem:[%s2039_s8 + $0x318] sm:$0xff]  ;;  %v376_v41 = vld [vmem:[%s2039_s8 + $0x320] sm:$0xff] }
 0x2e8   : > { %v970_v44 = vpop.permute.xlu2 %969 }
 0x2e9   : > { %v1275_v38 = vmul.f32 %v970_v44, %v368_v46 }
 0x2ee   : > { %1054 = vperm.xlu1 %1820, %v2649_v56   ;;  %1060 = vperm.xlu2 %1821, %v2649_v56  }
 0x2f0   : > { %v952_v35 = vpop.permute.xlu1 %951 }
 0x2f1   : > { %v1272_v29 = vmul.f32 %v952_v35, %v365_v47  ;;  %v378_v35 = vld [vmem:[%s2039_s8 + $0x330] sm:$0xff] }
 0x2f3   : > { %v1424_v7 = vadd.f32 %v1423_v21, %v1272_v29  ;;  %v379_v29 = vld [vmem:[%s2039_s8 + $0x338] sm:$0xff] }
 0x2f5   : > { %v1425_v20 = vadd.f32 %v1424_v7, %v1273_v59 }
 0x2f6   : > { %1823 = vset.pattern.permute.xlu1 %v2172_v24  ;;  %1824 = vset.pattern.permute.xlu2 %v2127_v19 }
 0x2f8   : > { %v988_v48 = vpop.permute.xlu2 %987 }
 0x2f9   : > { %v1278_v62 = vmul.f32 %v988_v48, %v371_v49 }
 0x2fe   : > { %1072 = vperm.xlu1 %1823, %v2649_v56   ;;  %1078 = vperm.xlu2 %1824, %v2649_v56  }
 0x300   : > { %v964_v40 = vpop.permute.xlu1 %963 }
 0x301   : > { %v1274_v51 = vmul.f32 %v964_v40, %v367_v16  ;;  %v2655_v16 = vld [vmem:[#allocation20_spill] sm:$0xff]  ;;  %v380_v40 = vld [vmem:[%s2039_s8 + $0x340] sm:$0xff] }
 0x302   : > { %v1286_v44 = vmul.f32 %v2655_v16, %v379_v29 }
 0x303   : > { %v1426_v63 = vadd.f32 %v1425_v20, %v1274_v51 }
 0x305   : > { %v1427_v61 = vadd.f32 %v1426_v63, %v1275_v38 }
 0x306   : > { %1825 = vset.pattern.permute.xlu1 %v2106_v15  ;;  %1826 = vset.pattern.permute.xlu2 %v2050_v3 }
 0x307   : > { %v1428_v43 = vadd.f32 %v1427_v61, %v1276_v53  ;;  %v383_v61 = vld [vmem:[%s2039_s8 + $0x358] sm:$0xff] }
 0x308   : > { %v1001_v36 = vpop.permute.xlu2 %1000 }
 0x309   : > { %v1280_v2 = vmul.f32 %v1001_v36, %v373_v27  ;;  %v386_v36 = vld [vmem:[%s2039_s8 + $0x370] sm:$0xff] }
 0x30e   : > { %1084 = vperm.xlu1 %1825, %v2649_v56   ;;  %1091 = vperm.xlu2 %1826, %v2653_v37  }
 0x310   : > { %v982_v34 = vpop.permute.xlu1 %981 }
 0x311   : > { %v1277_v18 = vmul.f32 %v982_v34, %v370_v33  ;;  %v2656_v34 = vld [vmem:[#allocation21_spill] sm:$0xff] }
 0x313   : > { %v1429_v58 = vadd.f32 %v1428_v43, %v1277_v18  ;;  %v384_v43 = vld [vmem:[%s2039_s8 + $0x360] sm:$0xff] }
 0x315   : > { %v1430_v30 = vadd.f32 %v1429_v58, %v1278_v62 }
 0x316   : > { %1828 = vset.pattern.permute.xlu1 %v2054_v4  ;;  %1829 = vset.pattern.permute.xlu2 %v2073_v9  ;;  %v1281_v9 = vmul.f32 %v2654_v57, %v374_v60  ;;  %v387_v60 = vld [vmem:[%s2039_s8 + $0x378] sm:$0xff] }
 0x317   : > { %v1431_v3 = vrot.slane %v1430_v30, 4 }
 0x318   : > { %v1019_v31 = vpop.permute.xlu2 %1018 }
 0x319   : > { %v1432_v25 = vadd.f32 %v1431_v3, %v1430_v30  ;;  %v385_v3 = vld [vmem:[%s2039_s8 + $0x368] sm:$0xff] }
 0x31b   : > { %v1433_v56 = vrot.slane %v1432_v25, 2 }
 0x31d   : > { %v1434_v52 = vadd.f32 %v1433_v56, %v1432_v25 }
 0x31e   : > { %1103 = vperm.xlu1 %1828, %v2653_v37   ;;  %1109 = vperm.xlu2 %1829, %v2653_v37  }
 0x31f   : > { %v1435_v11 = vrot.slane %v1434_v52, 1 }
 0x320   : > { %v995_v4 = vpop.permute.xlu1 %994 }
 0x321   : > { %v1436_v50 = vadd.f32 %v1435_v11, %v1434_v52  ;;  %v1279_v26 = vmul.f32 %v995_v4, %v372_v45 }
 0x323   : > { %v2549_v42 = vsel %vm1495_vm5, %v1436_v50, %v2503_v1  ;;  %v1437_v32 = vadd.f32 %v1280_v2, %v1279_v26  ;;  %v1283_v1 = vmul.f32 %v1019_v31, %v376_v41  ;;  %v390_v41 = vld [vmem:[%s2039_s8 + $0x390] sm:$0xff] }
 0x325   : > { %v1438_v55 = vadd.f32 %v1437_v32, %v1281_v9 }
 0x326   : > { %1830 = vset.pattern.permute.xlu1 %v2059_v6  ;;  %1831 = vset.pattern.permute.xlu2 %v2077_v10  ;;  %v377_v6 = vld [vmem:[%s2039_s8 + $0x328] sm:$0xff] }
 0x328   : > { %v1031_v10 = vpop.permute.xlu2 %1030 }
 0x329   : > { %v1285_v20 = vmul.f32 %v1031_v10, %v378_v35  ;;  %v392_v35 = vld [vmem:[%s2039_s8 + $0x3a0] sm:$0xff] }
 0x32e   : > { %1115 = vperm.xlu1 %1830, %v2653_v37   ;;  %1121 = vperm.xlu2 %1831, %v2653_v37  }
 0x330   : > { %v1013_v21 = vpop.permute.xlu1 %1012 }
 0x331   : > { %v1282_v47 = vmul.f32 %v1013_v21, %v375_v39  ;;  %v388_v39 = vld [vmem:[%s2039_s8 + $0x380] sm:$0xff] }
 0x333   : > { %v1439_v0 = vadd.f32 %v1438_v55, %v1282_v47  ;;  %v389_v55 = vld [vmem:[%s2039_s8 + $0x388] sm:$0xff] }
 0x334   : > { %v1296_v47 = vmul.f32 %v2372_v5, %v389_v55 }
 0x335   : > { %v1440_v22 = vadd.f32 %v1439_v0, %v1283_v1 }
 0x336   : > { %1833 = vset.pattern.permute.xlu1 %v2088_v12  ;;  %1834 = vset.pattern.permute.xlu2 %v2160_v23 }
 0x338   : > { %v1049_v51 = vpop.permute.xlu2 %1048 }
 0x33e   : > { %1133 = vperm.xlu1 %1833, %v2653_v37   ;;  %1139 = vperm.xlu2 %1834, %v2653_v37  }
 0x340   : > { %v1025_v59 = vpop.permute.xlu1 %1024 }
 0x341   : > { %v1284_v7 = vmul.f32 %v1025_v59, %v377_v6 }
 0x343   : > { %v1441_v46 = vadd.f32 %v1440_v22, %v1284_v7  ;;  %v391_v22 = vld [vmem:[%s2039_s8 + $0x398] sm:$0xff] }
 0x345   : > { %v1442_v8 = vadd.f32 %v1441_v46, %v1285_v20  ;;  %v393_v20 = vld [vmem:[%s2039_s8 + $0x3a8] sm:$0xff] }
 0x346   : > { %1835 = vset.pattern.permute.xlu1 %v2100_v14  ;;  %1836 = vset.pattern.permute.xlu2 %v2094_v13  ;;  %v1288_v14 = vmul.f32 %v1049_v51, %v381_v54  ;;  %v382_v13 = vld [vmem:[%s2039_s8 + $0x350] sm:$0xff]  ;;  %v396_v54 = vld [vmem:[%s2039_s8 + $0x3c0] sm:$0xff] }
 0x347   : > { %v1443_v12 = vadd.f32 %v1442_v8, %v1286_v44  ;;  %v394_v8 = vld [vmem:[%s2039_s8 + $0x3b0] sm:$0xff] }
 0x348   : > { %v1061_v63 = vpop.permute.xlu2 %1060 }
 0x34e   : > { %1145 = vperm.xlu1 %1835, %v2653_v37   ;;  %1151 = vperm.xlu2 %1836, %v2653_v37  }
 0x350   : > { %v1043_v23 = vpop.permute.xlu1 %1042 }
 0x351   : > { %v1287_v38 = vmul.f32 %v1043_v23, %v380_v40  ;;  %v1301_v40 = vmul.f32 %v2394_v28, %v394_v8 }
 0x353   : > { %v1444_v53 = vadd.f32 %v1443_v12, %v1287_v38  ;;  %v395_v12 = vld [vmem:[%s2039_s8 + $0x3b8] sm:$0xff] }
 0x355   : > { %v1445_v48 = vadd.f32 %v1444_v53, %v1288_v14  ;;  %v1158_v14 = vpop.permute.xlu0 %1157 }
 0x356   : > { %1837 = vset.pattern.permute.xlu1 %v2115_v17  ;;  %1838 = vset.pattern.permute.xlu2 %v2172_v24  ;;  %v1290_v17 = vmul.f32 %v1061_v63, %v383_v61  ;;  %v1291_v24 = vmul.f32 %v2656_v34, %v384_v43  ;;  %v397_v63 = vld [vmem:[%s2039_s8 + $0x3c8] sm:$0xff] }
 0x358   : > { %v1079_v56 = vpop.permute.xlu2 %1078 }
 0x359   : > { %v1293_v52 = vmul.f32 %v1079_v56, %v386_v36 }
 0x35d   : > { %v1506_v28 = vpop.xlane.xlu0 %1505 }
 0x35e   : > { %1163 = vperm.xlu1 %1837, %v2653_v37   ;;  %1169 = vperm.xlu2 %1838, %v2653_v37  }
 0x360   : > { %v1055_v33 = vpop.permute.xlu1 %1054 }
 0x361   : > { %v1289_v49 = vmul.f32 %v1055_v33, %v382_v13 }
 0x363   : > { %v1446_v18 = vadd.f32 %v1445_v48, %v1289_v49  ;;  %v398_v49 = vld [vmem:[%s2039_s8 + $0x3d0] sm:$0xff] }
 0x365   : > { %v1447_v62 = vadd.f32 %v1446_v18, %v1290_v17  ;;  %v1504_v18 = vld [vmem:[#allocation3] sm:$0xff] }
 0x366   : > { %1839 = vset.pattern.permute.xlu1 %v2127_v19  ;;  %1840 = vset.pattern.permute.xlu2 %v2106_v15 }
 0x367   : > { %v1448_v58 = vadd.f32 %v1447_v62, %v1291_v24  ;;  %v1507_v62 = vadd.f32 %v1506_v28, %v1504_v18 }
 0x368   : > { %v1092_v32 = vpop.permute.xlu2 %1091 }
 0x369   : > { %v1295_v1 = vmul.f32 %v1092_v32, %v388_v39  ;;  %1509 = vst.msk [vmem:[#allocation3] sm:$0xff] %vm1508_vm7, %v1507_v62 }
 0x36b   : > { %v1458_v6 = vadd.f32 %v1296_v47, %v1295_v1  ;;  %v406_v47 = vld [vmem:[#allocation2] sm:$0xff] }
 0x36e   : > { %1175 = vperm.xlu1 %1839, %v2653_v37   ;;  %1181 = vperm.xlu2 %1840, %v2653_v37  }
 0x370   : > { %v1073_v30 = vpop.permute.xlu1 %1072 }
 0x371   : > { %v1292_v25 = vmul.f32 %v1073_v30, %v385_v3  ;;  %v400_v3 = vld [vmem:[%s2039_s8 + $0x3e0] sm:$0xff] }
 0x373   : > { %v1449_v27 = vadd.f32 %v1448_v58, %v1292_v25  ;;  %v399_v58 = vld [vmem:[%s2039_s8 + $0x3d8] sm:$0xff] }
 0x374   : > { %v1306_v36 = vmul.f32 %v1158_v14, %v399_v58 }
 0x375   : > { %v1450_v19 = vadd.f32 %v1449_v27, %v1293_v52  ;;  %v401_v52 = vld [vmem:[%s2039_s8 + $0x3e8] sm:$0xff] }
 0x378   : > { %v1110_v21 = vpop.permute.xlu2 %1109 }
 0x379   : > { %v1298_v29 = vmul.f32 %v1110_v21, %v391_v22 }
 0x380   : > { %v1085_v45 = vpop.permute.xlu1 %1084 }
 0x381   : > { %v1294_v11 = vmul.f32 %v1085_v45, %v387_v60 }
 0x383   : > { %v1451_v15 = vadd.f32 %v1450_v19, %v1294_v11  ;;  %v402_v11 = vld [vmem:[%s2039_s8 + $0x3f0] sm:$0xff] }
 0x385   : > { %v1452_v2 = vrot.slane %v1451_v15, 4 }
 0x387   : > { %v1453_v4 = vadd.f32 %v1452_v2, %v1451_v15  ;;  %v403_v2 = vld [vmem:[%s2039_s8 + $0x3f8] sm:$0xff] }
 0x388   : > { %v1122_v59 = vpop.permute.xlu2 %1121 }
 0x389   : > { %v1454_v57 = vrot.slane %v1453_v4, 2  ;;  %v1300_v46 = vmul.f32 %v1122_v59, %v393_v20 }
 0x38b   : > { %v1455_v37 = vadd.f32 %v1454_v57, %v1453_v4 }
 0x38d   : > { %v1456_v9 = vrot.slane %v1455_v37, 1 }
 0x38f   : > { %v1457_v50 = vadd.f32 %v1456_v9, %v1455_v37 }
 0x390   : > { %v1104_v31 = vpop.permute.xlu1 %1103 }
 0x391   : > { %v2587_v26 = vsel %vm1497_vm6, %v1457_v50, %v2549_v42  ;;  %v1297_v0 = vmul.f32 %v1104_v31, %v390_v41 }
 0x393   : > { %v1459_v42 = vadd.f32 %v1458_v6, %v1297_v0 }
 0x395   : > { %v1460_v16 = vadd.f32 %v1459_v42, %v1298_v29 }
 0x398   : > { %v1140_v23 = vpop.permute.xlu2 %1139 }
 0x399   : > { %v1303_v43 = vmul.f32 %v1140_v23, %v396_v54 }
 0x3a0   : > { %v1116_v10 = vpop.permute.xlu1 %1115 }
 0x3a1   : > { %v1299_v7 = vmul.f32 %v1116_v10, %v392_v35 }
 0x3a3   : > { %v1461_v44 = vadd.f32 %v1460_v16, %v1299_v7 }
 0x3a5   : > { %v1462_v51 = vadd.f32 %v1461_v44, %v1300_v46 }
 0x3a7   : > { %v1463_v53 = vadd.f32 %v1462_v51, %v1301_v40 }
 0x3a8   : > { %v1152_v33 = vpop.permute.xlu2 %1151 }
 0x3a9   : > { %v1305_v24 = vmul.f32 %v1152_v33, %v398_v49 }
 0x3b0   : > { %v1134_v5 = vpop.permute.xlu1 %1133 }
 0x3b1   : > { %v1302_v38 = vmul.f32 %v1134_v5, %v395_v12 }
 0x3b3   : > { %v1464_v61 = vadd.f32 %v1463_v53, %v1302_v38 }
 0x3b5   : > { %v1465_v17 = vadd.f32 %v1464_v61, %v1303_v43 }
 0x3b8   : > { %v1170_v25 = vpop.permute.xlu2 %1169 }
 0x3b9   : > { %v1308_v19 = vmul.f32 %v1170_v25, %v401_v52 }
 0x3c0   : > { %v1146_v13 = vpop.permute.xlu1 %1145 }
 0x3c1   : > { %v1304_v48 = vmul.f32 %v1146_v13, %v397_v63 }
 0x3c3   : > { %v1466_v34 = vadd.f32 %v1465_v17, %v1304_v48 }
 0x3c5   : > { %v1467_v56 = vadd.f32 %v1466_v34, %v1305_v24 }
 0x3c7   : > { %v1468_v60 = vadd.f32 %v1467_v56, %v1306_v36 }
 0x3c8   : > { %v1182_v15 = vpop.permute.xlu2 %1181 }
 0x3c9   : > { %v1310_v9 = vmul.f32 %v1182_v15, %v403_v2 }
 0x3d0   : > { %v1164_v30 = vpop.permute.xlu1 %1163 }
 0x3d1   : > { %v1307_v27 = vmul.f32 %v1164_v30, %v400_v3 }
 0x3d3   : > { %v1469_v45 = vadd.f32 %v1468_v60, %v1307_v27 }
 0x3d5   : > { %v1470_v57 = vadd.f32 %v1469_v45, %v1308_v19 }
 0x3e0   : > { %v1176_v4 = vpop.permute.xlu1 %1175 }
 0x3e1   : > { %v1309_v37 = vmul.f32 %v1176_v4, %v402_v11 }
 0x3e3   : > { %v1471_v50 = vadd.f32 %v1470_v57, %v1309_v37 }
 0x3e5   : > { %v1472_v32 = vadd.f32 %v1471_v50, %v1310_v9 }
 0x3e7   : > { %v1473_v55 = vrot.slane %v1472_v32, 4 }
 0x3e9   : > { %v1474_v39 = vadd.f32 %v1473_v55, %v1472_v32 }
 0x3eb   : > { %v1475_v31 = vrot.slane %v1474_v39, 2 }
 0x3ed   : > { %v1476_v41 = vadd.f32 %v1475_v31, %v1474_v39 }
 0x3ef   : > { %v1477_v21 = vrot.slane %v1476_v41, 1 }
 0x3f1   : > { %v1478_v1 = vadd.f32 %v1477_v21, %v1476_v41 }
 0x3f2   : > { %1513 = sbr.rel (%p1651_p13) target bundleno = 1143 (0x477), region = 44 }
 0x3f3   : > { %v1500_v0 = vsel %vm1499_vm8, %v1478_v1, %v2587_v26 }
 0x3f4   : > { %v1502_v22 = vadd.f32 %v1500_v0, %v406_v47 }
 0x3f6   : > { %1503 = vst [vmem:[#allocation2] sm:$0xff] %v1502_v22 }
 0x3f7   : > { %v1514_v6 = vld [vmem:[#allocation3] sm:$0xff]  ;;  %v1936_v10 = vmov 0  }
 0x3f8   : > { %1842 = vset.pattern.permute.xlu0 %v1936_v10  ;;  %v1515_v35 = vmax.f32 %v1514_v6, 1.0 }
 0x3fa   : > { %1843 = vrcp.f32 %v1515_v35 }
 0x3fd   : > { %v1516_v29 = vld [vmem:[#allocation2] sm:$0xff] }
 0x400   : > { %v1844_v42 = vpop.eup %1843 }
 0x401   : > { %1520 = vperm.xlu0 %1842, %v1844_v42  }
 0x473   : > { %v1521_v59 = vpop.permute.xlu0 %1520 }
 0x474   : > { %v1523_v7 = vmul.f32 %v1521_v59, %v1516_v29 }
 0x476   : > { %1524 = vst [vmem:[%s2632_s2] sm:$0xff] %v1523_v7 }
 0x477 PF: > { %s18_s14 = sadd.s32 1, %s1927_s14   ;;  %s2657_s9 = smov %s1911_s10 }
 0x478   : > { %p15_p0 = scmp.ge.s32.totalorder %s18_s14, 4   ;;  %s2658_s10 = smov %s1915_s11 }
 0x479   : > { %s2659_s11 = smov %s2000_s21  ;;  %s2660_s12 = smov %s1923_s13 }
 0x47a   : > { %s2661_s13 = smov %s2663_s16  ;;  %17 = sbr.rel (!%p15_p0) target bundleno = 6 (0x6), region = 94 }
 0x47f   :  { %1550 = vsyncpa [#allocation5], 1 }
 0x480   :  { %1552 = vsyncpa [#allocation5 + $0x1], 1 }
 0x481   :  { %1553 = vsyncpa [#allocation7], 1 }
 0x482   :  { %1555 = vsyncpa [#allocation7 + $0x1], 1 }

</bundles_post_ra>
